<compile_context>
chip_gen: v7x
topology: tpu7x:2x2x1
jax: 0.10.0
libtpu: 0.0.40
codegen_flags: <defaults>
</compile_context>

<pallas_src>
import functools
import math

import jax
import jax.numpy as jnp
from jax.experimental import pallas as pl
from jax.experimental.pallas import tpu as pltpu

EPS = 1e-5          # nn.InstanceNorm2d default eps
NEG_SLOPE = 0.2     # nn.LeakyReLU(0.2)
CH_ALIGN = 16       # channel padding: bf16 sublane packing is 16 rows / tile


def _round_up(x, m):
    return (x + m - 1) // m * m


# ------------------------------ fused kernel --------------------------------

def _spadain_resblk_kernel(
        x_ref, lr_ref, masks_ref,
        n1_ww_ref, n1_bw_ref, n1_wb_ref, n1_bb_ref,
        w1_ref, b1_ref,
        n2_ww_ref, n2_bw_ref, n2_wb_ref, n2_bb_ref,
        w2_ref, b2_ref, wsc_ref,
        o_ref, stk1_ref, stk2_ref, *, width):
    """Whole SPAdaInResBlk forward for NB samples; layout (C, HW), HW on lanes.

    x_ref:  (NB, Cin_p, HW)   lr_ref: (NB, 3, HW)   masks_ref: (9, 1, HW)
    n*_ww/wb: (C_p, 3) f32    n*_bw/bb: (C_p, 1) f32
    w1: (Cout_p, 9*Cin_p) bf16   w2: (Cout_p, 9*Cout_p) bf16
    b1/b2: (Cout_p, 1) f32       wsc: (Cout_p, Cin_p) bf16
    stk1: (9*Cin_p, HW) bf16 scratch   stk2: (9*Cout_p, HW) bf16 scratch
    """
    nb = x_ref.shape[0]
    hw = x_ref.shape[2]

    # Hoist the (small) weight loads out of the per-sample loop.
    n1_ww = n1_ww_ref[...]; n1_bw = n1_bw_ref[...]
    n1_wb = n1_wb_ref[...]; n1_bb = n1_bb_ref[...]
    n2_ww = n2_ww_ref[...]; n2_bw = n2_bw_ref[...]
    n2_wb = n2_wb_ref[...]; n2_bb = n2_bb_ref[...]
    w1 = w1_ref[...]; b1 = b1_ref[...]
    w2 = w2_ref[...]; b2 = b2_ref[...]
    wsc = wsc_ref[...]

    def spadain_lrelu(h, lr0, lr1, lr2, ww, bw, wb, bb):
        # Single-pass biased InstanceNorm stats: var = E[x^2] - mean^2 (f32);
        # rsqrt goes to the EUP slot.  Zero-padded channels stay exactly 0.
        mean = jnp.mean(h, axis=1, keepdims=True)
        meansq = jnp.mean(h * h, axis=1, keepdims=True)
        var = jnp.maximum(meansq - mean * mean, 0.0)
        hn = (h - mean) * jax.lax.rsqrt(var + EPS)
        # 1x1-conv modulation from the 3-channel guidance map: 3 VPU FMAs.
        wmod = ww[:, 0:1] * lr0 + ww[:, 1:2] * lr1 + ww[:, 2:3] * lr2 + bw
        bmod = wb[:, 0:1] * lr0 + wb[:, 1:2] * lr1 + wb[:, 2:3] * lr2 + bb
        y = wmod * hn + bmod
        return jnp.where(y >= 0.0, y, NEG_SLOPE * y)          # LeakyReLU(0.2)

    def conv3x3(h, w_fused, b, stk_ref):
        # 3x3 / stride-1 / pad-1 conv as ONE fused-K bf16 matmul:
        #   build stacked operand (9*C, HW) in VMEM scratch from lane-rolled
        #   (XLU) + border-masked views; the mask multiply rides in the same
        #   pass as the f32->bf16 cast/store; then
        #   acc(Cout,HW) = W_fused(Cout,9*C) @ stacked(9*C,HW)  [f32 accum].
        c = h.shape[0]
        tap = 0
        for dy in (-1, 0, 1):
            for dx in (-1, 0, 1):
                if dy == 0 and dx == 0:
                    v = h                                      # center tap
                else:
                    shift = (-(dy * width + dx)) % hw
                    v = pltpu.roll(h, shift=shift, axis=1) * masks_ref[tap]
                stk_ref[tap * c:(tap + 1) * c, :] = v.astype(stk_ref.dtype)
                tap += 1
        acc = jnp.dot(w_fused, stk_ref[...],
                      preferred_element_type=jnp.float32)
        return acc + b

    inv_sqrt2 = 1.0 / math.sqrt(2.0)

    # Static unrolled loop over the samples of this grid step (NB is small and
    # compile-time constant); amortizes the per-grid-step pipeline overhead.
    for s in range(nb):
        x = x_ref[s].astype(jnp.float32)          # (Cin_p, HW)
        lr = lr_ref[s].astype(jnp.float32)        # (3,  HW)
        lr0, lr1, lr2 = lr[0:1, :], lr[1:2, :], lr[2:3, :]

        h = spadain_lrelu(x, lr0, lr1, lr2, n1_ww, n1_bw, n1_wb, n1_bb)
        h = conv3x3(h, w1, b1, stk1_ref)
        h = spadain_lrelu(h, lr0, lr1, lr2, n2_ww, n2_bw, n2_wb, n2_bb)
        h = conv3x3(h, w2, b2, stk2_ref)

        # Learned 1x1 shortcut (no bias) + residual, 1/sqrt(2) in the epilogue.
        sc = jnp.dot(wsc, x.astype(jnp.bfloat16),
                     preferred_element_type=jnp.float32)
        o_ref[s] = ((sc + h) * inv_sqrt2).astype(o_ref.dtype)


# --------------------------------- wrapper -----------------------------------

def _tap_masks(h, w):
    """(9, 1, H*W) f32 validity masks for the 9 conv taps (zero padding at borders)."""
    yy, xx = jnp.meshgrid(jnp.arange(h), jnp.arange(w), indexing="ij")
    masks = []
    for dy in (-1, 0, 1):
        for dx in (-1, 0, 1):
            valid = ((yy + dy >= 0) & (yy + dy < h) &
                     (xx + dx >= 0) & (xx + dx < w))
            masks.append(valid.reshape(1, h * w))
    return jnp.stack(masks, axis=0).astype(jnp.float32)


def spadain_resblk_forward(x_nchw, lr_nchw, p, *, samples_per_block=1):
    """Pallas implementation of SPAdaInResBlk.forward (downsample/upsample/ms off)."""
    n, c_in, height, width = x_nchw.shape
    hw = height * width
    cin_p, cout_p, c_out = p["cin_p"], p["cout_p"], p["c_out"]
    nb = samples_per_block
    assert n % nb == 0, "samples_per_block must divide the batch size"

    # NCHW -> (N, C, HW) is a pure reshape; channels on sublanes, the HW pixels
    # on the 128-lane axis (lane-dense, full-width unmasked stores).
    x = x_nchw.reshape(n, c_in, hw)
    if cin_p != c_in:                       # channel pad to the bf16 sublane tile
        x = jnp.pad(x, ((0, 0), (0, cin_p - c_in), (0, 0)))
    lr = lr_nchw.reshape(n, 3, hw)
    masks = _tap_masks(height, width)       # tiny (9, 1, HW) constant

    kernel = functools.partial(_spadain_resblk_kernel, width=width)
    batch3 = lambda i: (i, 0, 0)
    const2 = lambda i: (0, 0)
    const3 = lambda i: (0, 0, 0)

    out = pl.pallas_call(
        kernel,
        out_shape=jax.ShapeDtypeStruct((n, cout_p, hw), x_nchw.dtype),
        grid=(n // nb,),
        in_specs=[
            pl.BlockSpec((nb, cin_p, hw), batch3),      # x
            pl.BlockSpec((nb, 3, hw), batch3),          # lr
            pl.BlockSpec((9, 1, hw), const3),           # tap masks
            pl.BlockSpec((cin_p, 3), const2),           # norm1 weight-conv W
            pl.BlockSpec((cin_p, 1), const2),           # norm1 weight-conv b
            pl.BlockSpec((cin_p, 3), const2),           # norm1 bias-conv  W
            pl.BlockSpec((cin_p, 1), const2),           # norm1 bias-conv  b
            pl.BlockSpec((cout_p, 9 * cin_p), const2),  # conv1 fused taps (bf16)
            pl.BlockSpec((cout_p, 1), const2),          # conv1 bias
            pl.BlockSpec((cout_p, 3), const2),          # norm2 weight-conv W
            pl.BlockSpec((cout_p, 1), const2),          # norm2 weight-conv b
            pl.BlockSpec((cout_p, 3), const2),          # norm2 bias-conv  W
            pl.BlockSpec((cout_p, 1), const2),          # norm2 bias-conv  b
            pl.BlockSpec((cout_p, 9 * cout_p), const2), # conv2 fused taps (bf16)
            pl.BlockSpec((cout_p, 1), const2),          # conv2 bias
            pl.BlockSpec((cout_p, cin_p), const2),      # 1x1 shortcut (bf16)
        ],
        out_specs=pl.BlockSpec((nb, cout_p, hw), batch3),
        scratch_shapes=[
            pltpu.VMEM((9 * cin_p, hw), jnp.bfloat16),  # conv1 stacked operand
            pltpu.VMEM((9 * cout_p, hw), jnp.bfloat16), # conv2 stacked operand
        ],
        compiler_params=pltpu.CompilerParams(
            dimension_semantics=("parallel",),          # batch steps shard across TCs
            vmem_limit_bytes=64 * 1024 * 1024),
    )(x, lr, masks,
      p["n1_ww"], p["n1_bw"], p["n1_wb"], p["n1_bb"],
      p["w1"], p["b1"],
      p["n2_ww"], p["n2_bw"], p["n2_wb"], p["n2_bb"],
      p["w2"], p["b2"], p["w_sc"])

    out = out[:, :c_out, :]                              # drop channel padding
    return out.reshape(n, c_out, height, width)          # back to NCHW (pure reshape)


# ------------------------------ parameter setup -------------------------------

def init_params(key, dim_in, dim_out):
    ks = jax.random.split(key, 13)

    def nrm(k, shape, scale=0.1):
        return scale * jax.random.normal(k, shape, jnp.float32)

    # PyTorch-shaped weights (OIHW) / biases
    pt = dict(
        n1_ww=nrm(ks[0], (dim_in, 3, 1, 1)),  n1_bw=nrm(ks[1], (dim_in,)),
        n1_wb=nrm(ks[2], (dim_in, 3, 1, 1)),  n1_bb=nrm(ks[3], (dim_in,)),
        n2_ww=nrm(ks[4], (dim_out, 3, 1, 1)), n2_bw=nrm(ks[5], (dim_out,)),
        n2_wb=nrm(ks[6], (dim_out, 3, 1, 1)), n2_bb=nrm(ks[7], (dim_out,)),
        w1=nrm(ks[8], (dim_out, dim_in, 3, 3)),  b1=nrm(ks[9], (dim_out,)),
        w2=nrm(ks[10], (dim_out, dim_out, 3, 3)), b2=nrm(ks[11], (dim_out,)),
        w_sc=nrm(ks[12], (dim_out, dim_in, 1, 1)),
    )

    cin_p = _round_up(dim_in, CH_ALIGN)
    cout_p = _round_up(dim_out, CH_ALIGN)

    def mod_w(w, cp):     # (C, 3, 1, 1) -> (Cp, 3), zero-padded rows, f32
        w2 = w[:, :, 0, 0]
        return jnp.pad(w2, ((0, cp - w2.shape[0]), (0, 0)))

    def col(b, cp):       # (C,) -> (Cp, 1), f32
        return jnp.pad(b, (0, cp - b.shape[0])).reshape(-1, 1)

    def conv_fused(w, cop, cip):
        # (Cout, Cin, 3, 3) -> (Cout_p, 9*Cin_p) bf16, column index = tap*Cin_p + ci
        # with tap = kh*3 + kw, matching the in-kernel stacking order.
        co, ci = w.shape[0], w.shape[1]
        wp = jnp.zeros((cop, cip, 3, 3), jnp.float32).at[:co, :ci].set(w)
        return jnp.transpose(wp, (0, 2, 3, 1)).reshape(cop, 9 * cip).astype(jnp.bfloat16)

    def sc_w(w, cop, cip):  # (Cout, Cin, 1, 1) -> (Cout_p, Cin_p) bf16
        w2 = w[:, :, 0, 0]
        return jnp.pad(w2, ((0, cop - w2.shape[0]),
                            (0, cip - w2.shape[1]))).astype(jnp.bfloat16)

    kp = dict(
        n1_ww=mod_w(pt["n1_ww"], cin_p),  n1_bw=col(pt["n1_bw"], cin_p),
        n1_wb=mod_w(pt["n1_wb"], cin_p),  n1_bb=col(pt["n1_bb"], cin_p),
        n2_ww=mod_w(pt["n2_ww"], cout_p), n2_bw=col(pt["n2_bw"], cout_p),
        n2_wb=mod_w(pt["n2_wb"], cout_p), n2_bb=col(pt["n2_bb"], cout_p),
        w1=conv_fused(pt["w1"], cout_p, cin_p),  b1=col(pt["b1"], cout_p),
        w2=conv_fused(pt["w2"], cout_p, cout_p), b2=col(pt["b2"], cout_p),
        w_sc=sc_w(pt["w_sc"], cout_p, cin_p),
        c_out=dim_out, cin_p=cin_p, cout_p=cout_p,
    )
    return kp, pt


# --------------------- pure-JAX reference (for checking) ----------------------

def _ref_conv2d(x, w, b=None, pad=0):
    out = jax.lax.conv_general_dilated(
        x, w, window_strides=(1, 1), padding=[(pad, pad), (pad, pad)],
        dimension_numbers=("NCHW", "OIHW", "NCHW"))
    if b is not None:
        out = out + b.reshape(1, -1, 1, 1)
    return out


def _ref_in(x):
    mean = x.mean(axis=(2, 3), keepdims=True)
    var = ((x - mean) ** 2).mean(axis=(2, 3), keepdims=True)
    return (x - mean) / jnp.sqrt(var + EPS)


def _ref_lrelu(x):
    return jnp.where(x >= 0, x, NEG_SLOPE * x)


def reference_forward(x, lr, pt):
    h = _ref_in(x)
    w = _ref_conv2d(lr, pt["n1_ww"], pt["n1_bw"])
    b = _ref_conv2d(lr, pt["n1_wb"], pt["n1_bb"])
    h = _ref_lrelu(w * h + b)
    h = _ref_conv2d(h, pt["w1"], pt["b1"], pad=1)
    h2 = _ref_in(h)
    w = _ref_conv2d(lr, pt["n2_ww"], pt["n2_bw"])
    b = _ref_conv2d(lr, pt["n2_wb"], pt["n2_bb"])
    h2 = _ref_lrelu(w * h2 + b)
    h2 = _ref_conv2d(h2, pt["w2"], pt["b2"], pad=1)
    sc = _ref_conv2d(x, pt["w_sc"])
    return (sc + h2) / math.sqrt(2.0)


# ------------------------------------ main ------------------------------------

if __name__ == "__main__":
    key = jax.random.PRNGKey(0)
    # N=4 with samples_per_block=2 -> grid=(2,): per-step overhead amortized
    # while keeping an even, >=2 step count for the two v7x TensorCores.
    N, dim_in, dim_out, H, W = 4, 4, 8, 16, 16

    kx, klr, kp = jax.random.split(key, 3)
    x = jax.random.normal(kx, (N, dim_in, H, W), jnp.float32)
    lr = jax.random.normal(klr, (N, 3, H, W), jnp.float32)
    params, pt_params = init_params(kp, dim_in, dim_out)

    out = spadain_resblk_forward(x, lr, params, samples_per_block=2)
    out = jax.block_until_ready(out)

    assert out.shape == (N, dim_out, H, W), out.shape
    ref = reference_forward(x, lr, pt_params)
    max_err = float(jnp.max(jnp.abs(out - ref)))
    # bf16 MXU operands (f32 accumulation) -> loosened tolerance vs f32 reference.
    assert jnp.allclose(out, ref, rtol=3e-2, atol=3e-2), f"max_err={max_err}"

    print("KERNEL_OK")
</pallas_src>

<mosaic_0001>
module attributes {stable_mosaic.version = 11 : i64} {
  func.func @_spadain_resblk_kernel(%arg0: i32, %arg1: memref<2x16x256xf32, #tpu.memory_space<vmem>>, %arg2: memref<2x3x256xf32, #tpu.memory_space<vmem>>, %arg3: memref<9x1x256xf32, #tpu.memory_space<vmem>>, %arg4: memref<16x3xf32, #tpu.memory_space<vmem>>, %arg5: memref<16x1xf32, #tpu.memory_space<vmem>>, %arg6: memref<16x3xf32, #tpu.memory_space<vmem>>, %arg7: memref<16x1xf32, #tpu.memory_space<vmem>>, %arg8: memref<16x144xbf16, #tpu.memory_space<vmem>>, %arg9: memref<16x1xf32, #tpu.memory_space<vmem>>, %arg10: memref<16x3xf32, #tpu.memory_space<vmem>>, %arg11: memref<16x1xf32, #tpu.memory_space<vmem>>, %arg12: memref<16x3xf32, #tpu.memory_space<vmem>>, %arg13: memref<16x1xf32, #tpu.memory_space<vmem>>, %arg14: memref<16x144xbf16, #tpu.memory_space<vmem>>, %arg15: memref<16x1xf32, #tpu.memory_space<vmem>>, %arg16: memref<16x16xbf16, #tpu.memory_space<vmem>>, %arg17: memref<2x16x256xf32, #tpu.memory_space<vmem>>, %arg18: memref<144x256xbf16, #tpu.memory_space<vmem>>, %arg19: memref<144x256xbf16, #tpu.memory_space<vmem>>) attributes {dimension_semantics = [#tpu.dimension_semantics<parallel>], iteration_bounds = array<i64: 2>, scalar_prefetch = 0 : i64, scratch_operands = 2 : i64, tpu.core_type = #tpu.core_type<tc>, window_params = [{transform_indices = @transform_0, window_bounds = array<i64: 2, 16, 256>}, {transform_indices = @transform_1, window_bounds = array<i64: 2, 3, 256>}, {pipeline_mode = #tpu.pipeline_mode<synchronous>, transform_indices = @transform_2, window_bounds = array<i64: 9, 1, 256>}, {pipeline_mode = #tpu.pipeline_mode<synchronous>, transform_indices = @transform_3, window_bounds = array<i64: 16, 3>}, {pipeline_mode = #tpu.pipeline_mode<synchronous>, transform_indices = @transform_4, window_bounds = array<i64: 16, 1>}, {pipeline_mode = #tpu.pipeline_mode<synchronous>, transform_indices = @transform_5, window_bounds = array<i64: 16, 3>}, {pipeline_mode = #tpu.pipeline_mode<synchronous>, transform_indices = @transform_6, window_bounds = array<i64: 16, 1>}, {pipeline_mode = #tpu.pipeline_mode<synchronous>, transform_indices = @transform_7, window_bounds = array<i64: 16, 144>}, {pipeline_mode = #tpu.pipeline_mode<synchronous>, transform_indices = @transform_8, window_bounds = array<i64: 16, 1>}, {pipeline_mode = #tpu.pipeline_mode<synchronous>, transform_indices = @transform_9, window_bounds = array<i64: 16, 3>}, {pipeline_mode = #tpu.pipeline_mode<synchronous>, transform_indices = @transform_10, window_bounds = array<i64: 16, 1>}, {pipeline_mode = #tpu.pipeline_mode<synchronous>, transform_indices = @transform_11, window_bounds = array<i64: 16, 3>}, {pipeline_mode = #tpu.pipeline_mode<synchronous>, transform_indices = @transform_12, window_bounds = array<i64: 16, 1>}, {pipeline_mode = #tpu.pipeline_mode<synchronous>, transform_indices = @transform_13, window_bounds = array<i64: 16, 144>}, {pipeline_mode = #tpu.pipeline_mode<synchronous>, transform_indices = @transform_14, window_bounds = array<i64: 16, 1>}, {pipeline_mode = #tpu.pipeline_mode<synchronous>, transform_indices = @transform_15, window_bounds = array<i64: 16, 16>}, {transform_indices = @transform_16, window_bounds = array<i64: 2, 16, 256>}]} {
    %c0 = arith.constant 0 : index
    %c0_0 = arith.constant 0 : index
    %0 = vector.load %arg4[%c0, %c0_0] : memref<16x3xf32, #tpu.memory_space<vmem>>, vector<16x3xf32>
    %c0_1 = arith.constant 0 : index
    %c0_2 = arith.constant 0 : index
    %1 = vector.load %arg5[%c0_1, %c0_2] : memref<16x1xf32, #tpu.memory_space<vmem>>, vector<16x1xf32>
    %c0_3 = arith.constant 0 : index
    %c0_4 = arith.constant 0 : index
    %2 = vector.load %arg6[%c0_3, %c0_4] : memref<16x3xf32, #tpu.memory_space<vmem>>, vector<16x3xf32>
    %c0_5 = arith.constant 0 : index
    %c0_6 = arith.constant 0 : index
    %3 = vector.load %arg7[%c0_5, %c0_6] : memref<16x1xf32, #tpu.memory_space<vmem>>, vector<16x1xf32>
    %c0_7 = arith.constant 0 : index
    %c0_8 = arith.constant 0 : index
    %4 = vector.load %arg10[%c0_7, %c0_8] : memref<16x3xf32, #tpu.memory_space<vmem>>, vector<16x3xf32>
    %c0_9 = arith.constant 0 : index
    %c0_10 = arith.constant 0 : index
    %5 = vector.load %arg11[%c0_9, %c0_10] : memref<16x1xf32, #tpu.memory_space<vmem>>, vector<16x1xf32>
    %c0_11 = arith.constant 0 : index
    %c0_12 = arith.constant 0 : index
    %6 = vector.load %arg12[%c0_11, %c0_12] : memref<16x3xf32, #tpu.memory_space<vmem>>, vector<16x3xf32>
    %c0_13 = arith.constant 0 : index
    %c0_14 = arith.constant 0 : index
    %7 = vector.load %arg13[%c0_13, %c0_14] : memref<16x1xf32, #tpu.memory_space<vmem>>, vector<16x1xf32>
    %c0_15 = arith.constant 0 : index
    %c0_16 = arith.constant 0 : index
    %8 = vector.load %arg8[%c0_15, %c0_16] : memref<16x144xbf16, #tpu.memory_space<vmem>>, vector<16x144xbf16>
    %c0_17 = arith.constant 0 : index
    %c0_18 = arith.constant 0 : index
    %9 = vector.load %arg9[%c0_17, %c0_18] : memref<16x1xf32, #tpu.memory_space<vmem>>, vector<16x1xf32>
    %c0_19 = arith.constant 0 : index
    %c0_20 = arith.constant 0 : index
    %10 = vector.load %arg14[%c0_19, %c0_20] : memref<16x144xbf16, #tpu.memory_space<vmem>>, vector<16x144xbf16>
    %c0_21 = arith.constant 0 : index
    %c0_22 = arith.constant 0 : index
    %11 = vector.load %arg15[%c0_21, %c0_22] : memref<16x1xf32, #tpu.memory_space<vmem>>, vector<16x1xf32>
    %c0_23 = arith.constant 0 : index
    %c0_24 = arith.constant 0 : index
    %12 = vector.load %arg16[%c0_23, %c0_24] : memref<16x16xbf16, #tpu.memory_space<vmem>>, vector<16x16xbf16>
    %c0_25 = arith.constant 0 : index
    %c0_26 = arith.constant 0 : index
    %c0_27 = arith.constant 0 : index
    %13 = vector.load %arg1[%c0_25, %c0_26, %c0_27] : memref<2x16x256xf32, #tpu.memory_space<vmem>>, vector<1x16x256xf32>
    %14 = vector.shape_cast %13 : vector<1x16x256xf32> to vector<16x256xf32>
    %c0_28 = arith.constant 0 : index
    %c0_29 = arith.constant 0 : index
    %c0_30 = arith.constant 0 : index
    %15 = vector.load %arg2[%c0_28, %c0_29, %c0_30] : memref<2x3x256xf32, #tpu.memory_space<vmem>>, vector<1x3x256xf32>
    %16 = vector.shape_cast %15 : vector<1x3x256xf32> to vector<3x256xf32>
    %17 = vector.extract_strided_slice %16 {offsets = [0, 0], sizes = [1, 256], strides = [1, 1]} : vector<3x256xf32> to vector<1x256xf32>
    %18 = vector.extract_strided_slice %16 {offsets = [1, 0], sizes = [1, 256], strides = [1, 1]} : vector<3x256xf32> to vector<1x256xf32>
    %19 = vector.extract_strided_slice %16 {offsets = [2, 0], sizes = [1, 256], strides = [1, 1]} : vector<3x256xf32> to vector<1x256xf32>
    %cst = arith.constant dense<0.000000e+00> : vector<16xf32>
    %20 = vector.multi_reduction <add>, %14, %cst [1] : vector<16x256xf32> to vector<16xf32>
    %21 = vector.shape_cast %20 : vector<16xf32> to vector<16x1xf32>
    %cst_31 = arith.constant 2.560000e+02 : f32
    %22 = vector.broadcast %cst_31 : f32 to vector<16x1xf32>
    %23 = arith.divf %21, %22 : vector<16x1xf32>
    %24 = arith.mulf %14, %14 : vector<16x256xf32>
    %cst_32 = arith.constant dense<0.000000e+00> : vector<16xf32>
    %25 = vector.multi_reduction <add>, %24, %cst_32 [1] : vector<16x256xf32> to vector<16xf32>
    %26 = vector.shape_cast %25 : vector<16xf32> to vector<16x1xf32>
    %cst_33 = arith.constant 2.560000e+02 : f32
    %27 = vector.broadcast %cst_33 : f32 to vector<16x1xf32>
    %28 = arith.divf %26, %27 : vector<16x1xf32>
    %29 = arith.mulf %23, %23 : vector<16x1xf32>
    %30 = arith.subf %28, %29 : vector<16x1xf32>
    %cst_34 = arith.constant 0.000000e+00 : f32
    %31 = vector.broadcast %cst_34 : f32 to vector<16x1xf32>
    %32 = arith.maximumf %30, %31 : vector<16x1xf32>
    %33 = vector.broadcast %23 : vector<16x1xf32> to vector<16x256xf32>
    %34 = arith.subf %14, %33 : vector<16x256xf32>
    %cst_35 = arith.constant 9.99999974E-6 : f32
    %35 = vector.broadcast %cst_35 : f32 to vector<16x1xf32>
    %36 = arith.addf %32, %35 : vector<16x1xf32>
    %37 = math.rsqrt %36 : vector<16x1xf32>
    %38 = vector.broadcast %37 : vector<16x1xf32> to vector<16x256xf32>
    %39 = arith.mulf %34, %38 : vector<16x256xf32>
    %40 = vector.extract_strided_slice %0 {offsets = [0, 0], sizes = [16, 1], strides = [1, 1]} : vector<16x3xf32> to vector<16x1xf32>
    %41 = vector.broadcast %40 : vector<16x1xf32> to vector<16x256xf32>
    %42 = vector.broadcast %17 : vector<1x256xf32> to vector<16x256xf32>
    %43 = arith.mulf %41, %42 : vector<16x256xf32>
    %44 = vector.extract_strided_slice %0 {offsets = [0, 1], sizes = [16, 1], strides = [1, 1]} : vector<16x3xf32> to vector<16x1xf32>
    %45 = vector.broadcast %44 : vector<16x1xf32> to vector<16x256xf32>
    %46 = vector.broadcast %18 : vector<1x256xf32> to vector<16x256xf32>
    %47 = arith.mulf %45, %46 : vector<16x256xf32>
    %48 = arith.addf %43, %47 : vector<16x256xf32>
    %49 = vector.extract_strided_slice %0 {offsets = [0, 2], sizes = [16, 1], strides = [1, 1]} : vector<16x3xf32> to vector<16x1xf32>
    %50 = vector.broadcast %49 : vector<16x1xf32> to vector<16x256xf32>
    %51 = vector.broadcast %19 : vector<1x256xf32> to vector<16x256xf32>
    %52 = arith.mulf %50, %51 : vector<16x256xf32>
    %53 = arith.addf %48, %52 : vector<16x256xf32>
    %54 = vector.broadcast %1 : vector<16x1xf32> to vector<16x256xf32>
    %55 = arith.addf %53, %54 : vector<16x256xf32>
    %56 = vector.extract_strided_slice %2 {offsets = [0, 0], sizes = [16, 1], strides = [1, 1]} : vector<16x3xf32> to vector<16x1xf32>
    %57 = vector.broadcast %56 : vector<16x1xf32> to vector<16x256xf32>
    %58 = vector.broadcast %17 : vector<1x256xf32> to vector<16x256xf32>
    %59 = arith.mulf %57, %58 : vector<16x256xf32>
    %60 = vector.extract_strided_slice %2 {offsets = [0, 1], sizes = [16, 1], strides = [1, 1]} : vector<16x3xf32> to vector<16x1xf32>
    %61 = vector.broadcast %60 : vector<16x1xf32> to vector<16x256xf32>
    %62 = vector.broadcast %18 : vector<1x256xf32> to vector<16x256xf32>
    %63 = arith.mulf %61, %62 : vector<16x256xf32>
    %64 = arith.addf %59, %63 : vector<16x256xf32>
    %65 = vector.extract_strided_slice %2 {offsets = [0, 2], sizes = [16, 1], strides = [1, 1]} : vector<16x3xf32> to vector<16x1xf32>
    %66 = vector.broadcast %65 : vector<16x1xf32> to vector<16x256xf32>
    %67 = vector.broadcast %19 : vector<1x256xf32> to vector<16x256xf32>
    %68 = arith.mulf %66, %67 : vector<16x256xf32>
    %69 = arith.addf %64, %68 : vector<16x256xf32>
    %70 = vector.broadcast %3 : vector<16x1xf32> to vector<16x256xf32>
    %71 = arith.addf %69, %70 : vector<16x256xf32>
    %72 = arith.mulf %55, %39 : vector<16x256xf32>
    %73 = arith.addf %72, %71 : vector<16x256xf32>
    %cst_36 = arith.constant 0.000000e+00 : f32
    %74 = vector.broadcast %cst_36 : f32 to vector<16x256xf32>
    %75 = arith.cmpf oge, %73, %74 : vector<16x256xf32>
    %cst_37 = arith.constant 2.000000e-01 : f32
    %76 = vector.broadcast %cst_37 : f32 to vector<16x256xf32>
    %77 = arith.mulf %76, %73 : vector<16x256xf32>
    %78 = arith.select %75, %73, %77 : vector<16x256xi1>, vector<16x256xf32>
    %c17_i32 = arith.constant 17 : i32
    %79 = tpu.dynamic_rotate %78 by %c17_i32 dim 1 : vector<16x256xf32>, i32 -> vector<16x256xf32>
    %c0_38 = arith.constant 0 : index
    %c0_39 = arith.constant 0 : index
    %c0_40 = arith.constant 0 : index
    %80 = vector.load %arg3[%c0_38, %c0_39, %c0_40] : memref<9x1x256xf32, #tpu.memory_space<vmem>>, vector<1x1x256xf32>
    %81 = vector.shape_cast %80 : vector<1x1x256xf32> to vector<1x256xf32>
    %82 = vector.broadcast %81 : vector<1x256xf32> to vector<16x256xf32>
    %83 = arith.mulf %79, %82 : vector<16x256xf32>
    %84 = arith.truncf %83 : vector<16x256xf32> to vector<16x256xbf16>
    %c0_41 = arith.constant 0 : index
    %c0_42 = arith.constant 0 : index
    %85 = vector.load %arg18[%c0_41, %c0_42] : memref<144x256xbf16, #tpu.memory_space<vmem>>, vector<16x256xbf16>
    tpu.vector_store %arg18[%c0_41, %c0_42], %84 {strides = array<i32>} : memref<144x256xbf16, #tpu.memory_space<vmem>>, vector<16x256xbf16>,
    %c16_i32 = arith.constant 16 : i32
    %86 = tpu.dynamic_rotate %78 by %c16_i32 dim 1 : vector<16x256xf32>, i32 -> vector<16x256xf32>
    %c1 = arith.constant 1 : index
    %c0_43 = arith.constant 0 : index
    %c0_44 = arith.constant 0 : index
    %87 = vector.load %arg3[%c1, %c0_43, %c0_44] : memref<9x1x256xf32, #tpu.memory_space<vmem>>, vector<1x1x256xf32>
    %88 = vector.shape_cast %87 : vector<1x1x256xf32> to vector<1x256xf32>
    %89 = vector.broadcast %88 : vector<1x256xf32> to vector<16x256xf32>
    %90 = arith.mulf %86, %89 : vector<16x256xf32>
    %91 = arith.truncf %90 : vector<16x256xf32> to vector<16x256xbf16>
    %c16 = arith.constant 16 : index
    %c0_45 = arith.constant 0 : index
    %92 = vector.load %arg18[%c16, %c0_45] : memref<144x256xbf16, #tpu.memory_space<vmem>>, vector<16x256xbf16>
    tpu.vector_store %arg18[%c16, %c0_45], %91 {strides = array<i32>} : memref<144x256xbf16, #tpu.memory_space<vmem>>, vector<16x256xbf16>,
    %c15_i32 = arith.constant 15 : i32
    %93 = tpu.dynamic_rotate %78 by %c15_i32 dim 1 : vector<16x256xf32>, i32 -> vector<16x256xf32>
    %c2 = arith.constant 2 : index
    %c0_46 = arith.constant 0 : index
    %c0_47 = arith.constant 0 : index
    %94 = vector.load %arg3[%c2, %c0_46, %c0_47] : memref<9x1x256xf32, #tpu.memory_space<vmem>>, vector<1x1x256xf32>
    %95 = vector.shape_cast %94 : vector<1x1x256xf32> to vector<1x256xf32>
    %96 = vector.broadcast %95 : vector<1x256xf32> to vector<16x256xf32>
    %97 = arith.mulf %93, %96 : vector<16x256xf32>
    %98 = arith.truncf %97 : vector<16x256xf32> to vector<16x256xbf16>
    %c32 = arith.constant 32 : index
    %c0_48 = arith.constant 0 : index
    %99 = vector.load %arg18[%c32, %c0_48] : memref<144x256xbf16, #tpu.memory_space<vmem>>, vector<16x256xbf16>
    tpu.vector_store %arg18[%c32, %c0_48], %98 {strides = array<i32>} : memref<144x256xbf16, #tpu.memory_space<vmem>>, vector<16x256xbf16>,
    %c1_i32 = arith.constant 1 : i32
    %100 = tpu.dynamic_rotate %78 by %c1_i32 dim 1 : vector<16x256xf32>, i32 -> vector<16x256xf32>
    %c3 = arith.constant 3 : index
    %c0_49 = arith.constant 0 : index
    %c0_50 = arith.constant 0 : index
    %101 = vector.load %arg3[%c3, %c0_49, %c0_50] : memref<9x1x256xf32, #tpu.memory_space<vmem>>, vector<1x1x256xf32>
    %102 = vector.shape_cast %101 : vector<1x1x256xf32> to vector<1x256xf32>
    %103 = vector.broadcast %102 : vector<1x256xf32> to vector<16x256xf32>
    %104 = arith.mulf %100, %103 : vector<16x256xf32>
    %105 = arith.truncf %104 : vector<16x256xf32> to vector<16x256xbf16>
    %c48 = arith.constant 48 : index
    %c0_51 = arith.constant 0 : index
    %106 = vector.load %arg18[%c48, %c0_51] : memref<144x256xbf16, #tpu.memory_space<vmem>>, vector<16x256xbf16>
    tpu.vector_store %arg18[%c48, %c0_51], %105 {strides = array<i32>} : memref<144x256xbf16, #tpu.memory_space<vmem>>, vector<16x256xbf16>,
    %107 = arith.truncf %78 : vector<16x256xf32> to vector<16x256xbf16>
    %c64 = arith.constant 64 : index
    %c0_52 = arith.constant 0 : index
    %108 = vector.load %arg18[%c64, %c0_52] : memref<144x256xbf16, #tpu.memory_space<vmem>>, vector<16x256xbf16>
    tpu.vector_store %arg18[%c64, %c0_52], %107 {strides = array<i32>} : memref<144x256xbf16, #tpu.memory_space<vmem>>, vector<16x256xbf16>,
    %c255_i32 = arith.constant 255 : i32
    %109 = tpu.dynamic_rotate %78 by %c255_i32 dim 1 : vector<16x256xf32>, i32 -> vector<16x256xf32>
    %c5 = arith.constant 5 : index
    %c0_53 = arith.constant 0 : index
    %c0_54 = arith.constant 0 : index
    %110 = vector.load %arg3[%c5, %c0_53, %c0_54] : memref<9x1x256xf32, #tpu.memory_space<vmem>>, vector<1x1x256xf32>
    %111 = vector.shape_cast %110 : vector<1x1x256xf32> to vector<1x256xf32>
    %112 = vector.broadcast %111 : vector<1x256xf32> to vector<16x256xf32>
    %113 = arith.mulf %109, %112 : vector<16x256xf32>
    %114 = arith.truncf %113 : vector<16x256xf32> to vector<16x256xbf16>
    %c80 = arith.constant 80 : index
    %c0_55 = arith.constant 0 : index
    %115 = vector.load %arg18[%c80, %c0_55] : memref<144x256xbf16, #tpu.memory_space<vmem>>, vector<16x256xbf16>
    tpu.vector_store %arg18[%c80, %c0_55], %114 {strides = array<i32>} : memref<144x256xbf16, #tpu.memory_space<vmem>>, vector<16x256xbf16>,
    %c241_i32 = arith.constant 241 : i32
    %116 = tpu.dynamic_rotate %78 by %c241_i32 dim 1 : vector<16x256xf32>, i32 -> vector<16x256xf32>
    %c6 = arith.constant 6 : index
    %c0_56 = arith.constant 0 : index
    %c0_57 = arith.constant 0 : index
    %117 = vector.load %arg3[%c6, %c0_56, %c0_57] : memref<9x1x256xf32, #tpu.memory_space<vmem>>, vector<1x1x256xf32>
    %118 = vector.shape_cast %117 : vector<1x1x256xf32> to vector<1x256xf32>
    %119 = vector.broadcast %118 : vector<1x256xf32> to vector<16x256xf32>
    %120 = arith.mulf %116, %119 : vector<16x256xf32>
    %121 = arith.truncf %120 : vector<16x256xf32> to vector<16x256xbf16>
    %c96 = arith.constant 96 : index
    %c0_58 = arith.constant 0 : index
    %122 = vector.load %arg18[%c96, %c0_58] : memref<144x256xbf16, #tpu.memory_space<vmem>>, vector<16x256xbf16>
    tpu.vector_store %arg18[%c96, %c0_58], %121 {strides = array<i32>} : memref<144x256xbf16, #tpu.memory_space<vmem>>, vector<16x256xbf16>,
    %c240_i32 = arith.constant 240 : i32
    %123 = tpu.dynamic_rotate %78 by %c240_i32 dim 1 : vector<16x256xf32>, i32 -> vector<16x256xf32>
    %c7 = arith.constant 7 : index
    %c0_59 = arith.constant 0 : index
    %c0_60 = arith.constant 0 : index
    %124 = vector.load %arg3[%c7, %c0_59, %c0_60] : memref<9x1x256xf32, #tpu.memory_space<vmem>>, vector<1x1x256xf32>
    %125 = vector.shape_cast %124 : vector<1x1x256xf32> to vector<1x256xf32>
    %126 = vector.broadcast %125 : vector<1x256xf32> to vector<16x256xf32>
    %127 = arith.mulf %123, %126 : vector<16x256xf32>
    %128 = arith.truncf %127 : vector<16x256xf32> to vector<16x256xbf16>
    %c112 = arith.constant 112 : index
    %c0_61 = arith.constant 0 : index
    %129 = vector.load %arg18[%c112, %c0_61] : memref<144x256xbf16, #tpu.memory_space<vmem>>, vector<16x256xbf16>
    tpu.vector_store %arg18[%c112, %c0_61], %128 {strides = array<i32>} : memref<144x256xbf16, #tpu.memory_space<vmem>>, vector<16x256xbf16>,
    %c239_i32 = arith.constant 239 : i32
    %130 = tpu.dynamic_rotate %78 by %c239_i32 dim 1 : vector<16x256xf32>, i32 -> vector<16x256xf32>
    %c8 = arith.constant 8 : index
    %c0_62 = arith.constant 0 : index
    %c0_63 = arith.constant 0 : index
    %131 = vector.load %arg3[%c8, %c0_62, %c0_63] : memref<9x1x256xf32, #tpu.memory_space<vmem>>, vector<1x1x256xf32>
    %132 = vector.shape_cast %131 : vector<1x1x256xf32> to vector<1x256xf32>
    %133 = vector.broadcast %132 : vector<1x256xf32> to vector<16x256xf32>
    %134 = arith.mulf %130, %133 : vector<16x256xf32>
    %135 = arith.truncf %134 : vector<16x256xf32> to vector<16x256xbf16>
    %c128 = arith.constant 128 : index
    %c0_64 = arith.constant 0 : index
    %136 = vector.load %arg18[%c128, %c0_64] : memref<144x256xbf16, #tpu.memory_space<vmem>>, vector<16x256xbf16>
    tpu.vector_store %arg18[%c128, %c0_64], %135 {strides = array<i32>} : memref<144x256xbf16, #tpu.memory_space<vmem>>, vector<16x256xbf16>,
    %c0_65 = arith.constant 0 : index
    %c0_66 = arith.constant 0 : index
    %137 = vector.load %arg18[%c0_65, %c0_66] : memref<144x256xbf16, #tpu.memory_space<vmem>>, vector<144x256xbf16>
    %cst_67 = arith.constant dense<0.000000e+00> : vector<16x256xf32>
    %138 = tpu.matmul %8, %137, %cst_67 {dimension_numbers = #tpu.dot_dimension_numbers<[1], [0], [0], [1], [0, 0, 1, 1], [], []>} : vector<16x144xbf16>, vector<144x256xbf16>, vector<16x256xf32> -> vector<16x256xf32>
    %139 = vector.broadcast %9 : vector<16x1xf32> to vector<16x256xf32>
    %140 = arith.addf %138, %139 : vector<16x256xf32>
    %cst_68 = arith.constant dense<0.000000e+00> : vector<16xf32>
    %141 = vector.multi_reduction <add>, %140, %cst_68 [1] : vector<16x256xf32> to vector<16xf32>
    %142 = vector.shape_cast %141 : vector<16xf32> to vector<16x1xf32>
    %cst_69 = arith.constant 2.560000e+02 : f32
    %143 = vector.broadcast %cst_69 : f32 to vector<16x1xf32>
    %144 = arith.divf %142, %143 : vector<16x1xf32>
    %145 = arith.mulf %140, %140 : vector<16x256xf32>
    %cst_70 = arith.constant dense<0.000000e+00> : vector<16xf32>
    %146 = vector.multi_reduction <add>, %145, %cst_70 [1] : vector<16x256xf32> to vector<16xf32>
    %147 = vector.shape_cast %146 : vector<16xf32> to vector<16x1xf32>
    %cst_71 = arith.constant 2.560000e+02 : f32
    %148 = vector.broadcast %cst_71 : f32 to vector<16x1xf32>
    %149 = arith.divf %147, %148 : vector<16x1xf32>
    %150 = arith.mulf %144, %144 : vector<16x1xf32>
    %151 = arith.subf %149, %150 : vector<16x1xf32>
    %cst_72 = arith.constant 0.000000e+00 : f32
    %152 = vector.broadcast %cst_72 : f32 to vector<16x1xf32>
    %153 = arith.maximumf %151, %152 : vector<16x1xf32>
    %154 = vector.broadcast %144 : vector<16x1xf32> to vector<16x256xf32>
    %155 = arith.subf %140, %154 : vector<16x256xf32>
    %cst_73 = arith.constant 9.99999974E-6 : f32
    %156 = vector.broadcast %cst_73 : f32 to vector<16x1xf32>
    %157 = arith.addf %153, %156 : vector<16x1xf32>
    %158 = math.rsqrt %157 : vector<16x1xf32>
    %159 = vector.broadcast %158 : vector<16x1xf32> to vector<16x256xf32>
    %160 = arith.mulf %155, %159 : vector<16x256xf32>
    %161 = vector.extract_strided_slice %4 {offsets = [0, 0], sizes = [16, 1], strides = [1, 1]} : vector<16x3xf32> to vector<16x1xf32>
    %162 = vector.broadcast %161 : vector<16x1xf32> to vector<16x256xf32>
    %163 = vector.broadcast %17 : vector<1x256xf32> to vector<16x256xf32>
    %164 = arith.mulf %162, %163 : vector<16x256xf32>
    %165 = vector.extract_strided_slice %4 {offsets = [0, 1], sizes = [16, 1], strides = [1, 1]} : vector<16x3xf32> to vector<16x1xf32>
    %166 = vector.broadcast %165 : vector<16x1xf32> to vector<16x256xf32>
    %167 = vector.broadcast %18 : vector<1x256xf32> to vector<16x256xf32>
    %168 = arith.mulf %166, %167 : vector<16x256xf32>
    %169 = arith.addf %164, %168 : vector<16x256xf32>
    %170 = vector.extract_strided_slice %4 {offsets = [0, 2], sizes = [16, 1], strides = [1, 1]} : vector<16x3xf32> to vector<16x1xf32>
    %171 = vector.broadcast %170 : vector<16x1xf32> to vector<16x256xf32>
    %172 = vector.broadcast %19 : vector<1x256xf32> to vector<16x256xf32>
    %173 = arith.mulf %171, %172 : vector<16x256xf32>
    %174 = arith.addf %169, %173 : vector<16x256xf32>
    %175 = vector.broadcast %5 : vector<16x1xf32> to vector<16x256xf32>
    %176 = arith.addf %174, %175 : vector<16x256xf32>
    %177 = vector.extract_strided_slice %6 {offsets = [0, 0], sizes = [16, 1], strides = [1, 1]} : vector<16x3xf32> to vector<16x1xf32>
    %178 = vector.broadcast %177 : vector<16x1xf32> to vector<16x256xf32>
    %179 = vector.broadcast %17 : vector<1x256xf32> to vector<16x256xf32>
    %180 = arith.mulf %178, %179 : vector<16x256xf32>
    %181 = vector.extract_strided_slice %6 {offsets = [0, 1], sizes = [16, 1], strides = [1, 1]} : vector<16x3xf32> to vector<16x1xf32>
    %182 = vector.broadcast %181 : vector<16x1xf32> to vector<16x256xf32>
    %183 = vector.broadcast %18 : vector<1x256xf32> to vector<16x256xf32>
    %184 = arith.mulf %182, %183 : vector<16x256xf32>
    %185 = arith.addf %180, %184 : vector<16x256xf32>
    %186 = vector.extract_strided_slice %6 {offsets = [0, 2], sizes = [16, 1], strides = [1, 1]} : vector<16x3xf32> to vector<16x1xf32>
    %187 = vector.broadcast %186 : vector<16x1xf32> to vector<16x256xf32>
    %188 = vector.broadcast %19 : vector<1x256xf32> to vector<16x256xf32>
    %189 = arith.mulf %187, %188 : vector<16x256xf32>
    %190 = arith.addf %185, %189 : vector<16x256xf32>
    %191 = vector.broadcast %7 : vector<16x1xf32> to vector<16x256xf32>
    %192 = arith.addf %190, %191 : vector<16x256xf32>
    %193 = arith.mulf %176, %160 : vector<16x256xf32>
    %194 = arith.addf %193, %192 : vector<16x256xf32>
    %cst_74 = arith.constant 0.000000e+00 : f32
    %195 = vector.broadcast %cst_74 : f32 to vector<16x256xf32>
    %196 = arith.cmpf oge, %194, %195 : vector<16x256xf32>
    %cst_75 = arith.constant 2.000000e-01 : f32
    %197 = vector.broadcast %cst_75 : f32 to vector<16x256xf32>
    %198 = arith.mulf %197, %194 : vector<16x256xf32>
    %199 = arith.select %196, %194, %198 : vector<16x256xi1>, vector<16x256xf32>
    %c17_i32_76 = arith.constant 17 : i32
    %200 = tpu.dynamic_rotate %199 by %c17_i32_76 dim 1 : vector<16x256xf32>, i32 -> vector<16x256xf32>
    %c0_77 = arith.constant 0 : index
    %c0_78 = arith.constant 0 : index
    %c0_79 = arith.constant 0 : index
    %201 = vector.load %arg3[%c0_77, %c0_78, %c0_79] : memref<9x1x256xf32, #tpu.memory_space<vmem>>, vector<1x1x256xf32>
    %202 = vector.shape_cast %201 : vector<1x1x256xf32> to vector<1x256xf32>
    %203 = vector.broadcast %202 : vector<1x256xf32> to vector<16x256xf32>
    %204 = arith.mulf %200, %203 : vector<16x256xf32>
    %205 = arith.truncf %204 : vector<16x256xf32> to vector<16x256xbf16>
    %c0_80 = arith.constant 0 : index
    %c0_81 = arith.constant 0 : index
    %206 = vector.load %arg19[%c0_80, %c0_81] : memref<144x256xbf16, #tpu.memory_space<vmem>>, vector<16x256xbf16>
    tpu.vector_store %arg19[%c0_80, %c0_81], %205 {strides = array<i32>} : memref<144x256xbf16, #tpu.memory_space<vmem>>, vector<16x256xbf16>,
    %c16_i32_82 = arith.constant 16 : i32
    %207 = tpu.dynamic_rotate %199 by %c16_i32_82 dim 1 : vector<16x256xf32>, i32 -> vector<16x256xf32>
    %c1_83 = arith.constant 1 : index
    %c0_84 = arith.constant 0 : index
    %c0_85 = arith.constant 0 : index
    %208 = vector.load %arg3[%c1_83, %c0_84, %c0_85] : memref<9x1x256xf32, #tpu.memory_space<vmem>>, vector<1x1x256xf32>
    %209 = vector.shape_cast %208 : vector<1x1x256xf32> to vector<1x256xf32>
    %210 = vector.broadcast %209 : vector<1x256xf32> to vector<16x256xf32>
    %211 = arith.mulf %207, %210 : vector<16x256xf32>
    %212 = arith.truncf %211 : vector<16x256xf32> to vector<16x256xbf16>
    %c16_86 = arith.constant 16 : index
    %c0_87 = arith.constant 0 : index
    %213 = vector.load %arg19[%c16_86, %c0_87] : memref<144x256xbf16, #tpu.memory_space<vmem>>, vector<16x256xbf16>
    tpu.vector_store %arg19[%c16_86, %c0_87], %212 {strides = array<i32>} : memref<144x256xbf16, #tpu.memory_space<vmem>>, vector<16x256xbf16>,
    %c15_i32_88 = arith.constant 15 : i32
    %214 = tpu.dynamic_rotate %199 by %c15_i32_88 dim 1 : vector<16x256xf32>, i32 -> vector<16x256xf32>
    %c2_89 = arith.constant 2 : index
    %c0_90 = arith.constant 0 : index
    %c0_91 = arith.constant 0 : index
    %215 = vector.load %arg3[%c2_89, %c0_90, %c0_91] : memref<9x1x256xf32, #tpu.memory_space<vmem>>, vector<1x1x256xf32>
    %216 = vector.shape_cast %215 : vector<1x1x256xf32> to vector<1x256xf32>
    %217 = vector.broadcast %216 : vector<1x256xf32> to vector<16x256xf32>
    %218 = arith.mulf %214, %217 : vector<16x256xf32>
    %219 = arith.truncf %218 : vector<16x256xf32> to vector<16x256xbf16>
    %c32_92 = arith.constant 32 : index
    %c0_93 = arith.constant 0 : index
    %220 = vector.load %arg19[%c32_92, %c0_93] : memref<144x256xbf16, #tpu.memory_space<vmem>>, vector<16x256xbf16>
    tpu.vector_store %arg19[%c32_92, %c0_93], %219 {strides = array<i32>} : memref<144x256xbf16, #tpu.memory_space<vmem>>, vector<16x256xbf16>,
    %c1_i32_94 = arith.constant 1 : i32
    %221 = tpu.dynamic_rotate %199 by %c1_i32_94 dim 1 : vector<16x256xf32>, i32 -> vector<16x256xf32>
    %c3_95 = arith.constant 3 : index
    %c0_96 = arith.constant 0 : index
    %c0_97 = arith.constant 0 : index
    %222 = vector.load %arg3[%c3_95, %c0_96, %c0_97] : memref<9x1x256xf32, #tpu.memory_space<vmem>>, vector<1x1x256xf32>
    %223 = vector.shape_cast %222 : vector<1x1x256xf32> to vector<1x256xf32>
    %224 = vector.broadcast %223 : vector<1x256xf32> to vector<16x256xf32>
    %225 = arith.mulf %221, %224 : vector<16x256xf32>
    %226 = arith.truncf %225 : vector<16x256xf32> to vector<16x256xbf16>
    %c48_98 = arith.constant 48 : index
    %c0_99 = arith.constant 0 : index
    %227 = vector.load %arg19[%c48_98, %c0_99] : memref<144x256xbf16, #tpu.memory_space<vmem>>, vector<16x256xbf16>
    tpu.vector_store %arg19[%c48_98, %c0_99], %226 {strides = array<i32>} : memref<144x256xbf16, #tpu.memory_space<vmem>>, vector<16x256xbf16>,
    %228 = arith.truncf %199 : vector<16x256xf32> to vector<16x256xbf16>
    %c64_100 = arith.constant 64 : index
    %c0_101 = arith.constant 0 : index
    %229 = vector.load %arg19[%c64_100, %c0_101] : memref<144x256xbf16, #tpu.memory_space<vmem>>, vector<16x256xbf16>
    tpu.vector_store %arg19[%c64_100, %c0_101], %228 {strides = array<i32>} : memref<144x256xbf16, #tpu.memory_space<vmem>>, vector<16x256xbf16>,
    %c255_i32_102 = arith.constant 255 : i32
    %230 = tpu.dynamic_rotate %199 by %c255_i32_102 dim 1 : vector<16x256xf32>, i32 -> vector<16x256xf32>
    %c5_103 = arith.constant 5 : index
    %c0_104 = arith.constant 0 : index
    %c0_105 = arith.constant 0 : index
    %231 = vector.load %arg3[%c5_103, %c0_104, %c0_105] : memref<9x1x256xf32, #tpu.memory_space<vmem>>, vector<1x1x256xf32>
    %232 = vector.shape_cast %231 : vector<1x1x256xf32> to vector<1x256xf32>
    %233 = vector.broadcast %232 : vector<1x256xf32> to vector<16x256xf32>
    %234 = arith.mulf %230, %233 : vector<16x256xf32>
    %235 = arith.truncf %234 : vector<16x256xf32> to vector<16x256xbf16>
    %c80_106 = arith.constant 80 : index
    %c0_107 = arith.constant 0 : index
    %236 = vector.load %arg19[%c80_106, %c0_107] : memref<144x256xbf16, #tpu.memory_space<vmem>>, vector<16x256xbf16>
    tpu.vector_store %arg19[%c80_106, %c0_107], %235 {strides = array<i32>} : memref<144x256xbf16, #tpu.memory_space<vmem>>, vector<16x256xbf16>,
    %c241_i32_108 = arith.constant 241 : i32
    %237 = tpu.dynamic_rotate %199 by %c241_i32_108 dim 1 : vector<16x256xf32>, i32 -> vector<16x256xf32>
    %c6_109 = arith.constant 6 : index
    %c0_110 = arith.constant 0 : index
    %c0_111 = arith.constant 0 : index
    %238 = vector.load %arg3[%c6_109, %c0_110, %c0_111] : memref<9x1x256xf32, #tpu.memory_space<vmem>>, vector<1x1x256xf32>
    %239 = vector.shape_cast %238 : vector<1x1x256xf32> to vector<1x256xf32>
    %240 = vector.broadcast %239 : vector<1x256xf32> to vector<16x256xf32>
    %241 = arith.mulf %237, %240 : vector<16x256xf32>
    %242 = arith.truncf %241 : vector<16x256xf32> to vector<16x256xbf16>
    %c96_112 = arith.constant 96 : index
    %c0_113 = arith.constant 0 : index
    %243 = vector.load %arg19[%c96_112, %c0_113] : memref<144x256xbf16, #tpu.memory_space<vmem>>, vector<16x256xbf16>
    tpu.vector_store %arg19[%c96_112, %c0_113], %242 {strides = array<i32>} : memref<144x256xbf16, #tpu.memory_space<vmem>>, vector<16x256xbf16>,
    %c240_i32_114 = arith.constant 240 : i32
    %244 = tpu.dynamic_rotate %199 by %c240_i32_114 dim 1 : vector<16x256xf32>, i32 -> vector<16x256xf32>
    %c7_115 = arith.constant 7 : index
    %c0_116 = arith.constant 0 : index
    %c0_117 = arith.constant 0 : index
    %245 = vector.load %arg3[%c7_115, %c0_116, %c0_117] : memref<9x1x256xf32, #tpu.memory_space<vmem>>, vector<1x1x256xf32>
    %246 = vector.shape_cast %245 : vector<1x1x256xf32> to vector<1x256xf32>
    %247 = vector.broadcast %246 : vector<1x256xf32> to vector<16x256xf32>
    %248 = arith.mulf %244, %247 : vector<16x256xf32>
    %249 = arith.truncf %248 : vector<16x256xf32> to vector<16x256xbf16>
    %c112_118 = arith.constant 112 : index
    %c0_119 = arith.constant 0 : index
    %250 = vector.load %arg19[%c112_118, %c0_119] : memref<144x256xbf16, #tpu.memory_space<vmem>>, vector<16x256xbf16>
    tpu.vector_store %arg19[%c112_118, %c0_119], %249 {strides = array<i32>} : memref<144x256xbf16, #tpu.memory_space<vmem>>, vector<16x256xbf16>,
    %c239_i32_120 = arith.constant 239 : i32
    %251 = tpu.dynamic_rotate %199 by %c239_i32_120 dim 1 : vector<16x256xf32>, i32 -> vector<16x256xf32>
    %c8_121 = arith.constant 8 : index
    %c0_122 = arith.constant 0 : index
    %c0_123 = arith.constant 0 : index
    %252 = vector.load %arg3[%c8_121, %c0_122, %c0_123] : memref<9x1x256xf32, #tpu.memory_space<vmem>>, vector<1x1x256xf32>
    %253 = vector.shape_cast %252 : vector<1x1x256xf32> to vector<1x256xf32>
    %254 = vector.broadcast %253 : vector<1x256xf32> to vector<16x256xf32>
    %255 = arith.mulf %251, %254 : vector<16x256xf32>
    %256 = arith.truncf %255 : vector<16x256xf32> to vector<16x256xbf16>
    %c128_124 = arith.constant 128 : index
    %c0_125 = arith.constant 0 : index
    %257 = vector.load %arg19[%c128_124, %c0_125] : memref<144x256xbf16, #tpu.memory_space<vmem>>, vector<16x256xbf16>
    tpu.vector_store %arg19[%c128_124, %c0_125], %256 {strides = array<i32>} : memref<144x256xbf16, #tpu.memory_space<vmem>>, vector<16x256xbf16>,
    %c0_126 = arith.constant 0 : index
    %c0_127 = arith.constant 0 : index
    %258 = vector.load %arg19[%c0_126, %c0_127] : memref<144x256xbf16, #tpu.memory_space<vmem>>, vector<144x256xbf16>
    %cst_128 = arith.constant dense<0.000000e+00> : vector<16x256xf32>
    %259 = tpu.matmul %10, %258, %cst_128 {dimension_numbers = #tpu.dot_dimension_numbers<[1], [0], [0], [1], [0, 0, 1, 1], [], []>} : vector<16x144xbf16>, vector<144x256xbf16>, vector<16x256xf32> -> vector<16x256xf32>
    %260 = vector.broadcast %11 : vector<16x1xf32> to vector<16x256xf32>
    %261 = arith.addf %259, %260 : vector<16x256xf32>
    %262 = arith.truncf %14 : vector<16x256xf32> to vector<16x256xbf16>
    %cst_129 = arith.constant dense<0.000000e+00> : vector<16x256xf32>
    %263 = tpu.matmul %12, %262, %cst_129 {dimension_numbers = #tpu.dot_dimension_numbers<[1], [0], [0], [1], [0, 0, 1, 1], [], []>} : vector<16x16xbf16>, vector<16x256xbf16>, vector<16x256xf32> -> vector<16x256xf32>
    %264 = arith.addf %263, %261 : vector<16x256xf32>
    %cst_130 = arith.constant 0.707106769 : f32
    %265 = vector.broadcast %cst_130 : f32 to vector<16x256xf32>
    %266 = arith.mulf %264, %265 : vector<16x256xf32>
    %c0_131 = arith.constant 0 : index
    %c0_132 = arith.constant 0 : index
    %c0_133 = arith.constant 0 : index
    %267 = vector.load %arg17[%c0_131, %c0_132, %c0_133] : memref<2x16x256xf32, #tpu.memory_space<vmem>>, vector<1x16x256xf32>
    %268 = vector.shape_cast %267 : vector<1x16x256xf32> to vector<16x256xf32>
    %269 = vector.shape_cast %266 : vector<16x256xf32> to vector<1x16x256xf32>
    tpu.vector_store %arg17[%c0_131, %c0_132, %c0_133], %269 {strides = array<i32>} : memref<2x16x256xf32, #tpu.memory_space<vmem>>, vector<1x16x256xf32>,
    %c1_134 = arith.constant 1 : index
    %c0_135 = arith.constant 0 : index
    %c0_136 = arith.constant 0 : index
    %270 = vector.load %arg1[%c1_134, %c0_135, %c0_136] : memref<2x16x256xf32, #tpu.memory_space<vmem>>, vector<1x16x256xf32>
    %271 = vector.shape_cast %270 : vector<1x16x256xf32> to vector<16x256xf32>
    %c1_137 = arith.constant 1 : index
    %c0_138 = arith.constant 0 : index
    %c0_139 = arith.constant 0 : index
    %272 = vector.load %arg2[%c1_137, %c0_138, %c0_139] : memref<2x3x256xf32, #tpu.memory_space<vmem>>, vector<1x3x256xf32>
    %273 = vector.shape_cast %272 : vector<1x3x256xf32> to vector<3x256xf32>
    %274 = vector.extract_strided_slice %273 {offsets = [0, 0], sizes = [1, 256], strides = [1, 1]} : vector<3x256xf32> to vector<1x256xf32>
    %275 = vector.extract_strided_slice %273 {offsets = [1, 0], sizes = [1, 256], strides = [1, 1]} : vector<3x256xf32> to vector<1x256xf32>
    %276 = vector.extract_strided_slice %273 {offsets = [2, 0], sizes = [1, 256], strides = [1, 1]} : vector<3x256xf32> to vector<1x256xf32>
    %cst_140 = arith.constant dense<0.000000e+00> : vector<16xf32>
    %277 = vector.multi_reduction <add>, %271, %cst_140 [1] : vector<16x256xf32> to vector<16xf32>
    %278 = vector.shape_cast %277 : vector<16xf32> to vector<16x1xf32>
    %cst_141 = arith.constant 2.560000e+02 : f32
    %279 = vector.broadcast %cst_141 : f32 to vector<16x1xf32>
    %280 = arith.divf %278, %279 : vector<16x1xf32>
    %281 = arith.mulf %271, %271 : vector<16x256xf32>
    %cst_142 = arith.constant dense<0.000000e+00> : vector<16xf32>
    %282 = vector.multi_reduction <add>, %281, %cst_142 [1] : vector<16x256xf32> to vector<16xf32>
    %283 = vector.shape_cast %282 : vector<16xf32> to vector<16x1xf32>
    %cst_143 = arith.constant 2.560000e+02 : f32
    %284 = vector.broadcast %cst_143 : f32 to vector<16x1xf32>
    %285 = arith.divf %283, %284 : vector<16x1xf32>
    %286 = arith.mulf %280, %280 : vector<16x1xf32>
    %287 = arith.subf %285, %286 : vector<16x1xf32>
    %cst_144 = arith.constant 0.000000e+00 : f32
    %288 = vector.broadcast %cst_144 : f32 to vector<16x1xf32>
    %289 = arith.maximumf %287, %288 : vector<16x1xf32>
    %290 = vector.broadcast %280 : vector<16x1xf32> to vector<16x256xf32>
    %291 = arith.subf %271, %290 : vector<16x256xf32>
    %cst_145 = arith.constant 9.99999974E-6 : f32
    %292 = vector.broadcast %cst_145 : f32 to vector<16x1xf32>
    %293 = arith.addf %289, %292 : vector<16x1xf32>
    %294 = math.rsqrt %293 : vector<16x1xf32>
    %295 = vector.broadcast %294 : vector<16x1xf32> to vector<16x256xf32>
    %296 = arith.mulf %291, %295 : vector<16x256xf32>
    %297 = vector.extract_strided_slice %0 {offsets = [0, 0], sizes = [16, 1], strides = [1, 1]} : vector<16x3xf32> to vector<16x1xf32>
    %298 = vector.broadcast %297 : vector<16x1xf32> to vector<16x256xf32>
    %299 = vector.broadcast %274 : vector<1x256xf32> to vector<16x256xf32>
    %300 = arith.mulf %298, %299 : vector<16x256xf32>
    %301 = vector.extract_strided_slice %0 {offsets = [0, 1], sizes = [16, 1], strides = [1, 1]} : vector<16x3xf32> to vector<16x1xf32>
    %302 = vector.broadcast %301 : vector<16x1xf32> to vector<16x256xf32>
    %303 = vector.broadcast %275 : vector<1x256xf32> to vector<16x256xf32>
    %304 = arith.mulf %302, %303 : vector<16x256xf32>
    %305 = arith.addf %300, %304 : vector<16x256xf32>
    %306 = vector.extract_strided_slice %0 {offsets = [0, 2], sizes = [16, 1], strides = [1, 1]} : vector<16x3xf32> to vector<16x1xf32>
    %307 = vector.broadcast %306 : vector<16x1xf32> to vector<16x256xf32>
    %308 = vector.broadcast %276 : vector<1x256xf32> to vector<16x256xf32>
    %309 = arith.mulf %307, %308 : vector<16x256xf32>
    %310 = arith.addf %305, %309 : vector<16x256xf32>
    %311 = vector.broadcast %1 : vector<16x1xf32> to vector<16x256xf32>
    %312 = arith.addf %310, %311 : vector<16x256xf32>
    %313 = vector.extract_strided_slice %2 {offsets = [0, 0], sizes = [16, 1], strides = [1, 1]} : vector<16x3xf32> to vector<16x1xf32>
    %314 = vector.broadcast %313 : vector<16x1xf32> to vector<16x256xf32>
    %315 = vector.broadcast %274 : vector<1x256xf32> to vector<16x256xf32>
    %316 = arith.mulf %314, %315 : vector<16x256xf32>
    %317 = vector.extract_strided_slice %2 {offsets = [0, 1], sizes = [16, 1], strides = [1, 1]} : vector<16x3xf32> to vector<16x1xf32>
    %318 = vector.broadcast %317 : vector<16x1xf32> to vector<16x256xf32>
    %319 = vector.broadcast %275 : vector<1x256xf32> to vector<16x256xf32>
    %320 = arith.mulf %318, %319 : vector<16x256xf32>
    %321 = arith.addf %316, %320 : vector<16x256xf32>
    %322 = vector.extract_strided_slice %2 {offsets = [0, 2], sizes = [16, 1], strides = [1, 1]} : vector<16x3xf32> to vector<16x1xf32>
    %323 = vector.broadcast %322 : vector<16x1xf32> to vector<16x256xf32>
    %324 = vector.broadcast %276 : vector<1x256xf32> to vector<16x256xf32>
    %325 = arith.mulf %323, %324 : vector<16x256xf32>
    %326 = arith.addf %321, %325 : vector<16x256xf32>
    %327 = vector.broadcast %3 : vector<16x1xf32> to vector<16x256xf32>
    %328 = arith.addf %326, %327 : vector<16x256xf32>
    %329 = arith.mulf %312, %296 : vector<16x256xf32>
    %330 = arith.addf %329, %328 : vector<16x256xf32>
    %cst_146 = arith.constant 0.000000e+00 : f32
    %331 = vector.broadcast %cst_146 : f32 to vector<16x256xf32>
    %332 = arith.cmpf oge, %330, %331 : vector<16x256xf32>
    %cst_147 = arith.constant 2.000000e-01 : f32
    %333 = vector.broadcast %cst_147 : f32 to vector<16x256xf32>
    %334 = arith.mulf %333, %330 : vector<16x256xf32>
    %335 = arith.select %332, %330, %334 : vector<16x256xi1>, vector<16x256xf32>
    %c17_i32_148 = arith.constant 17 : i32
    %336 = tpu.dynamic_rotate %335 by %c17_i32_148 dim 1 : vector<16x256xf32>, i32 -> vector<16x256xf32>
    %c0_149 = arith.constant 0 : index
    %c0_150 = arith.constant 0 : index
    %c0_151 = arith.constant 0 : index
    %337 = vector.load %arg3[%c0_149, %c0_150, %c0_151] : memref<9x1x256xf32, #tpu.memory_space<vmem>>, vector<1x1x256xf32>
    %338 = vector.shape_cast %337 : vector<1x1x256xf32> to vector<1x256xf32>
    %339 = vector.broadcast %338 : vector<1x256xf32> to vector<16x256xf32>
    %340 = arith.mulf %336, %339 : vector<16x256xf32>
    %341 = arith.truncf %340 : vector<16x256xf32> to vector<16x256xbf16>
    %c0_152 = arith.constant 0 : index
    %c0_153 = arith.constant 0 : index
    %342 = vector.load %arg18[%c0_152, %c0_153] : memref<144x256xbf16, #tpu.memory_space<vmem>>, vector<16x256xbf16>
    tpu.vector_store %arg18[%c0_152, %c0_153], %341 {strides = array<i32>} : memref<144x256xbf16, #tpu.memory_space<vmem>>, vector<16x256xbf16>,
    %c16_i32_154 = arith.constant 16 : i32
    %343 = tpu.dynamic_rotate %335 by %c16_i32_154 dim 1 : vector<16x256xf32>, i32 -> vector<16x256xf32>
    %c1_155 = arith.constant 1 : index
    %c0_156 = arith.constant 0 : index
    %c0_157 = arith.constant 0 : index
    %344 = vector.load %arg3[%c1_155, %c0_156, %c0_157] : memref<9x1x256xf32, #tpu.memory_space<vmem>>, vector<1x1x256xf32>
    %345 = vector.shape_cast %344 : vector<1x1x256xf32> to vector<1x256xf32>
    %346 = vector.broadcast %345 : vector<1x256xf32> to vector<16x256xf32>
    %347 = arith.mulf %343, %346 : vector<16x256xf32>
    %348 = arith.truncf %347 : vector<16x256xf32> to vector<16x256xbf16>
    %c16_158 = arith.constant 16 : index
    %c0_159 = arith.constant 0 : index
    %349 = vector.load %arg18[%c16_158, %c0_159] : memref<144x256xbf16, #tpu.memory_space<vmem>>, vector<16x256xbf16>
    tpu.vector_store %arg18[%c16_158, %c0_159], %348 {strides = array<i32>} : memref<144x256xbf16, #tpu.memory_space<vmem>>, vector<16x256xbf16>,
    %c15_i32_160 = arith.constant 15 : i32
    %350 = tpu.dynamic_rotate %335 by %c15_i32_160 dim 1 : vector<16x256xf32>, i32 -> vector<16x256xf32>
    %c2_161 = arith.constant 2 : index
    %c0_162 = arith.constant 0 : index
    %c0_163 = arith.constant 0 : index
    %351 = vector.load %arg3[%c2_161, %c0_162, %c0_163] : memref<9x1x256xf32, #tpu.memory_space<vmem>>, vector<1x1x256xf32>
    %352 = vector.shape_cast %351 : vector<1x1x256xf32> to vector<1x256xf32>
    %353 = vector.broadcast %352 : vector<1x256xf32> to vector<16x256xf32>
    %354 = arith.mulf %350, %353 : vector<16x256xf32>
    %355 = arith.truncf %354 : vector<16x256xf32> to vector<16x256xbf16>
    %c32_164 = arith.constant 32 : index
    %c0_165 = arith.constant 0 : index
    %356 = vector.load %arg18[%c32_164, %c0_165] : memref<144x256xbf16, #tpu.memory_space<vmem>>, vector<16x256xbf16>
    tpu.vector_store %arg18[%c32_164, %c0_165], %355 {strides = array<i32>} : memref<144x256xbf16, #tpu.memory_space<vmem>>, vector<16x256xbf16>,
    %c1_i32_166 = arith.constant 1 : i32
    %357 = tpu.dynamic_rotate %335 by %c1_i32_166 dim 1 : vector<16x256xf32>, i32 -> vector<16x256xf32>
    %c3_167 = arith.constant 3 : index
    %c0_168 = arith.constant 0 : index
    %c0_169 = arith.constant 0 : index
    %358 = vector.load %arg3[%c3_167, %c0_168, %c0_169] : memref<9x1x256xf32, #tpu.memory_space<vmem>>, vector<1x1x256xf32>
    %359 = vector.shape_cast %358 : vector<1x1x256xf32> to vector<1x256xf32>
    %360 = vector.broadcast %359 : vector<1x256xf32> to vector<16x256xf32>
    %361 = arith.mulf %357, %360 : vector<16x256xf32>
    %362 = arith.truncf %361 : vector<16x256xf32> to vector<16x256xbf16>
    %c48_170 = arith.constant 48 : index
    %c0_171 = arith.constant 0 : index
    %363 = vector.load %arg18[%c48_170, %c0_171] : memref<144x256xbf16, #tpu.memory_space<vmem>>, vector<16x256xbf16>
    tpu.vector_store %arg18[%c48_170, %c0_171], %362 {strides = array<i32>} : memref<144x256xbf16, #tpu.memory_space<vmem>>, vector<16x256xbf16>,
    %364 = arith.truncf %335 : vector<16x256xf32> to vector<16x256xbf16>
    %c64_172 = arith.constant 64 : index
    %c0_173 = arith.constant 0 : index
    %365 = vector.load %arg18[%c64_172, %c0_173] : memref<144x256xbf16, #tpu.memory_space<vmem>>, vector<16x256xbf16>
    tpu.vector_store %arg18[%c64_172, %c0_173], %364 {strides = array<i32>} : memref<144x256xbf16, #tpu.memory_space<vmem>>, vector<16x256xbf16>,
    %c255_i32_174 = arith.constant 255 : i32
    %366 = tpu.dynamic_rotate %335 by %c255_i32_174 dim 1 : vector<16x256xf32>, i32 -> vector<16x256xf32>
    %c5_175 = arith.constant 5 : index
    %c0_176 = arith.constant 0 : index
    %c0_177 = arith.constant 0 : index
    %367 = vector.load %arg3[%c5_175, %c0_176, %c0_177] : memref<9x1x256xf32, #tpu.memory_space<vmem>>, vector<1x1x256xf32>
    %368 = vector.shape_cast %367 : vector<1x1x256xf32> to vector<1x256xf32>
    %369 = vector.broadcast %368 : vector<1x256xf32> to vector<16x256xf32>
    %370 = arith.mulf %366, %369 : vector<16x256xf32>
    %371 = arith.truncf %370 : vector<16x256xf32> to vector<16x256xbf16>
    %c80_178 = arith.constant 80 : index
    %c0_179 = arith.constant 0 : index
    %372 = vector.load %arg18[%c80_178, %c0_179] : memref<144x256xbf16, #tpu.memory_space<vmem>>, vector<16x256xbf16>
    tpu.vector_store %arg18[%c80_178, %c0_179], %371 {strides = array<i32>} : memref<144x256xbf16, #tpu.memory_space<vmem>>, vector<16x256xbf16>,
    %c241_i32_180 = arith.constant 241 : i32
    %373 = tpu.dynamic_rotate %335 by %c241_i32_180 dim 1 : vector<16x256xf32>, i32 -> vector<16x256xf32>
    %c6_181 = arith.constant 6 : index
    %c0_182 = arith.constant 0 : index
    %c0_183 = arith.constant 0 : index
    %374 = vector.load %arg3[%c6_181, %c0_182, %c0_183] : memref<9x1x256xf32, #tpu.memory_space<vmem>>, vector<1x1x256xf32>
    %375 = vector.shape_cast %374 : vector<1x1x256xf32> to vector<1x256xf32>
    %376 = vector.broadcast %375 : vector<1x256xf32> to vector<16x256xf32>
    %377 = arith.mulf %373, %376 : vector<16x256xf32>
    %378 = arith.truncf %377 : vector<16x256xf32> to vector<16x256xbf16>
    %c96_184 = arith.constant 96 : index
    %c0_185 = arith.constant 0 : index
    %379 = vector.load %arg18[%c96_184, %c0_185] : memref<144x256xbf16, #tpu.memory_space<vmem>>, vector<16x256xbf16>
    tpu.vector_store %arg18[%c96_184, %c0_185], %378 {strides = array<i32>} : memref<144x256xbf16, #tpu.memory_space<vmem>>, vector<16x256xbf16>,
    %c240_i32_186 = arith.constant 240 : i32
    %380 = tpu.dynamic_rotate %335 by %c240_i32_186 dim 1 : vector<16x256xf32>, i32 -> vector<16x256xf32>
    %c7_187 = arith.constant 7 : index
    %c0_188 = arith.constant 0 : index
    %c0_189 = arith.constant 0 : index
    %381 = vector.load %arg3[%c7_187, %c0_188, %c0_189] : memref<9x1x256xf32, #tpu.memory_space<vmem>>, vector<1x1x256xf32>
    %382 = vector.shape_cast %381 : vector<1x1x256xf32> to vector<1x256xf32>
    %383 = vector.broadcast %382 : vector<1x256xf32> to vector<16x256xf32>
    %384 = arith.mulf %380, %383 : vector<16x256xf32>
    %385 = arith.truncf %384 : vector<16x256xf32> to vector<16x256xbf16>
    %c112_190 = arith.constant 112 : index
    %c0_191 = arith.constant 0 : index
    %386 = vector.load %arg18[%c112_190, %c0_191] : memref<144x256xbf16, #tpu.memory_space<vmem>>, vector<16x256xbf16>
    tpu.vector_store %arg18[%c112_190, %c0_191], %385 {strides = array<i32>} : memref<144x256xbf16, #tpu.memory_space<vmem>>, vector<16x256xbf16>,
    %c239_i32_192 = arith.constant 239 : i32
    %387 = tpu.dynamic_rotate %335 by %c239_i32_192 dim 1 : vector<16x256xf32>, i32 -> vector<16x256xf32>
    %c8_193 = arith.constant 8 : index
    %c0_194 = arith.constant 0 : index
    %c0_195 = arith.constant 0 : index
    %388 = vector.load %arg3[%c8_193, %c0_194, %c0_195] : memref<9x1x256xf32, #tpu.memory_space<vmem>>, vector<1x1x256xf32>
    %389 = vector.shape_cast %388 : vector<1x1x256xf32> to vector<1x256xf32>
    %390 = vector.broadcast %389 : vector<1x256xf32> to vector<16x256xf32>
    %391 = arith.mulf %387, %390 : vector<16x256xf32>
    %392 = arith.truncf %391 : vector<16x256xf32> to vector<16x256xbf16>
    %c128_196 = arith.constant 128 : index
    %c0_197 = arith.constant 0 : index
    %393 = vector.load %arg18[%c128_196, %c0_197] : memref<144x256xbf16, #tpu.memory_space<vmem>>, vector<16x256xbf16>
    tpu.vector_store %arg18[%c128_196, %c0_197], %392 {strides = array<i32>} : memref<144x256xbf16, #tpu.memory_space<vmem>>, vector<16x256xbf16>,
    %c0_198 = arith.constant 0 : index
    %c0_199 = arith.constant 0 : index
    %394 = vector.load %arg18[%c0_198, %c0_199] : memref<144x256xbf16, #tpu.memory_space<vmem>>, vector<144x256xbf16>
    %cst_200 = arith.constant dense<0.000000e+00> : vector<16x256xf32>
    %395 = tpu.matmul %8, %394, %cst_200 {dimension_numbers = #tpu.dot_dimension_numbers<[1], [0], [0], [1], [0, 0, 1, 1], [], []>} : vector<16x144xbf16>, vector<144x256xbf16>, vector<16x256xf32> -> vector<16x256xf32>
    %396 = vector.broadcast %9 : vector<16x1xf32> to vector<16x256xf32>
    %397 = arith.addf %395, %396 : vector<16x256xf32>
    %cst_201 = arith.constant dense<0.000000e+00> : vector<16xf32>
    %398 = vector.multi_reduction <add>, %397, %cst_201 [1] : vector<16x256xf32> to vector<16xf32>
    %399 = vector.shape_cast %398 : vector<16xf32> to vector<16x1xf32>
    %cst_202 = arith.constant 2.560000e+02 : f32
    %400 = vector.broadcast %cst_202 : f32 to vector<16x1xf32>
    %401 = arith.divf %399, %400 : vector<16x1xf32>
    %402 = arith.mulf %397, %397 : vector<16x256xf32>
    %cst_203 = arith.constant dense<0.000000e+00> : vector<16xf32>
    %403 = vector.multi_reduction <add>, %402, %cst_203 [1] : vector<16x256xf32> to vector<16xf32>
    %404 = vector.shape_cast %403 : vector<16xf32> to vector<16x1xf32>
    %cst_204 = arith.constant 2.560000e+02 : f32
    %405 = vector.broadcast %cst_204 : f32 to vector<16x1xf32>
    %406 = arith.divf %404, %405 : vector<16x1xf32>
    %407 = arith.mulf %401, %401 : vector<16x1xf32>
    %408 = arith.subf %406, %407 : vector<16x1xf32>
    %cst_205 = arith.constant 0.000000e+00 : f32
    %409 = vector.broadcast %cst_205 : f32 to vector<16x1xf32>
    %410 = arith.maximumf %408, %409 : vector<16x1xf32>
    %411 = vector.broadcast %401 : vector<16x1xf32> to vector<16x256xf32>
    %412 = arith.subf %397, %411 : vector<16x256xf32>
    %cst_206 = arith.constant 9.99999974E-6 : f32
    %413 = vector.broadcast %cst_206 : f32 to vector<16x1xf32>
    %414 = arith.addf %410, %413 : vector<16x1xf32>
    %415 = math.rsqrt %414 : vector<16x1xf32>
    %416 = vector.broadcast %415 : vector<16x1xf32> to vector<16x256xf32>
    %417 = arith.mulf %412, %416 : vector<16x256xf32>
    %418 = vector.extract_strided_slice %4 {offsets = [0, 0], sizes = [16, 1], strides = [1, 1]} : vector<16x3xf32> to vector<16x1xf32>
    %419 = vector.broadcast %418 : vector<16x1xf32> to vector<16x256xf32>
    %420 = vector.broadcast %274 : vector<1x256xf32> to vector<16x256xf32>
    %421 = arith.mulf %419, %420 : vector<16x256xf32>
    %422 = vector.extract_strided_slice %4 {offsets = [0, 1], sizes = [16, 1], strides = [1, 1]} : vector<16x3xf32> to vector<16x1xf32>
    %423 = vector.broadcast %422 : vector<16x1xf32> to vector<16x256xf32>
    %424 = vector.broadcast %275 : vector<1x256xf32> to vector<16x256xf32>
    %425 = arith.mulf %423, %424 : vector<16x256xf32>
    %426 = arith.addf %421, %425 : vector<16x256xf32>
    %427 = vector.extract_strided_slice %4 {offsets = [0, 2], sizes = [16, 1], strides = [1, 1]} : vector<16x3xf32> to vector<16x1xf32>
    %428 = vector.broadcast %427 : vector<16x1xf32> to vector<16x256xf32>
    %429 = vector.broadcast %276 : vector<1x256xf32> to vector<16x256xf32>
    %430 = arith.mulf %428, %429 : vector<16x256xf32>
    %431 = arith.addf %426, %430 : vector<16x256xf32>
    %432 = vector.broadcast %5 : vector<16x1xf32> to vector<16x256xf32>
    %433 = arith.addf %431, %432 : vector<16x256xf32>
    %434 = vector.extract_strided_slice %6 {offsets = [0, 0], sizes = [16, 1], strides = [1, 1]} : vector<16x3xf32> to vector<16x1xf32>
    %435 = vector.broadcast %434 : vector<16x1xf32> to vector<16x256xf32>
    %436 = vector.broadcast %274 : vector<1x256xf32> to vector<16x256xf32>
    %437 = arith.mulf %435, %436 : vector<16x256xf32>
    %438 = vector.extract_strided_slice %6 {offsets = [0, 1], sizes = [16, 1], strides = [1, 1]} : vector<16x3xf32> to vector<16x1xf32>
    %439 = vector.broadcast %438 : vector<16x1xf32> to vector<16x256xf32>
    %440 = vector.broadcast %275 : vector<1x256xf32> to vector<16x256xf32>
    %441 = arith.mulf %439, %440 : vector<16x256xf32>
    %442 = arith.addf %437, %441 : vector<16x256xf32>
    %443 = vector.extract_strided_slice %6 {offsets = [0, 2], sizes = [16, 1], strides = [1, 1]} : vector<16x3xf32> to vector<16x1xf32>
    %444 = vector.broadcast %443 : vector<16x1xf32> to vector<16x256xf32>
    %445 = vector.broadcast %276 : vector<1x256xf32> to vector<16x256xf32>
    %446 = arith.mulf %444, %445 : vector<16x256xf32>
    %447 = arith.addf %442, %446 : vector<16x256xf32>
    %448 = vector.broadcast %7 : vector<16x1xf32> to vector<16x256xf32>
    %449 = arith.addf %447, %448 : vector<16x256xf32>
    %450 = arith.mulf %433, %417 : vector<16x256xf32>
    %451 = arith.addf %450, %449 : vector<16x256xf32>
    %cst_207 = arith.constant 0.000000e+00 : f32
    %452 = vector.broadcast %cst_207 : f32 to vector<16x256xf32>
    %453 = arith.cmpf oge, %451, %452 : vector<16x256xf32>
    %cst_208 = arith.constant 2.000000e-01 : f32
    %454 = vector.broadcast %cst_208 : f32 to vector<16x256xf32>
    %455 = arith.mulf %454, %451 : vector<16x256xf32>
    %456 = arith.select %453, %451, %455 : vector<16x256xi1>, vector<16x256xf32>
    %c17_i32_209 = arith.constant 17 : i32
    %457 = tpu.dynamic_rotate %456 by %c17_i32_209 dim 1 : vector<16x256xf32>, i32 -> vector<16x256xf32>
    %c0_210 = arith.constant 0 : index
    %c0_211 = arith.constant 0 : index
    %c0_212 = arith.constant 0 : index
    %458 = vector.load %arg3[%c0_210, %c0_211, %c0_212] : memref<9x1x256xf32, #tpu.memory_space<vmem>>, vector<1x1x256xf32>
    %459 = vector.shape_cast %458 : vector<1x1x256xf32> to vector<1x256xf32>
    %460 = vector.broadcast %459 : vector<1x256xf32> to vector<16x256xf32>
    %461 = arith.mulf %457, %460 : vector<16x256xf32>
    %462 = arith.truncf %461 : vector<16x256xf32> to vector<16x256xbf16>
    %c0_213 = arith.constant 0 : index
    %c0_214 = arith.constant 0 : index
    %463 = vector.load %arg19[%c0_213, %c0_214] : memref<144x256xbf16, #tpu.memory_space<vmem>>, vector<16x256xbf16>
    tpu.vector_store %arg19[%c0_213, %c0_214], %462 {strides = array<i32>} : memref<144x256xbf16, #tpu.memory_space<vmem>>, vector<16x256xbf16>,
    %c16_i32_215 = arith.constant 16 : i32
    %464 = tpu.dynamic_rotate %456 by %c16_i32_215 dim 1 : vector<16x256xf32>, i32 -> vector<16x256xf32>
    %c1_216 = arith.constant 1 : index
    %c0_217 = arith.constant 0 : index
    %c0_218 = arith.constant 0 : index
    %465 = vector.load %arg3[%c1_216, %c0_217, %c0_218] : memref<9x1x256xf32, #tpu.memory_space<vmem>>, vector<1x1x256xf32>
    %466 = vector.shape_cast %465 : vector<1x1x256xf32> to vector<1x256xf32>
    %467 = vector.broadcast %466 : vector<1x256xf32> to vector<16x256xf32>
    %468 = arith.mulf %464, %467 : vector<16x256xf32>
    %469 = arith.truncf %468 : vector<16x256xf32> to vector<16x256xbf16>
    %c16_219 = arith.constant 16 : index
    %c0_220 = arith.constant 0 : index
    %470 = vector.load %arg19[%c16_219, %c0_220] : memref<144x256xbf16, #tpu.memory_space<vmem>>, vector<16x256xbf16>
    tpu.vector_store %arg19[%c16_219, %c0_220], %469 {strides = array<i32>} : memref<144x256xbf16, #tpu.memory_space<vmem>>, vector<16x256xbf16>,
    %c15_i32_221 = arith.constant 15 : i32
    %471 = tpu.dynamic_rotate %456 by %c15_i32_221 dim 1 : vector<16x256xf32>, i32 -> vector<16x256xf32>
    %c2_222 = arith.constant 2 : index
    %c0_223 = arith.constant 0 : index
    %c0_224 = arith.constant 0 : index
    %472 = vector.load %arg3[%c2_222, %c0_223, %c0_224] : memref<9x1x256xf32, #tpu.memory_space<vmem>>, vector<1x1x256xf32>
    %473 = vector.shape_cast %472 : vector<1x1x256xf32> to vector<1x256xf32>
    %474 = vector.broadcast %473 : vector<1x256xf32> to vector<16x256xf32>
    %475 = arith.mulf %471, %474 : vector<16x256xf32>
    %476 = arith.truncf %475 : vector<16x256xf32> to vector<16x256xbf16>
    %c32_225 = arith.constant 32 : index
    %c0_226 = arith.constant 0 : index
    %477 = vector.load %arg19[%c32_225, %c0_226] : memref<144x256xbf16, #tpu.memory_space<vmem>>, vector<16x256xbf16>
    tpu.vector_store %arg19[%c32_225, %c0_226], %476 {strides = array<i32>} : memref<144x256xbf16, #tpu.memory_space<vmem>>, vector<16x256xbf16>,
    %c1_i32_227 = arith.constant 1 : i32
    %478 = tpu.dynamic_rotate %456 by %c1_i32_227 dim 1 : vector<16x256xf32>, i32 -> vector<16x256xf32>
    %c3_228 = arith.constant 3 : index
    %c0_229 = arith.constant 0 : index
    %c0_230 = arith.constant 0 : index
    %479 = vector.load %arg3[%c3_228, %c0_229, %c0_230] : memref<9x1x256xf32, #tpu.memory_space<vmem>>, vector<1x1x256xf32>
    %480 = vector.shape_cast %479 : vector<1x1x256xf32> to vector<1x256xf32>
    %481 = vector.broadcast %480 : vector<1x256xf32> to vector<16x256xf32>
    %482 = arith.mulf %478, %481 : vector<16x256xf32>
    %483 = arith.truncf %482 : vector<16x256xf32> to vector<16x256xbf16>
    %c48_231 = arith.constant 48 : index
    %c0_232 = arith.constant 0 : index
    %484 = vector.load %arg19[%c48_231, %c0_232] : memref<144x256xbf16, #tpu.memory_space<vmem>>, vector<16x256xbf16>
    tpu.vector_store %arg19[%c48_231, %c0_232], %483 {strides = array<i32>} : memref<144x256xbf16, #tpu.memory_space<vmem>>, vector<16x256xbf16>,
    %485 = arith.truncf %456 : vector<16x256xf32> to vector<16x256xbf16>
    %c64_233 = arith.constant 64 : index
    %c0_234 = arith.constant 0 : index
    %486 = vector.load %arg19[%c64_233, %c0_234] : memref<144x256xbf16, #tpu.memory_space<vmem>>, vector<16x256xbf16>
    tpu.vector_store %arg19[%c64_233, %c0_234], %485 {strides = array<i32>} : memref<144x256xbf16, #tpu.memory_space<vmem>>, vector<16x256xbf16>,
    %c255_i32_235 = arith.constant 255 : i32
    %487 = tpu.dynamic_rotate %456 by %c255_i32_235 dim 1 : vector<16x256xf32>, i32 -> vector<16x256xf32>
    %c5_236 = arith.constant 5 : index
    %c0_237 = arith.constant 0 : index
    %c0_238 = arith.constant 0 : index
    %488 = vector.load %arg3[%c5_236, %c0_237, %c0_238] : memref<9x1x256xf32, #tpu.memory_space<vmem>>, vector<1x1x256xf32>
    %489 = vector.shape_cast %488 : vector<1x1x256xf32> to vector<1x256xf32>
    %490 = vector.broadcast %489 : vector<1x256xf32> to vector<16x256xf32>
    %491 = arith.mulf %487, %490 : vector<16x256xf32>
    %492 = arith.truncf %491 : vector<16x256xf32> to vector<16x256xbf16>
    %c80_239 = arith.constant 80 : index
    %c0_240 = arith.constant 0 : index
    %493 = vector.load %arg19[%c80_239, %c0_240] : memref<144x256xbf16, #tpu.memory_space<vmem>>, vector<16x256xbf16>
    tpu.vector_store %arg19[%c80_239, %c0_240], %492 {strides = array<i32>} : memref<144x256xbf16, #tpu.memory_space<vmem>>, vector<16x256xbf16>,
    %c241_i32_241 = arith.constant 241 : i32
    %494 = tpu.dynamic_rotate %456 by %c241_i32_241 dim 1 : vector<16x256xf32>, i32 -> vector<16x256xf32>
    %c6_242 = arith.constant 6 : index
    %c0_243 = arith.constant 0 : index
    %c0_244 = arith.constant 0 : index
    %495 = vector.load %arg3[%c6_242, %c0_243, %c0_244] : memref<9x1x256xf32, #tpu.memory_space<vmem>>, vector<1x1x256xf32>
    %496 = vector.shape_cast %495 : vector<1x1x256xf32> to vector<1x256xf32>
    %497 = vector.broadcast %496 : vector<1x256xf32> to vector<16x256xf32>
    %498 = arith.mulf %494, %497 : vector<16x256xf32>
    %499 = arith.truncf %498 : vector<16x256xf32> to vector<16x256xbf16>
    %c96_245 = arith.constant 96 : index
    %c0_246 = arith.constant 0 : index
    %500 = vector.load %arg19[%c96_245, %c0_246] : memref<144x256xbf16, #tpu.memory_space<vmem>>, vector<16x256xbf16>
    tpu.vector_store %arg19[%c96_245, %c0_246], %499 {strides = array<i32>} : memref<144x256xbf16, #tpu.memory_space<vmem>>, vector<16x256xbf16>,
    %c240_i32_247 = arith.constant 240 : i32
    %501 = tpu.dynamic_rotate %456 by %c240_i32_247 dim 1 : vector<16x256xf32>, i32 -> vector<16x256xf32>
    %c7_248 = arith.constant 7 : index
    %c0_249 = arith.constant 0 : index
    %c0_250 = arith.constant 0 : index
    %502 = vector.load %arg3[%c7_248, %c0_249, %c0_250] : memref<9x1x256xf32, #tpu.memory_space<vmem>>, vector<1x1x256xf32>
    %503 = vector.shape_cast %502 : vector<1x1x256xf32> to vector<1x256xf32>
    %504 = vector.broadcast %503 : vector<1x256xf32> to vector<16x256xf32>
    %505 = arith.mulf %501, %504 : vector<16x256xf32>
    %506 = arith.truncf %505 : vector<16x256xf32> to vector<16x256xbf16>
    %c112_251 = arith.constant 112 : index
    %c0_252 = arith.constant 0 : index
    %507 = vector.load %arg19[%c112_251, %c0_252] : memref<144x256xbf16, #tpu.memory_space<vmem>>, vector<16x256xbf16>
    tpu.vector_store %arg19[%c112_251, %c0_252], %506 {strides = array<i32>} : memref<144x256xbf16, #tpu.memory_space<vmem>>, vector<16x256xbf16>,
    %c239_i32_253 = arith.constant 239 : i32
    %508 = tpu.dynamic_rotate %456 by %c239_i32_253 dim 1 : vector<16x256xf32>, i32 -> vector<16x256xf32>
    %c8_254 = arith.constant 8 : index
    %c0_255 = arith.constant 0 : index
    %c0_256 = arith.constant 0 : index
    %509 = vector.load %arg3[%c8_254, %c0_255, %c0_256] : memref<9x1x256xf32, #tpu.memory_space<vmem>>, vector<1x1x256xf32>
    %510 = vector.shape_cast %509 : vector<1x1x256xf32> to vector<1x256xf32>
    %511 = vector.broadcast %510 : vector<1x256xf32> to vector<16x256xf32>
    %512 = arith.mulf %508, %511 : vector<16x256xf32>
    %513 = arith.truncf %512 : vector<16x256xf32> to vector<16x256xbf16>
    %c128_257 = arith.constant 128 : index
    %c0_258 = arith.constant 0 : index
    %514 = vector.load %arg19[%c128_257, %c0_258] : memref<144x256xbf16, #tpu.memory_space<vmem>>, vector<16x256xbf16>
    tpu.vector_store %arg19[%c128_257, %c0_258], %513 {strides = array<i32>} : memref<144x256xbf16, #tpu.memory_space<vmem>>, vector<16x256xbf16>,
    %c0_259 = arith.constant 0 : index
    %c0_260 = arith.constant 0 : index
    %515 = vector.load %arg19[%c0_259, %c0_260] : memref<144x256xbf16, #tpu.memory_space<vmem>>, vector<144x256xbf16>
    %cst_261 = arith.constant dense<0.000000e+00> : vector<16x256xf32>
    %516 = tpu.matmul %10, %515, %cst_261 {dimension_numbers = #tpu.dot_dimension_numbers<[1], [0], [0], [1], [0, 0, 1, 1], [], []>} : vector<16x144xbf16>, vector<144x256xbf16>, vector<16x256xf32> -> vector<16x256xf32>
    %517 = vector.broadcast %11 : vector<16x1xf32> to vector<16x256xf32>
    %518 = arith.addf %516, %517 : vector<16x256xf32>
    %519 = arith.truncf %271 : vector<16x256xf32> to vector<16x256xbf16>
    %cst_262 = arith.constant dense<0.000000e+00> : vector<16x256xf32>
    %520 = tpu.matmul %12, %519, %cst_262 {dimension_numbers = #tpu.dot_dimension_numbers<[1], [0], [0], [1], [0, 0, 1, 1], [], []>} : vector<16x16xbf16>, vector<16x256xbf16>, vector<16x256xf32> -> vector<16x256xf32>
    %521 = arith.addf %520, %518 : vector<16x256xf32>
    %cst_263 = arith.constant 0.707106769 : f32
    %522 = vector.broadcast %cst_263 : f32 to vector<16x256xf32>
    %523 = arith.mulf %521, %522 : vector<16x256xf32>
    %c1_264 = arith.constant 1 : index
    %c0_265 = arith.constant 0 : index
    %c0_266 = arith.constant 0 : index
    %524 = vector.load %arg17[%c1_264, %c0_265, %c0_266] : memref<2x16x256xf32, #tpu.memory_space<vmem>>, vector<1x16x256xf32>
    %525 = vector.shape_cast %524 : vector<1x16x256xf32> to vector<16x256xf32>
    %526 = vector.shape_cast %523 : vector<16x256xf32> to vector<1x16x256xf32>
    tpu.vector_store %arg17[%c1_264, %c0_265, %c0_266], %526 {strides = array<i32>} : memref<2x16x256xf32, #tpu.memory_space<vmem>>, vector<1x16x256xf32>,
    return
  }
  func.func @transform_0(%arg0: i32) -> (i32, i32, i32) {
    %c0_i32 = arith.constant 0 : i32
    %c0_i32_0 = arith.constant 0 : i32
    %c0_i32_1 = arith.constant 0 : i32
    return %arg0, %c0_i32, %c0_i32_0 : i32, i32, i32
  }
  func.func @transform_1(%arg0: i32) -> (i32, i32, i32) {
    %c0_i32 = arith.constant 0 : i32
    %c0_i32_0 = arith.constant 0 : i32
    %c0_i32_1 = arith.constant 0 : i32
    return %arg0, %c0_i32, %c0_i32_0 : i32, i32, i32
  }
  func.func @transform_2(%arg0: i32) -> (i32, i32, i32) {
    %c0_i32 = arith.constant 0 : i32
    %c0_i32_0 = arith.constant 0 : i32
    %c0_i32_1 = arith.constant 0 : i32
    %c0_i32_2 = arith.constant 0 : i32
    return %c0_i32, %c0_i32_0, %c0_i32_1 : i32, i32, i32
  }
  func.func @transform_3(%arg0: i32) -> (i32, i32) {
    %c0_i32 = arith.constant 0 : i32
    %c0_i32_0 = arith.constant 0 : i32
    %c0_i32_1 = arith.constant 0 : i32
    return %c0_i32, %c0_i32_0 : i32, i32
  }
  func.func @transform_4(%arg0: i32) -> (i32, i32) {
    %c0_i32 = arith.constant 0 : i32
    %c0_i32_0 = arith.constant 0 : i32
    %c0_i32_1 = arith.constant 0 : i32
    return %c0_i32, %c0_i32_0 : i32, i32
  }
  func.func @transform_5(%arg0: i32) -> (i32, i32) {
    %c0_i32 = arith.constant 0 : i32
    %c0_i32_0 = arith.constant 0 : i32
    %c0_i32_1 = arith.constant 0 : i32
    return %c0_i32, %c0_i32_0 : i32, i32
  }
  func.func @transform_6(%arg0: i32) -> (i32, i32) {
    %c0_i32 = arith.constant 0 : i32
    %c0_i32_0 = arith.constant 0 : i32
    %c0_i32_1 = arith.constant 0 : i32
    return %c0_i32, %c0_i32_0 : i32, i32
  }
  func.func @transform_7(%arg0: i32) -> (i32, i32) {
    %c0_i32 = arith.constant 0 : i32
    %c0_i32_0 = arith.constant 0 : i32
    %c0_i32_1 = arith.constant 0 : i32
    return %c0_i32, %c0_i32_0 : i32, i32
  }
  func.func @transform_8(%arg0: i32) -> (i32, i32) {
    %c0_i32 = arith.constant 0 : i32
    %c0_i32_0 = arith.constant 0 : i32
    %c0_i32_1 = arith.constant 0 : i32
    return %c0_i32, %c0_i32_0 : i32, i32
  }
  func.func @transform_9(%arg0: i32) -> (i32, i32) {
    %c0_i32 = arith.constant 0 : i32
    %c0_i32_0 = arith.constant 0 : i32
    %c0_i32_1 = arith.constant 0 : i32
    return %c0_i32, %c0_i32_0 : i32, i32
  }
  func.func @transform_10(%arg0: i32) -> (i32, i32) {
    %c0_i32 = arith.constant 0 : i32
    %c0_i32_0 = arith.constant 0 : i32
    %c0_i32_1 = arith.constant 0 : i32
    return %c0_i32, %c0_i32_0 : i32, i32
  }
  func.func @transform_11(%arg0: i32) -> (i32, i32) {
    %c0_i32 = arith.constant 0 : i32
    %c0_i32_0 = arith.constant 0 : i32
    %c0_i32_1 = arith.constant 0 : i32
    return %c0_i32, %c0_i32_0 : i32, i32
  }
  func.func @transform_12(%arg0: i32) -> (i32, i32) {
    %c0_i32 = arith.constant 0 : i32
    %c0_i32_0 = arith.constant 0 : i32
    %c0_i32_1 = arith.constant 0 : i32
    return %c0_i32, %c0_i32_0 : i32, i32
  }
  func.func @transform_13(%arg0: i32) -> (i32, i32) {
    %c0_i32 = arith.constant 0 : i32
    %c0_i32_0 = arith.constant 0 : i32
    %c0_i32_1 = arith.constant 0 : i32
    return %c0_i32, %c0_i32_0 : i32, i32
  }
  func.func @transform_14(%arg0: i32) -> (i32, i32) {
    %c0_i32 = arith.constant 0 : i32
    %c0_i32_0 = arith.constant 0 : i32
    %c0_i32_1 = arith.constant 0 : i32
    return %c0_i32, %c0_i32_0 : i32, i32
  }
  func.func @transform_15(%arg0: i32) -> (i32, i32) {
    %c0_i32 = arith.constant 0 : i32
    %c0_i32_0 = arith.constant 0 : i32
    %c0_i32_1 = arith.constant 0 : i32
    return %c0_i32, %c0_i32_0 : i32, i32
  }
  func.func @transform_16(%arg0: i32) -> (i32, i32, i32) {
    %c0_i32 = arith.constant 0 : i32
    %c0_i32_0 = arith.constant 0 : i32
    %c0_i32_1 = arith.constant 0 : i32
    return %arg0, %c0_i32, %c0_i32_0 : i32, i32, i32
  }
}

</mosaic_0001>

<bundles_post_ra>
// kernel: tpu_custom_call.1
= control target key start
LH: loop header
LB: loop body
LE: loop exit
PB: predicated region body
PF: predicated region fallthrough
CT: control target
= control target key end

     0   :  { %s6179_s0 = inlined_call_operand.hbm [shape: f32[4,16,256], index: 0, kind: input, shape index: {}]   ;;  %s6180_s1 = inlined_call_operand.hbm [shape: f32[4,3,256], index: 1, kind: input, shape index: {}]   ;;  %s6181_s2 = inlined_call_operand.hbm [shape: f32[9,1,256], index: 2, kind: input, shape index: {}]   ;;  %s6182_s3 = inlined_call_operand.hbm [shape: f32[16,3], index: 3, kind: input, shape index: {}]   ;;  %s6183_s4 = inlined_call_operand.hbm [shape: f32[16,1], index: 4, kind: input, shape index: {}]   ;;  %s6184_s5 = inlined_call_operand.hbm [shape: f32[16,3], index: 5, kind: input, shape index: {}]   ;;  %s6185_s6 = inlined_call_operand.hbm [shape: f32[16,1], index: 6, kind: input, shape index: {}]   ;;  %s6186_s7 = inlined_call_operand.hbm [shape: bf16[16,144], index: 7, kind: input, shape index: {}]   ;;  %s6187_s8 = inlined_call_operand.hbm [shape: f32[16,1], index: 8, kind: input, shape index: {}]   ;;  %s6188_s9 = inlined_call_operand.hbm [shape: f32[16,3], index: 9, kind: input, shape index: {}]   ;;  %s6189_s10 = inlined_call_operand.hbm [shape: f32[16,1], index: 10, kind: input, shape index: {}]   ;;  %s6190_s11 = inlined_call_operand.hbm [shape: f32[16,3], index: 11, kind: input, shape index: {}]   ;;  %s6191_s12 = inlined_call_operand.hbm [shape: f32[16,1], index: 12, kind: input, shape index: {}]   ;;  %s6192_s13 = inlined_call_operand.hbm [shape: bf16[16,144], index: 13, kind: input, shape index: {}]   ;;  %s6193_s14 = inlined_call_operand.hbm [shape: f32[16,1], index: 14, kind: input, shape index: {}]   ;;  %s6194_s15 = inlined_call_operand.hbm [shape: bf16[16,16], index: 15, kind: input, shape index: {}]   ;;  %s6195_s16 = inlined_call_operand.hbm [shape: f32[4,16,256], index: 16, kind: output, shape index: {}]  }
   0x1   :  { %6222 = sst [smem:[#allocation50_spill]] %s6179_s0 }
   0x2   :  { %6223 = sst [smem:[#allocation51_spill]] %s6180_s1 }
   0x3   :  { %6224 = sst [smem:[#allocation52_spill]] %s6181_s2 }
   0x4   :  { %6225 = sst [smem:[#allocation53_spill]] %s6182_s3 }
   0x5   :  { %6226 = sst [smem:[#allocation54_spill]] %s6183_s4 }
   0x6   :  { %6227 = sst [smem:[#allocation55_spill]] %s6184_s5 }
   0x7   :  { %6228 = sst [smem:[#allocation56_spill]] %s6185_s6 }
   0x8   :  { %6229 = sst [smem:[#allocation57_spill]] %s6186_s7 }
   0x9   :  { %6230 = sst [smem:[#allocation58_spill]] %s6187_s8 }
   0xa   :  { %6231 = sst [smem:[#allocation59_spill]] %s6188_s9 }
   0xb   :  { %6232 = sst [smem:[#allocation60_spill]] %s6195_s16 }
   0xc   :  { %21 = vsyncpa [#allocation5], 0 }
   0xd   :  { %23 = vsyncpa [#allocation5 + $0x1], 0 }
   0xe   :  { %24 = vsyncpa [#allocation8], 0 }
   0xf   :  { %26 = vsyncpa [#allocation8 + $0x1], 0 }
  0x10   :  { %27 = vsyncpa [#allocation11], 0 }
  0x11   :  { %28 = vsyncpa [#allocation14], 0 }
  0x12   :  { %29 = vsyncpa [#allocation17], 0 }
  0x13   :  { %30 = vsyncpa [#allocation20], 0 }
  0x14   :  { %31 = vsyncpa [#allocation23], 0 }
  0x15   :  { %32 = vsyncpa [#allocation26], 0 }
  0x16   :  { %33 = vsyncpa [#allocation29], 0 }
  0x17   :  { %34 = vsyncpa [#allocation6], 0 }
  0x18   :  { %36 = vsyncpa [#allocation6 + $0x1], 0  ;;  %s4240_s21 = smov 0   ;;  %s4242_s22 = smov 0  }
  0x19   :  { %s4244_s23 = smov 0   ;;  %s4246_s24 = smov 0  }
  0x1a LB: > { %6233 = sst [smem:[#allocation42_spill]] %s4104_s21  ;;  %s4118_s25 = smov [#allocation9]   ;;  %s4116_s24 = sphi %s4246_s24, %s6309_s24   ;;  %s4112_s23 = sphi %s4244_s23, %s6308_s23   ;;  %s4108_s22 = sphi %s4242_s22, %s6307_s22   ;;  %s4104_s21 = sphi %s4240_s21, %s6306_s21  }
  0x1b   : > { %6234 = sst [smem:[#allocation43_spill]] %s4108_s22  ;;  %s431_s26 = sshll.u32 %s4118_s25, 4  ;;  %s4266_s26 = int_to_ptr.vmem [resolvable:$true] %s431_s26 }
  0x1c   : > { %6235 = sst [smem:[#allocation44_spill]] %s4112_s23  ;;  %s4261_s27 = sadd.s32 4294967295, %s4116_s24  }
  0x1d   : > { %6236 = sst [smem:[#allocation45_spill]] %s4261_s27  ;;  %p3212_p0 = scmp.ge.s32.totalorder %s4116_s24, 1 }
  0x1e   : > { %p6205_p1 = scmp.eq.s32.totalorder %s4261_s27, 0  ;;  %p419_p2 = scmp.lt.s32.totalorder %s4116_s24, 3 }
  0x1f   : > { %s4119_s29 = smov [#allocation10]   ;;  %s4120_s17 = smov [#allocation13]  }
  0x20   : > { %p4268_p3 = pnand %p3212_p0, %p419_p2  ;;  %s444_s30 = sshll.u32 %s4119_s29, 4  ;;  %s4281_s30 = int_to_ptr.vmem [resolvable:$true] %s444_s30 }
  0x21   : > { %s4283_s18 = sshll.u32 %s4120_s17, 4  ;;  %s6240_s2 = sld [smem:[#allocation52_spill]]  ;;  %s471_s18 = int_to_ptr.vmem [resolvable:$true] %s4283_s18 }
  0x22   : > { %s6237_s28 = scalar_select %p4268_p3, 1, 0 }
  0x23   : > { %p3364_p5 = pneg %p4268_p3 }
  0x24   : > { %6238 = sst [smem:[#allocation46_spill]] %s6237_s28 }
  0x25   : > { %p4277_p6 = pnand %p3364_p5, %p6205_p1 }
  0x27   : > { %s3562_s25 = scalar_lea.hbm %s6240_s2, 288  ;;  %p4293_p8 = pneg %p4277_p6 }
  0x28   : > { %p3563_p7 = scmp.ne.s32.totalorder %s6240_s2, %s3562_s25  ;;  %p3569_p11 = scmp.lt.u32.totalorder %s3562_s25, %s6240_s2 }
  0x2a   : > { %p3565_p9 = pnand %p4293_p8, %p3563_p7 }
  0x2c   : > { %p3566_p10 = pneg %p3565_p9 }
  0x2e   : > { %p3571_p12 = pnand %p3569_p11, %p3566_p10 }
  0x30   : > { %3574 = shalt.err (!%p3571_p12)
}
  0x31   : > { %s3575_s16 = scalar_lea.vmem %s4266_s26, 288  ;;  %p3583_p5 = scmp.lt.s32.totalorder %s4266_s26, %s4266_s26 }
  0x32   : > { %p3576_p13 = scmp.ne.s32.totalorder %s4266_s26, %s3575_s16  ;;  %p3584_p4 = scmp.lt.s32.totalorder %s3575_s16, %s3575_s16 }
  0x34   : > { %p3578_p0 = pnand %p3576_p13, %p4293_p8  ;;  %p3585_p7 = por %p3584_p4, %p3583_p5 }
  0x36   : > { %p3579_p2 = pneg %p3578_p0 }
  0x38   : > { %p3586_p9 = pnand %p3585_p7, %p3579_p2 }
  0x3a   : > { %3589 = shalt.err (!%p3586_p9)
}
  0x3b   : > { %s4121_s28 = smov 32   ;;  %s4122_s1 = smov 2  }
  0x3c   : > { %3367 = dma.hbm_to_vmem [thread:$0]  (!%p4277_p6), %s6240_s2, 288, %s4266_s26, [#allocation8], %s4121_s28, %s4121_s28, %s4122_s1  }
  0x3d   : > { %s6242_s3 = sld [smem:[#allocation53_spill]] }
  0x43   : > { %s3590_s27 = scalar_lea.hbm %s6242_s3, 256 }
  0x44   : > { %p3591_p4 = scmp.ne.s32.totalorder %s6242_s3, %s3590_s27  ;;  %p3597_p12 = scmp.lt.u32.totalorder %s3590_s27, %s6242_s3 }
  0x46   : > { %p3593_p10 = pnand %p3591_p4, %p4293_p8 }
  0x48   : > { %p3594_p11 = pneg %p3593_p10 }
  0x4a   : > { %p3599_p13 = pnand %p3597_p12, %p3594_p11 }
  0x4c   : > { %3602 = shalt.err (!%p3599_p13)
}
  0x4d   : > { %s3603_s26 = scalar_lea.vmem %s4281_s30, 256  ;;  %p3611_p7 = scmp.lt.s32.totalorder %s4281_s30, %s4281_s30 }
  0x4e   : > { %p3604_p0 = scmp.ne.s32.totalorder %s4281_s30, %s3603_s26  ;;  %p3612_p9 = scmp.lt.s32.totalorder %s3603_s26, %s3603_s26 }
  0x50   : > { %p3606_p2 = pnand %p3604_p0, %p4293_p8  ;;  %p3613_p4 = por %p3612_p9, %p3611_p7 }
  0x52   : > { %p3607_p5 = pneg %p3606_p2 }
  0x54   : > { %p3614_p10 = pnand %p3613_p4, %p3607_p5 }
  0x56   : > { %3617 = shalt.err (!%p3614_p10)
}
  0x57   : > { %s6207_s21 = smov 128   ;;  %s6208_s22 = smov 8  }
  0x58   : > { %3370 = dma.hbm_to_vmem [thread:$0]  (!%p4277_p6), %s6242_s3, 256, %s4281_s30, [#allocation11], %s6207_s21, %s6207_s21, %s6208_s22  }
  0x59   : > { %s6243_s5 = sld [smem:[#allocation55_spill]] }
  0x5f   : > { %s3618_s19 = scalar_lea.hbm %s6243_s5, 256 }
  0x60   : > { %p3619_p11 = scmp.ne.s32.totalorder %s6243_s5, %s3618_s19  ;;  %p3625_p0 = scmp.lt.u32.totalorder %s3618_s19, %s6243_s5 }
  0x62   : > { %p3621_p12 = pnand %p3619_p11, %p4293_p8 }
  0x64   : > { %p3622_p13 = pneg %p3621_p12 }
  0x66   : > { %p3627_p2 = pnand %p3625_p0, %p3622_p13 }
  0x68   : > { %3630 = shalt.err (!%p3627_p2)
}
  0x69   : > { %s3631_s26 = scalar_lea.vmem %s471_s18, 256  ;;  %p3639_p4 = scmp.lt.s32.totalorder %s471_s18, %s471_s18 }
  0x6a   : > { %p3632_p5 = scmp.ne.s32.totalorder %s471_s18, %s3631_s26  ;;  %p3640_p10 = scmp.lt.s32.totalorder %s3631_s26, %s3631_s26 }
  0x6c   : > { %p3634_p7 = pnand %p3632_p5, %p4293_p8  ;;  %p3641_p1 = por %p3640_p10, %p3639_p4 }
  0x6e   : > { %p3635_p9 = pneg %p3634_p7 }
  0x70   : > { %p3642_p3 = pnand %p3641_p1, %p3635_p9 }
  0x72   : > { %3645 = shalt.err (!%p3642_p3)
}
  0x73   : > { %3376 = dma.hbm_to_vmem [thread:$0]  (!%p4277_p6), %s6243_s5, 256, %s471_s18, [#allocation14], %s6207_s21, %s6207_s21, %s6208_s22  }
  0x74   : > { %s4125_s27 = smov [#allocation16]   ;;  %s4126_s1 = smov [#allocation19]  }
  0x75   : > { %s496_s28 = sshll.u32 %s4125_s27, 4  ;;  %s522_s19 = sshll.u32 %s4126_s1, 4  ;;  %s497_s28 = int_to_ptr.vmem [resolvable:$true] %s496_s28  ;;  %s523_s19 = int_to_ptr.vmem [resolvable:$true] %s522_s19 }
  0x76   : > { %s6244_s7 = sld [smem:[#allocation57_spill]] }
  0x7c   : > { %s3646_s17 = scalar_lea.hbm %s6244_s7, 256 }
  0x7d   : > { %p3647_p1 = scmp.ne.s32.totalorder %s6244_s7, %s3646_s17  ;;  %p3653_p12 = scmp.lt.u32.totalorder %s3646_s17, %s6244_s7 }
  0x7f   : > { %p3649_p3 = pnand %p3647_p1, %p4293_p8 }
  0x81   : > { %p3650_p11 = pneg %p3649_p3 }
  0x83   : > { %p3655_p13 = pnand %p3653_p12, %p3650_p11 }
  0x85   : > { %3658 = shalt.err (!%p3655_p13)
}
  0x86   : > { %s3659_s18 = scalar_lea.vmem %s497_s28, 256  ;;  %p3667_p7 = scmp.lt.s32.totalorder %s497_s28, %s497_s28 }
  0x87   : > { %p3660_p0 = scmp.ne.s32.totalorder %s497_s28, %s3659_s18  ;;  %p3668_p9 = scmp.lt.s32.totalorder %s3659_s18, %s3659_s18 }
  0x89   : > { %p3662_p2 = pnand %p3660_p0, %p4293_p8  ;;  %p3669_p4 = por %p3668_p9, %p3667_p7 }
  0x8b   : > { %p3663_p5 = pneg %p3662_p2 }
  0x8d   : > { %p3670_p10 = pnand %p3669_p4, %p3663_p5 }
  0x8f   : > { %3673 = shalt.err (!%p3670_p10)
}
  0x90   : > { %3382 = dma.hbm_to_vmem [thread:$0]  (!%p4277_p6), %s6244_s7, 256, %s497_s28, [#allocation17], %s6207_s21, %s6207_s21, %s6208_s22  }
  0x91   : > { %s6245_s9 = sld [smem:[#allocation59_spill]] }
  0x97   : > { %s3674_s20 = scalar_lea.hbm %s6245_s9, 256 }
  0x98   : > { %p3675_p1 = scmp.ne.s32.totalorder %s6245_s9, %s3674_s20  ;;  %p3681_p12 = scmp.lt.u32.totalorder %s3674_s20, %s6245_s9 }
  0x9a   : > { %p3677_p3 = pnand %p3675_p1, %p4293_p8 }
  0x9c   : > { %p3678_p11 = pneg %p3677_p3 }
  0x9e   : > { %p3683_p13 = pnand %p3681_p12, %p3678_p11 }
  0xa0   : > { %3686 = shalt.err (!%p3683_p13)
}
  0xa1   : > { %s3687_s30 = scalar_lea.vmem %s523_s19, 256  ;;  %p3695_p7 = scmp.lt.s32.totalorder %s523_s19, %s523_s19 }
  0xa2   : > { %p3688_p0 = scmp.ne.s32.totalorder %s523_s19, %s3687_s30  ;;  %p3696_p9 = scmp.lt.s32.totalorder %s3687_s30, %s3687_s30 }
  0xa4   : > { %p3690_p2 = pnand %p3688_p0, %p4293_p8  ;;  %p3697_p4 = por %p3696_p9, %p3695_p7 }
  0xa6   : > { %p3691_p5 = pneg %p3690_p2 }
  0xa8   : > { %p3698_p10 = pnand %p3697_p4, %p3691_p5 }
  0xaa   : > { %3701 = shalt.err (!%p3698_p10)
}
  0xab   : > { %3388 = dma.hbm_to_vmem [thread:$0]  (!%p4277_p6), %s6245_s9, 256, %s523_s19, [#allocation20], %s6207_s21, %s6207_s21, %s6208_s22  }
  0xac   : > { %s4127_s2 = smov [#allocation22]   ;;  %s4128_s27 = smov [#allocation25]  }
  0xad   : > { %s548_s23 = sshll.u32 %s4127_s2, 4  ;;  %s574_s1 = sshll.u32 %s4128_s27, 4  ;;  %s549_s23 = int_to_ptr.vmem [resolvable:$true] %s548_s23  ;;  %s575_s1 = int_to_ptr.vmem [resolvable:$true] %s574_s1 }
  0xae   : > { %s3702_s17 = scalar_lea.hbm %s6190_s11, 256 }
  0xaf   : > { %p3703_p1 = scmp.ne.s32.totalorder %s6190_s11, %s3702_s17  ;;  %p3709_p12 = scmp.lt.u32.totalorder %s3702_s17, %s6190_s11 }
  0xb1   : > { %p3705_p3 = pnand %p3703_p1, %p4293_p8 }
  0xb3   : > { %p3706_p11 = pneg %p3705_p3 }
  0xb5   : > { %p3711_p13 = pnand %p3709_p12, %p3706_p11 }
  0xb7   : > { %3714 = shalt.err (!%p3711_p13)
}
  0xb8   : > { %s3715_s19 = scalar_lea.vmem %s549_s23, 256  ;;  %p3723_p7 = scmp.lt.s32.totalorder %s549_s23, %s549_s23 }
  0xb9   : > { %p3716_p0 = scmp.ne.s32.totalorder %s549_s23, %s3715_s19  ;;  %p3724_p9 = scmp.lt.s32.totalorder %s3715_s19, %s3715_s19 }
  0xbb   : > { %p3718_p2 = pnand %p3716_p0, %p4293_p8  ;;  %p3725_p4 = por %p3724_p9, %p3723_p7 }
  0xbd   : > { %p3719_p5 = pneg %p3718_p2 }
  0xbf   : > { %p3726_p10 = pnand %p3725_p4, %p3719_p5 }
  0xc1   : > { %3729 = shalt.err (!%p3726_p10)
}
  0xc2   : > { %3394 = dma.hbm_to_vmem [thread:$0]  (!%p4277_p6), %s6190_s11, 256, %s549_s23, [#allocation23], %s6207_s21, %s6207_s21, %s6208_s22  }
  0xc3   : > { %s3730_s25 = scalar_lea.hbm %s6192_s13, 256 }
  0xc4   : > { %p3731_p1 = scmp.ne.s32.totalorder %s6192_s13, %s3730_s25  ;;  %p3737_p12 = scmp.lt.u32.totalorder %s3730_s25, %s6192_s13 }
  0xc6   : > { %p3733_p3 = pnand %p3731_p1, %p4293_p8 }
  0xc8   : > { %p3734_p11 = pneg %p3733_p3 }
  0xca   : > { %p3739_p13 = pnand %p3737_p12, %p3734_p11 }
  0xcc   : > { %3742 = shalt.err (!%p3739_p13)
}
  0xcd   : > { %s3743_s28 = scalar_lea.vmem %s575_s1, 256  ;;  %p3751_p7 = scmp.lt.s32.totalorder %s575_s1, %s575_s1 }
  0xce   : > { %p3744_p0 = scmp.ne.s32.totalorder %s575_s1, %s3743_s28  ;;  %p3752_p9 = scmp.lt.s32.totalorder %s3743_s28, %s3743_s28 }
  0xd0   : > { %p3746_p2 = pnand %p3744_p0, %p4293_p8  ;;  %p3753_p4 = por %p3752_p9, %p3751_p7 }
  0xd2   : > { %p3747_p5 = pneg %p3746_p2 }
  0xd4   : > { %p3754_p10 = pnand %p3753_p4, %p3747_p5 }
  0xd6   : > { %3757 = shalt.err (!%p3754_p10)
}
  0xd7   : > { %3400 = dma.hbm_to_vmem [thread:$0]  (!%p4277_p6), %s6192_s13, 256, %s575_s1, [#allocation26], %s6207_s21, %s6207_s21, %s6208_s22  }
  0xd8   : > { %s4129_s18 = smov [#allocation12]   ;;  %s4130_s27 = smov [#allocation15]  }
  0xd9   : > { %s457_s2 = sshll.u32 %s4129_s18, 4  ;;  %s483_s20 = sshll.u32 %s4130_s27, 4  ;;  %s458_s2 = int_to_ptr.vmem [resolvable:$true] %s457_s2  ;;  %s484_s20 = int_to_ptr.vmem [resolvable:$true] %s483_s20 }
  0xda   : > { %s6246_s4 = sld [smem:[#allocation54_spill]] }
  0xe0   : > { %s3758_s16 = scalar_lea.hbm %s6246_s4, 256 }
  0xe1   : > { %p3759_p1 = scmp.ne.s32.totalorder %s6246_s4, %s3758_s16  ;;  %p3765_p12 = scmp.lt.u32.totalorder %s3758_s16, %s6246_s4 }
  0xe3   : > { %p3761_p3 = pnand %p3759_p1, %p4293_p8 }
  0xe5   : > { %p3762_p11 = pneg %p3761_p3 }
  0xe7   : > { %p3767_p13 = pnand %p3765_p12, %p3762_p11 }
  0xe9   : > { %3770 = shalt.err (!%p3767_p13)
}
  0xea   : > { %s3771_s1 = scalar_lea.vmem %s458_s2, 256  ;;  %p3779_p7 = scmp.lt.s32.totalorder %s458_s2, %s458_s2 }
  0xeb   : > { %p3772_p0 = scmp.ne.s32.totalorder %s458_s2, %s3771_s1  ;;  %p3780_p9 = scmp.lt.s32.totalorder %s3771_s1, %s3771_s1 }
  0xed   : > { %p3774_p2 = pnand %p3772_p0, %p4293_p8  ;;  %p3781_p4 = por %p3780_p9, %p3779_p7 }
  0xef   : > { %p3775_p5 = pneg %p3774_p2 }
  0xf1   : > { %p3782_p10 = pnand %p3781_p4, %p3775_p5 }
  0xf3   : > { %3785 = shalt.err (!%p3782_p10)
}
  0xf4   : > { %3373 = dma.hbm_to_vmem [thread:$0]  (!%p4277_p6), %s6246_s4, 256, %s458_s2, [#allocation11], %s6207_s21, %s6207_s21, %s6208_s22  }
  0xf5   : > { %s6247_s6 = sld [smem:[#allocation56_spill]] }
  0xfb   : > { %s3786_s17 = scalar_lea.hbm %s6247_s6, 256 }
  0xfc   : > { %p3787_p1 = scmp.ne.s32.totalorder %s6247_s6, %s3786_s17  ;;  %p3793_p12 = scmp.lt.u32.totalorder %s3786_s17, %s6247_s6 }
  0xfe   : > { %p3789_p3 = pnand %p3787_p1, %p4293_p8 }
 0x100   : > { %p3790_p11 = pneg %p3789_p3 }
 0x102   : > { %p3795_p13 = pnand %p3793_p12, %p3790_p11 }
 0x104   : > { %3798 = shalt.err (!%p3795_p13)
}
 0x105   : > { %s3799_s23 = scalar_lea.vmem %s484_s20, 256  ;;  %p3807_p7 = scmp.lt.s32.totalorder %s484_s20, %s484_s20 }
 0x106   : > { %p3800_p0 = scmp.ne.s32.totalorder %s484_s20, %s3799_s23  ;;  %p3808_p9 = scmp.lt.s32.totalorder %s3799_s23, %s3799_s23 }
 0x108   : > { %p3802_p2 = pnand %p3800_p0, %p4293_p8  ;;  %p3809_p4 = por %p3808_p9, %p3807_p7 }
 0x10a   : > { %p3803_p5 = pneg %p3802_p2 }
 0x10c   : > { %p3810_p10 = pnand %p3809_p4, %p3803_p5 }
 0x10e   : > { %3813 = shalt.err (!%p3810_p10)
}
 0x10f   : > { %3379 = dma.hbm_to_vmem [thread:$0]  (!%p4277_p6), %s6247_s6, 256, %s484_s20, [#allocation14], %s6207_s21, %s6207_s21, %s6208_s22  }
 0x110   : > { %s4131_s19 = smov [#allocation18]   ;;  %s4132_s27 = smov [#allocation21]  }
 0x111   : > { %s509_s18 = sshll.u32 %s4131_s19, 4  ;;  %s535_s25 = sshll.u32 %s4132_s27, 4  ;;  %s510_s18 = int_to_ptr.vmem [resolvable:$true] %s509_s18  ;;  %s536_s25 = int_to_ptr.vmem [resolvable:$true] %s535_s25 }
 0x112   : > { %s6248_s8 = sld [smem:[#allocation58_spill]] }
 0x118   : > { %s3814_s26 = scalar_lea.hbm %s6248_s8, 256 }
 0x119   : > { %p3815_p1 = scmp.ne.s32.totalorder %s6248_s8, %s3814_s26  ;;  %p3821_p12 = scmp.lt.u32.totalorder %s3814_s26, %s6248_s8 }
 0x11b   : > { %p3817_p3 = pnand %p3815_p1, %p4293_p8 }
 0x11d   : > { %p3818_p11 = pneg %p3817_p3 }
 0x11f   : > { %p3823_p13 = pnand %p3821_p12, %p3818_p11 }
 0x121   : > { %3826 = shalt.err (!%p3823_p13)
}
 0x122   : > { %s3827_s20 = scalar_lea.vmem %s510_s18, 256  ;;  %p3835_p7 = scmp.lt.s32.totalorder %s510_s18, %s510_s18 }
 0x123   : > { %p3828_p0 = scmp.ne.s32.totalorder %s510_s18, %s3827_s20  ;;  %p3836_p9 = scmp.lt.s32.totalorder %s3827_s20, %s3827_s20 }
 0x125   : > { %p3830_p2 = pnand %p3828_p0, %p4293_p8  ;;  %p3837_p4 = por %p3836_p9, %p3835_p7 }
 0x127   : > { %p3831_p5 = pneg %p3830_p2 }
 0x129   : > { %p3838_p10 = pnand %p3837_p4, %p3831_p5 }
 0x12b   : > { %3841 = shalt.err (!%p3838_p10)
}
 0x12c   : > { %3385 = dma.hbm_to_vmem [thread:$0]  (!%p4277_p6), %s6248_s8, 256, %s510_s18, [#allocation17], %s6207_s21, %s6207_s21, %s6208_s22  }
 0x12d   : > { %s3842_s16 = scalar_lea.hbm %s6189_s10, 256 }
 0x12e   : > { %p3843_p1 = scmp.ne.s32.totalorder %s6189_s10, %s3842_s16  ;;  %p3849_p12 = scmp.lt.u32.totalorder %s3842_s16, %s6189_s10 }
 0x130   : > { %p3845_p3 = pnand %p3843_p1, %p4293_p8 }
 0x132   : > { %p3846_p11 = pneg %p3845_p3 }
 0x134   : > { %p3851_p13 = pnand %p3849_p12, %p3846_p11 }
 0x136   : > { %3854 = shalt.err (!%p3851_p13)
}
 0x137   : > { %s3855_s2 = scalar_lea.vmem %s536_s25, 256  ;;  %p3863_p7 = scmp.lt.s32.totalorder %s536_s25, %s536_s25 }
 0x138   : > { %p3856_p0 = scmp.ne.s32.totalorder %s536_s25, %s3855_s2  ;;  %p3864_p9 = scmp.lt.s32.totalorder %s3855_s2, %s3855_s2 }
 0x13a   : > { %p3858_p2 = pnand %p3856_p0, %p4293_p8  ;;  %p3865_p4 = por %p3864_p9, %p3863_p7 }
 0x13c   : > { %p3859_p5 = pneg %p3858_p2 }
 0x13e   : > { %p3866_p10 = pnand %p3865_p4, %p3859_p5 }
 0x140   : > { %3869 = shalt.err (!%p3866_p10)
}
 0x141   : > { %3391 = dma.hbm_to_vmem [thread:$0]  (!%p4277_p6), %s6189_s10, 256, %s536_s25, [#allocation20], %s6207_s21, %s6207_s21, %s6208_s22  }
 0x142   : > { %s4133_s1 = smov [#allocation24]   ;;  %s4134_s27 = smov [#allocation27]  }
 0x143   : > { %s561_s19 = sshll.u32 %s4133_s1, 4  ;;  %s587_s17 = sshll.u32 %s4134_s27, 4  ;;  %s562_s19 = int_to_ptr.vmem [resolvable:$true] %s561_s19  ;;  %s588_s17 = int_to_ptr.vmem [resolvable:$true] %s587_s17 }
 0x144   : > { %s3870_s30 = scalar_lea.hbm %s6191_s12, 256 }
 0x145   : > { %p3871_p1 = scmp.ne.s32.totalorder %s6191_s12, %s3870_s30  ;;  %p3877_p12 = scmp.lt.u32.totalorder %s3870_s30, %s6191_s12 }
 0x147   : > { %p3873_p3 = pnand %p3871_p1, %p4293_p8 }
 0x149   : > { %p3874_p11 = pneg %p3873_p3 }
 0x14b   : > { %p3879_p13 = pnand %p3877_p12, %p3874_p11 }
 0x14d   : > { %3882 = shalt.err (!%p3879_p13)
}
 0x14e   : > { %s3883_s25 = scalar_lea.vmem %s562_s19, 256  ;;  %p3891_p7 = scmp.lt.s32.totalorder %s562_s19, %s562_s19 }
 0x14f   : > { %p3884_p0 = scmp.ne.s32.totalorder %s562_s19, %s3883_s25  ;;  %p3892_p9 = scmp.lt.s32.totalorder %s3883_s25, %s3883_s25 }
 0x151   : > { %p3886_p2 = pnand %p3884_p0, %p4293_p8  ;;  %p3893_p4 = por %p3892_p9, %p3891_p7 }
 0x153   : > { %p3887_p5 = pneg %p3886_p2 }
 0x155   : > { %p3894_p10 = pnand %p3893_p4, %p3887_p5 }
 0x157   : > { %3897 = shalt.err (!%p3894_p10)
}
 0x158   : > { %3397 = dma.hbm_to_vmem [thread:$0]  (!%p4277_p6), %s6191_s12, 256, %s562_s19, [#allocation23], %s6207_s21, %s6207_s21, %s6208_s22  }
 0x159   : > { %s3898_s26 = scalar_lea.hbm %s6193_s14, 256 }
 0x15a   : > { %p3899_p1 = scmp.ne.s32.totalorder %s6193_s14, %s3898_s26  ;;  %p3905_p12 = scmp.lt.u32.totalorder %s3898_s26, %s6193_s14 }
 0x15c   : > { %p3901_p3 = pnand %p3899_p1, %p4293_p8 }
 0x15e   : > { %p3902_p11 = pneg %p3901_p3 }
 0x160   : > { %p3907_p13 = pnand %p3905_p12, %p3902_p11 }
 0x162   : > { %3910 = shalt.err (!%p3907_p13)
}
 0x163   : > { %s3911_s18 = scalar_lea.vmem %s588_s17, 256  ;;  %p3919_p7 = scmp.lt.s32.totalorder %s588_s17, %s588_s17 }
 0x164   : > { %p3912_p0 = scmp.ne.s32.totalorder %s588_s17, %s3911_s18  ;;  %p3920_p9 = scmp.lt.s32.totalorder %s3911_s18, %s3911_s18 }
 0x166   : > { %p3914_p2 = pnand %p3912_p0, %p4293_p8  ;;  %p3921_p4 = por %p3920_p9, %p3919_p7 }
 0x168   : > { %p3915_p5 = pneg %p3914_p2 }
 0x16a   : > { %p3922_p10 = pnand %p3921_p4, %p3915_p5 }
 0x16c   : > { %3925 = shalt.err (!%p3922_p10)
}
 0x16d   : > { %3403 = dma.hbm_to_vmem [thread:$0]  (!%p4277_p6), %s6193_s14, 256, %s588_s17, [#allocation26], %s6207_s21, %s6207_s21, %s6208_s22  }
 0x16e   : > { %s4135_s20 = smov [#allocation28]   ;;  %s3926_s26 = scalar_lea.hbm %s6194_s15, 128 }
 0x16f   : > { %s600_s1 = sshll.u32 %s4135_s20, 4  ;;  %p3927_p1 = scmp.ne.s32.totalorder %s6194_s15, %s3926_s26  ;;  %s601_s1 = int_to_ptr.vmem [resolvable:$true] %s600_s1 }
 0x170   : > { %p3933_p12 = scmp.lt.u32.totalorder %s3926_s26, %s6194_s15 }
 0x171   : > { %p3929_p3 = pnand %p3927_p1, %p4293_p8 }
 0x173   : > { %p3930_p11 = pneg %p3929_p3 }
 0x175   : > { %p3935_p13 = pnand %p3933_p12, %p3930_p11 }
 0x177   : > { %3938 = shalt.err (!%p3935_p13)
}
 0x178   : > { %s3939_s17 = scalar_lea.vmem %s601_s1, 128  ;;  %p3947_p7 = scmp.lt.s32.totalorder %s601_s1, %s601_s1 }
 0x179   : > { %p3940_p0 = scmp.ne.s32.totalorder %s601_s1, %s3939_s17  ;;  %p3948_p9 = scmp.lt.s32.totalorder %s3939_s17, %s3939_s17 }
 0x17b   : > { %p3942_p2 = pnand %p3940_p0, %p4293_p8  ;;  %p3949_p4 = por %p3948_p9, %p3947_p7 }
 0x17d   : > { %p3943_p5 = pneg %p3942_p2 }
 0x17f   : > { %p3950_p10 = pnand %p3949_p4, %p3943_p5 }
 0x181   : > { %3953 = shalt.err (!%p3950_p10)
}
 0x182   : > { %s4136_s18 = smov 64   ;;  %s6249_s19 = sld [smem:[#allocation44_spill]] }
 0x183   : > { %s6250_s25 = sld [smem:[#allocation43_spill]]  ;;  %s6251_s20 = sld [smem:[#allocation42_spill]] }
 0x184   : > { %s6252_s29 = sld [smem:[#allocation45_spill]]  ;;  %s4137_s27 = smov 4  }
 0x185   : > { %3406 = dma.hbm_to_vmem [thread:$0]  (!%p4277_p6), %s6194_s15, 128, %s601_s1, [#allocation29], %s4136_s18, %s4136_s18, %s4137_s27  }
 0x186   : > { %s3211_s30 = sadd.s32 4294967294, %s4116_s24   ;;  %s4592_s28 = sadd.s32 1, %s4116_s24  }
 0x187   : > { %s46_s23 = ssub.s32 %s4116_s24, %s4592_s28  ;;  %p57_p3 = scmp.eq.s32.totalorder %s4116_s24, 0 }
 0x188   : > { %s49_s2 = sadd.s32 1, %s6249_s19  ;;  %p47_p8 = scmp.eq.s32.totalorder %s46_s23, 0 }
 0x189   : > { %p56_p1 = scmp.ne.s32.totalorder %s6249_s19, %s6250_s25  ;;  %p62_p11 = scmp.ne.s32.totalorder %s6250_s25, %s6251_s20 }
 0x18a   : > { %s4603_s17 = scalar_select %p47_p8, %s6249_s19, %s49_s2  }
 0x18b   : > { %p4605_p12 = por %p57_p3, %p56_p1  ;;  %p6254_p13 = scmp.eq.s32.totalorder %s6252_s29, 0 }
 0x18c   : > { %p406_p0 = scmp.eq.s32.totalorder %s6252_s29, 1  ;;  %p412_p2 = scmp.eq.s32.totalorder %s3211_s30, 1 }
 0x18d   : > { %p4611_p6 = por %p6254_p13, %p62_p11  ;;  %p3432_p5 = scmp.lt.s32.totalorder %s4116_s24, 2 }
 0x18e   : > { %s4618_s18 = sand.u32 1, %s6249_s19   ;;  %p4620_p7 = por %p406_p0, %p56_p1 }
 0x18f   : > { %p4624_p9 = por %p412_p2, %p62_p11  ;;  %s3228_s27 = sshll.u32 %s4618_s18, 6 }
 0x190   : > { %s6256_s25 = scalar_select %p4620_p7, 1, 0 }
 0x191   : > { %s6257_s20 = scalar_select %p4624_p9, 1, 0 }
 0x192   : > { %s3281_s16 = sshll.u32 %s4116_s24, 10  ;;  %s6258_s2 = sld [smem:[#allocation50_spill]] }
 0x193   : > { %s618_s19 = scalar_lea.vmem [#allocation4], %s3228_s27  ;;  %p4639_p4 = pnand %p3432_p5, %p4605_p12 }
 0x194   : > { %s626_s30 = sshll.u32 %s618_s19, 4  ;;  %s615_s3 = scalar_lea.sflag [#allocation5], %s4618_s18  ;;  %s4635_s30 = int_to_ptr.vmem [resolvable:$true] %s626_s30 }
 0x195   : > { %p3956_p8 = pneg %p4639_p4 }
 0x198   : > { %s4633_s29 = scalar_lea.hbm %s6258_s2, %s3281_s16  ;;  %s3959_s0 = scalar_lea.hbm %s6258_s2, 2048 }
 0x199   : > { %s3954_s26 = scalar_lea.hbm %s4633_s29, 1024  ;;  %p3960_p11 = scmp.lt.u32.totalorder %s4633_s29, %s6258_s2 }
 0x19a   : > { %p3955_p10 = scmp.ne.s32.totalorder %s4633_s29, %s3954_s26  ;;  %p3961_p12 = scmp.lt.u32.totalorder %s3959_s0, %s3954_s26 }
 0x19b   : > { %p3963_p0 = scmp.lt.u32.totalorder %s3954_s26, %s4633_s29 }
 0x19c   : > { %p3957_p1 = pnand %p3956_p8, %p3955_p10  ;;  %p3962_p13 = por %p3961_p12, %p3960_p11 }
 0x19e   : > { %p3958_p3 = pneg %p3957_p1  ;;  %p3964_p2 = por %p3963_p0, %p3962_p13 }
 0x1a0   : > { %p3965_p5 = pnand %p3964_p2, %p3958_p3 }
 0x1a2   : > { %3968 = shalt.err (!%p3965_p5)
}
 0x1a3   : > { %s3969_s22 = scalar_lea.vmem %s4635_s30, 1024  ;;  %s4138_s27 = smov [#allocation4]  }
 0x1a4   : > { %p3970_p10 = scmp.ne.s32.totalorder %s4635_s30, %s3969_s22  ;;  %s3974_s16 = sshll.u32 %s4138_s27, 4  ;;  %s3975_s16 = int_to_ptr.vmem [resolvable:$false] %s3974_s16 }
 0x1a5   : > { %s3976_s23 = scalar_lea.vmem %s3975_s16, 2048  ;;  %p3977_p7 = scmp.lt.s32.totalorder %s4635_s30, %s3975_s16 }
 0x1a6   : > { %p3972_p1 = pnand %p3970_p10, %p3956_p8  ;;  %p3978_p11 = scmp.lt.s32.totalorder %s3976_s23, %s3969_s22 }
 0x1a8   : > { %p3973_p9 = pneg %p3972_p1  ;;  %p3979_p12 = por %p3978_p11, %p3977_p7 }
 0x1aa   : > { %p3980_p13 = pnand %p3979_p12, %p3973_p9 }
 0x1ac   : > { %3983 = shalt.err (!%p3980_p13)
}
 0x1ad   : > { %s4139_s26 = smov 256   ;;  %s4140_s0 = smov 16  }
 0x1ae   : > { %3410 = dma.hbm_to_vmem [thread:$0]  (!%p4639_p4), %s4633_s29, 1024, %s4635_s30, %s615_s3, %s4139_s26, %s4139_s26, %s4140_s0  }
 0x1af   : > { %s3232_s19 = sshll.u32 %s4618_s18, 4  ;;  %s3283_s27 = sshll.u32 %s4116_s24, 8 }
 0x1b0   : > { %s6260_s23 = sld [smem:[#allocation51_spill]]  ;;  %s640_s5 = scalar_lea.vmem [#allocation7], %s3232_s19 }
 0x1b1   : > { %s648_s6 = sshll.u32 %s640_s5, 4  ;;  %s6262_s7 = sand.u32 1, %s4116_s24   ;;  %s4679_s6 = int_to_ptr.vmem [resolvable:$true] %s648_s6 }
 0x1b2   : > { %s4683_s8 = scalar_lea.sflag [#allocation8], %s6262_s7 }
 0x1b6   : > { %s6261_s2 = smov %s6260_s23  ;;  %s4677_s4 = scalar_lea.hbm %s6260_s23, %s3283_s27 }
 0x1b7   : > { %s3984_s9 = scalar_lea.hbm %s4677_s4, 256  ;;  %s3989_s29 = scalar_lea.hbm %s6261_s2, 512 }
 0x1b8   : > { %p3985_p7 = scmp.ne.s32.totalorder %s4677_s4, %s3984_s9  ;;  %p3990_p0 = scmp.lt.u32.totalorder %s4677_s4, %s6261_s2 }
 0x1b9   : > { %p3991_p2 = scmp.lt.u32.totalorder %s3989_s29, %s3984_s9  ;;  %p3993_p10 = scmp.lt.u32.totalorder %s3984_s9, %s4677_s4 }
 0x1ba   : > { %p3987_p9 = pnand %p3985_p7, %p3956_p8 }
 0x1bb   : > { %p3992_p5 = por %p3991_p2, %p3990_p0 }
 0x1bc   : > { %p3988_p3 = pneg %p3987_p9 }
 0x1bd   : > { %p3994_p1 = por %p3993_p10, %p3992_p5 }
 0x1bf   : > { %p3995_p11 = pnand %p3994_p1, %p3988_p3 }
 0x1c1   : > { %3998 = shalt.err (!%p3995_p11)
}
 0x1c2   : > { %s3999_s5 = scalar_lea.vmem %s4679_s6, 256  ;;  %s4141_s7 = smov [#allocation7]  }
 0x1c3   : > { %p4000_p12 = scmp.ne.s32.totalorder %s4679_s6, %s3999_s5  ;;  %s4004_s0 = sshll.u32 %s4141_s7, 4  ;;  %s4005_s0 = int_to_ptr.vmem [resolvable:$false] %s4004_s0 }
 0x1c4   : > { %s4006_s19 = scalar_lea.vmem %s4005_s0, 512  ;;  %p4007_p9 = scmp.lt.s32.totalorder %s4679_s6, %s4005_s0 }
 0x1c5   : > { %p4002_p13 = pnand %p4000_p12, %p3956_p8  ;;  %p4008_p0 = scmp.lt.s32.totalorder %s4006_s19, %s3999_s5 }
 0x1c7   : > { %p4003_p7 = pneg %p4002_p13  ;;  %p4009_p2 = por %p4008_p0, %p4007_p9 }
 0x1c9   : > { %p4010_p5 = pnand %p4009_p2, %p4003_p7 }
 0x1cb   : > { %4013 = shalt.err (!%p4010_p5)
}
 0x1cc   : > { %s6263_s9 = smov 8   ;;  %s6264_s27 = smov 128  }
 0x1cd   : > { %3413 = dma.hbm_to_vmem [thread:$0]  (!%p4639_p4), %s4677_s4, 256, %s4679_s6, %s4683_s8, %s6264_s27, %s6264_s27, %s6263_s9  }
 0x1ce   : > { %s6265_s16 = sld [smem:[#allocation46_spill]] }
 0x1d4   : > { %p6266_p8 = scmp.ne.s32.totalorder %s6265_s16, 0 }
 0x1d6   : > { %660 = sbr.rel (%p6266_p8) target bundleno = 1814 (0x716), region = 84 }
 0x1dd   : > { %s6267_s22 = sld [smem:[#allocation43_spill]] }
 0x1e3   : > { %s4715_s23 = sand.u32 1, %s6267_s22  }
 0x1e4   : > { %s3237_s3 = sshll.u32 %s4715_s23, 6  ;;  %s663_s18 = scalar_lea.sflag [#allocation5], %s4715_s23 }
 0x1e5   : > { %s4721_s21 = scalar_lea.vmem [#allocation4], %s3237_s3 }
 0x1e6   : > { %4059 = dma.done.wait (%p4611_p6), %s663_s18, 1024  }
 0x1e7   : > { %4061 = vsyncadd (%p4611_p6), %s663_s18, 4294966272  ;;  %s6268_s4 = sld [smem:[#allocation45_spill]]  ;;  %s3238_s8 = sshll.u32 %s4715_s23, 4 }
 0x1e8   : > { %s4729_s30 = scalar_lea.vmem [#allocation7], %s3238_s8 }
 0x1ed   : > { %s671_s6 = sand.u32 1, %s6268_s4  }
 0x1ee   : > { %s672_s29 = scalar_lea.sflag [#allocation8], %s671_s6 }
 0x1ef   : > { %4063 = dma.done.wait (%p4611_p6), %s672_s29, 256  }
 0x1f0   : > { %4065 = vsyncadd (%p4611_p6), %s672_s29, 4294967040  ;;  %p6269_p4 = scmp.eq.s32.totalorder %s6268_s4, 0 }
 0x1f2   : > { %4067 = dma.done.wait (%p6269_p4), [#allocation8], 288   ;;  %p6270_p3 = pmov %p6269_p4 }
 0x1f4   : > { %4069 = vsyncadd (%p6270_p3), [#allocation8], 4294967008  ;;  %p6271_p10 = pmov %p6270_p3 }
 0x1f5   : > { %p6272_p1 = pmov %p6270_p3 }
 0x1f6   : > { %4071 = dma.done.wait (%p6271_p10), [#allocation11], 512  }
 0x1f7   : > { %4073 = vsyncadd (%p6272_p1), [#allocation11], 4294966784  ;;  %p6273_p11 = pmov %p6272_p1 }
 0x1f8   : > { %p6274_p12 = pmov %p6272_p1 }
 0x1f9   : > { %4075 = dma.done.wait (%p6273_p11), [#allocation14], 512  }
 0x1fa   : > { %4077 = vsyncadd (%p6274_p12), [#allocation14], 4294966784  ;;  %p6275_p6 = pmov %p6272_p1 }
 0x1fb   : > { %p6276_p13 = pmov %p6272_p1 }
 0x1fc   : > { %4079 = dma.done.wait (%p6275_p6), [#allocation17], 512  }
 0x1fd   : > { %4081 = vsyncadd (%p6276_p13), [#allocation17], 4294966784  ;;  %p6277_p7 = pmov %p6272_p1 }
 0x1fe   : > { %p6278_p9 = pmov %p6272_p1 }
 0x1ff   : > { %4083 = dma.done.wait (%p6277_p7), [#allocation20], 512  }
 0x200   : > { %4085 = vsyncadd (%p6278_p9), [#allocation20], 4294966784  ;;  %p6279_p0 = pmov %p6272_p1 }
 0x202   : > { %4087 = dma.done.wait (%p6279_p0), [#allocation23], 512   ;;  %p6280_p2 = pmov %p6279_p0 }
 0x203   : > { %p6281_p5 = pmov %p6279_p0 }
 0x204   : > { %4089 = vsyncadd (%p6280_p2), [#allocation23], 4294966784 }
 0x205   : > { %4091 = dma.done.wait (%p6281_p5), [#allocation26], 512   ;;  %p6282_p8 = pmov %p6279_p0 }
 0x206   : > { %p6283_p4 = pmov %p6279_p0 }
 0x207   : > { %4093 = vsyncadd (%p6282_p8), [#allocation26], 4294966784 }
 0x208   : > { %4095 = dma.done.wait (%p6283_p4), [#allocation29], 128   ;;  %p6284_p3 = pmov %p6279_p0 }
 0x209   : > { %v6213_v0 = vmov 0   ;;  %v4770_v1 = vld [vmem:[%s4721_s21] sm:$0xff]  ;;  %v4773_v2 = vld [vmem:[%s4721_s21 + $0x8] sm:$0xff]  ;;  %v4776_v3 = vld [vmem:[%s4721_s21 + $0x10] sm:$0xff]  ;;  %v6217_v15 = vlaneseq  ;;  %v6215_v16 = vmov 1   ;;  %v6211_v24 = vmov 2  }
 0x20a   : > { %4097 = vsyncadd (%p6284_p3), [#allocation29], 4294967168  ;;  %3515 = vset.pattern.permute.xlu1 %v6213_v0  ;;  %3514 = vset.pattern.permute.xlu0 %v6213_v0  ;;  %v820_v4 = vadd.f32 %v4773_v2, %v4770_v1  ;;  %v829_v5 = vmul.f32 %v4770_v1, %v4770_v1  ;;  %v830_v6 = vmul.f32 %v4773_v2, %v4773_v2  ;;  %v4785_v7 = vld [vmem:[%s4721_s21 + $0x18] sm:$0xff]  ;;  %v791_v17 = vld [vmem:[#allocation12] sm:$0xff]  ;;  %s4145_s1 = smov 17   ;;  %s4146_s26 = smov 16  }
 0x20b   : > { %v831_v8 = vmul.f32 %v4776_v3, %v4776_v3  ;;  %v832_v9 = vmul.f32 %v4785_v7, %v4785_v7  ;;  %v823_v11 = vadd.f32 %v4785_v7, %v4776_v3  ;;  %v790_v13 = vld [vmem:[#allocation10 + $0x8] sm:$0xff]  ;;  %v789_v14 = vld [vmem:[#allocation10] sm:$0xff]  ;;  %v4795_v18 = vshrl.u32 %v6217_v15, 7  ;;  %v796_v19 = vld [vmem:[#allocation15 + $0x8] sm:$0xff]  ;;  %s4147_s5 = smov 15   ;;  %s4148_s7 = smov 1  }
 0x20c   : > { %821 = vadd.xlane.f32.xlu0 %v820_v4  ;;  %v833_v10 = vadd.f32 %v830_v6, %v829_v5  ;;  %v4799_v21 = vld [vmem:[%s4729_s30 + $0x8] sm:$0x77]  ;;  %v4816_v28 = vld [vmem:[%s4721_s21 + $0x30] sm:$0xff]  ;;  %v4822_v30 = vld [vmem:[%s4721_s21 + $0x20] sm:$0xff]  ;;  %s4149_s0 = smov 127   ;;  %s4150_s19 = smov 113  }
 0x20d   : > { %v836_v12 = vadd.f32 %v832_v9, %v831_v8  ;;  %v940_v20 = vsub.s32 6, %v4795_v18  ;;  %v4802_v22 = vsub.s32 2, %v4795_v18  ;;  %v794_v25 = vld [vmem:[#allocation13 + $0x8] sm:$0xff]  ;;  %v793_v27 = vld [vmem:[#allocation13] sm:$0xff]  ;;  %v4825_v31 = vld [vmem:[%s4721_s21 + $0x28] sm:$0xff]  ;;  %v2012_v34 = vmul.f32 %v4822_v30, %v4822_v30  ;;  %s4151_s9 = smov 112  }
 0x20e   : > { %834 = vadd.xlane.f32.xlu1 %v833_v10  ;;  %v4819_v29 = vld [vmem:[%s4721_s21 + $0x38] sm:$0xff]  ;;  %v792_v32 = vld [vmem:[#allocation12 + $0x8] sm:$0xff]  ;;  %v2013_v35 = vmul.f32 %v4825_v31, %v4825_v31  ;;  %v795_v36 = vld [vmem:[#allocation15] sm:$0xff]  ;;  %v2004_v38 = vadd.f32 %v4825_v31, %v4822_v30  ;;  %v2014_v39 = vmul.f32 %v4816_v28, %v4816_v28  ;;  %v4863_v60 = vsub.s32 1, %v4795_v18  ;;  %s4152_s27 = smov 111   ;;  %s784_s16 = scalar_lea.vmem [#allocation30], %s3237_s3 }
 0x20f   : > { %v2098_v23 = vrot.slane %v4799_v21, %v940_v20  ;;  %v2007_v33 = vadd.f32 %v4819_v29, %v4816_v28  ;;  %v2015_v40 = vmul.f32 %v4819_v29, %v4819_v29  ;;  %v6219_v61 = vsub.s32 5, %v4795_v18  ;;  %v819_v6 = vld [vmem:[%s4729_s30] sm:$0x77]  ;;  %s2982_s22 = sshll.u32 %s784_s16, 4  ;;  %s3285_s18 = sshll.u32 %s6268_s4, 10  ;;  %s6129_s22 = int_to_ptr.vmem [resolvable:$true] %s2982_s22 }
 0x210   : > { %824 = vadd.xlane.f32.xlu0 %v823_v11  ;;  %v2016_v37 = vadd.f32 %v2013_v35, %v2012_v34  ;;  %v4869_v4 = vsub.s32 0, %v4795_v18  ;;  %v6218_v8 = vsub.s32 4, %v4795_v18  ;;  %v903_v10 = vrot.slane %v819_v6, %v4863_v60  ;;  %s6301_s6 = sld [smem:[#allocation60_spill]]  ;;  %s2968_s29 = scalar_lea.sflag [#allocation6], %s4715_s23 }
 0x211   : > { %v4809_v26 = vrot.slane %v2098_v23, %v4802_v22  ;;  %v2019_v41 = vadd.f32 %v2015_v40, %v2014_v39  ;;  %v907_v11 = vrot.slane %v819_v6, %v6219_v61  ;;  %v941_v23 = vrot.slane %v819_v6, %v940_v20  ;;  %s4014_s4 = scalar_lea.vmem %s6129_s22, 1024  ;;  %p6302_p1 = scmp.ne.s32.totalorder %s6256_s25, 0 }
 0x212   : > { %837 = vadd.xlane.f32.xlu1 %v836_v12  ;;  %vm1368_vm4 = vcmask 130048   ;;  %p4015_p10 = scmp.ne.s32.totalorder %s6129_s22, %s4014_s4  ;;  %s4153_s30 = smov [#allocation30]  }
 0x214   : > { %p4016_p11 = pnand %p4015_p10, %p6302_p1 }
 0x216   : > { %s6134_s8 = scalar_lea.hbm %s6301_s6, %s3285_s18  ;;  %p4017_p12 = pneg %p4016_p11 }
 0x223   : > { %866 = vperm.xlu1 %3515, %v790_v13  }
 0x226   : > { %861 = vperm.xlu0 %3514, %v789_v14  }
 0x227   : > { %3516 = vset.pattern.permute.xlu1 %v6215_v16 }
 0x228   : > { %893 = vperm.xlu1 %3516, %v789_v14  }
 0x22a   : > { %962 = vperm.xlu0 %3514, %v791_v17   ;;  %v877_v17 = vrot.slane %v819_v6, %v6218_v8 }
 0x22c   : > { %897 = vperm.xlu1 %3516, %v790_v13  }
 0x22e   : > { %1027 = vperm.xlu0 %3514, %v796_v19   ;;  %v937_v19 = vrot.slane %v819_v6, %v4802_v22 }
 0x230   : > { %3517 = vset.pattern.permute.xlu1 %v6211_v24  ;;  %v4901_v20 = vrot.slane %v937_v19, %v4802_v22 }
 0x231   : > { %927 = vperm.xlu1 %3517, %v789_v14  }
 0x232   : > { %3522 = vset.pattern.permute.xlu0 %v6215_v16  ;;  %6285 = vst [vmem:[#allocation47_spill] sm:$0xff] %v4901_v20 }
 0x233   : > { %993 = vperm.xlu0 %3522, %v794_v25  }
 0x235   : > { %931 = vperm.xlu1 %3517, %v790_v13   ;;  %v873_v13 = vrot.slane %v819_v6, %v4869_v4 }
 0x237   : > { %v4895_v35 = vrot.slane %v873_v13, %v4869_v4 }
 0x239   : > { %3518 = vset.pattern.permute.xlu1 %v6213_v0 }
 0x23a   : > { %976 = vperm.xlu1 %3518, %v793_v27  }
 0x23e   : > { %981 = vperm.xlu1 %3518, %v794_v25  }
 0x242   : > { %3519 = vset.pattern.permute.xlu1 %v6215_v16 }
 0x243   : > { %989 = vperm.xlu1 %3519, %v793_v27  }
 0x247   : > { %3520 = vset.pattern.permute.xlu1 %v6211_v24 }
 0x248   : > { %1005 = vperm.xlu1 %3520, %v793_v27   ;;  %v4887_v27 = vrot.slane %v903_v10, %v4863_v60 }
 0x24c   : > { %1009 = vperm.xlu1 %3520, %v794_v25  }
 0x250   : > { %3521 = vset.pattern.permute.xlu1 %v6213_v0 }
 0x251   : > { %967 = vperm.xlu1 %3521, %v792_v32   ;;  %v4890_v32 = vrot.slane %v907_v11, %v4863_v60 }
 0x252   : > { %2008 = vadd.xlane.f32.xlu0 %v2007_v33 }
 0x255   : > { %1022 = vperm.xlu1 %3521, %v795_v36   ;;  %v4898_v36 = vrot.slane %v877_v17, %v4869_v4 }
 0x256   : > { %2017 = vadd.xlane.f32.xlu0 %v2016_v37  ;;  %v4904_v37 = vrot.slane %v941_v23, %v4802_v22 }
 0x279   : > { %2005 = vadd.xlane.f32.xlu1 %v2004_v38 }
 0x27d   : > { %2020 = vadd.xlane.f32.xlu1 %v2019_v41 }
 0x299   : > { %v822_v45 = vpop.xlane.xlu0 %821 }
 0x29a   : > { %v4850_v51 = vmul.f32 0.00390625, %v822_v45 }
 0x29b   : > { %v835_v42 = vpop.xlane.xlu1 %834 }
 0x29c   : > { %v839_v56 = vmul.f32 0.00390625, %v835_v42  ;;  %v841_v57 = vmul.f32 %v4850_v51, %v4850_v51 }
 0x29d   : > { %v825_v48 = vpop.xlane.xlu0 %824 }
 0x29e   : > { %v4846_v49 = vmul.f32 0.00390625, %v825_v48  ;;  %v843_v63 = vsub.f32 %v839_v56, %v841_v57 }
 0x29f   : > { %v838_v43 = vpop.xlane.xlu1 %837 }
 0x2a0   : > { %v840_v52 = vmul.f32 0.00390625, %v838_v43  ;;  %v842_v53 = vmul.f32 %v4846_v49, %v4846_v49  ;;  %v845_v12 = vmax.f32 %v843_v63, 0.0  ;;  %v849_v10 = vsub.f32 %v4776_v3, %v4846_v49 }
 0x2a1   : > { %v850_v11 = vsub.f32 %v4785_v7, %v4846_v49 }
 0x2a2   : > { %v844_v58 = vsub.f32 %v840_v52, %v842_v53  ;;  %v851_v34 = vadd.f32 1e-05, %v845_v12 }
 0x2a3   : > { %v4840_v44 = vpop.permute.xlu1 %866 }
 0x2a4   : > { %v846_v5 = vmax.f32 %v844_v58, 0.0  ;;  %v890_v52 = vmul.f32 %v4895_v35, %v4840_v44  ;;  %v891_v53 = vmul.f32 %v4898_v36, %v4840_v44 }
 0x2a5   : > { %v4856_v55 = vpop.permute.xlu0 %861 }
 0x2a6   : > { %v852_v14 = vadd.f32 1e-05, %v846_v5  ;;  %v888_v40 = vmul.f32 %v4895_v35, %v4856_v55  ;;  %v889_v41 = vmul.f32 %v4898_v36, %v4856_v55 }
 0x2a7   : > { %v4842_v46 = vpop.permute.xlu1 %893 }
 0x2a8   : > { %3537 = vrsqrt.f32 %v852_v14  ;;  %v918_v38 = vmul.f32 %v4887_v27, %v4842_v46  ;;  %v919_v39 = vmul.f32 %v4890_v32, %v4842_v46 }
 0x2a9   : > { %v4866_v62 = vpop.permute.xlu0 %962  ;;  %3539 = vrsqrt.f32 %v851_v34 }
 0x2aa   : > { %v922_v12 = vadd.f32 %v918_v38, %v888_v40  ;;  %v923_v13 = vadd.f32 %v919_v39, %v889_v41 }
 0x2ab   : > { %v4844_v47 = vpop.permute.xlu1 %897 }
 0x2ac   : > { %v920_v43 = vmul.f32 %v4887_v27, %v4844_v47  ;;  %v921_v45 = vmul.f32 %v4890_v32, %v4844_v47 }
 0x2ad   : > { %v4884_v25 = vpop.permute.xlu0 %1027 }
 0x2ae   : > { %v924_v14 = vadd.f32 %v920_v43, %v890_v52  ;;  %v925_v17 = vadd.f32 %v921_v45, %v891_v53 }
 0x2b0   : > { %v4848_v50 = vpop.permute.xlu1 %927 }
 0x2b1   : > { %v952_v56 = vmul.f32 %v4901_v20, %v4848_v50  ;;  %v953_v57 = vmul.f32 %v4904_v37, %v4848_v50 }
 0x2b2   : > { %v4914_v42 = vpop.permute.xlu0 %993  ;;  %v3538_v43 = vpop.eup %3537 }
 0x2b3   : > { %v998_v5 = vmul.f32 %v4914_v42, %v4887_v27  ;;  %v999_v6 = vmul.f32 %v4914_v42, %v4890_v32  ;;  %v956_v38 = vadd.f32 %v952_v56, %v922_v12  ;;  %v957_v39 = vadd.f32 %v953_v57, %v923_v13  ;;  %v3540_v12 = vpop.eup %3539 }
 0x2b4   : > { %v4854_v54 = vpop.permute.xlu1 %931  ;;  %v847_v57 = vsub.f32 %v4770_v1, %v4850_v51  ;;  %v857_v13 = vmul.f32 %v3538_v43, %v849_v10  ;;  %v858_v61 = vmul.f32 %v3538_v43, %v850_v11 }
 0x2b5   : > { %v954_v19 = vmul.f32 %v4901_v20, %v4854_v54  ;;  %v955_v23 = vmul.f32 %v4904_v37, %v4854_v54 }
 0x2b7   : > { %v958_v8 = vadd.f32 %v954_v19, %v924_v14  ;;  %v959_v56 = vadd.f32 %v955_v23, %v925_v17  ;;  %v970_v14 = vadd.f32 %v4866_v62, %v956_v38  ;;  %v971_v17 = vadd.f32 %v4866_v62, %v957_v39 }
 0x2b9   : > { %v4860_v59 = vpop.permute.xlu1 %976 }
 0x2ba   : > { %v984_v45 = vmul.f32 %v4860_v59, %v4895_v35  ;;  %v985_v52 = vmul.f32 %v4860_v59, %v4898_v36 }
 0x2bd   : > { %v4873_v9 = vpop.permute.xlu1 %981 }
 0x2be   : > { %v986_v58 = vmul.f32 %v4873_v9, %v4895_v35  ;;  %v987_v63 = vmul.f32 %v4873_v9, %v4898_v36 }
 0x2c0   : > { %v1002_v40 = vadd.f32 %v998_v5, %v986_v58  ;;  %v1003_v41 = vadd.f32 %v999_v6, %v987_v63  ;;  %v848_v58 = vsub.f32 %v4773_v2, %v4850_v51 }
 0x2c2   : > { %v4892_v33 = vpop.permute.xlu1 %989 }
 0x2c3   : > { %v996_v24 = vmul.f32 %v4892_v33, %v4887_v27  ;;  %v997_v3 = vmul.f32 %v4892_v33, %v4890_v32 }
 0x2c5   : > { %v1000_v63 = vadd.f32 %v996_v24, %v984_v45  ;;  %v1001_v5 = vadd.f32 %v997_v3, %v985_v52  ;;  %v855_v3 = vmul.f32 %v3540_v12, %v847_v57 }
 0x2c7   : > { %v4920_v48 = vpop.permute.xlu1 %1005 }
 0x2c8   : > { %v1012_v53 = vmul.f32 %v4920_v48, %v4901_v20  ;;  %v1013_v0 = vmul.f32 %v4920_v48, %v4904_v37 }
 0x2ca   : > { %v1016_v19 = vadd.f32 %v1012_v53, %v1000_v63  ;;  %v1017_v1 = vadd.f32 %v1013_v0, %v1001_v5 }
 0x2cb   : > { %v4946_v34 = vpop.permute.xlu1 %1009 }
 0x2cc   : > { %v1014_v7 = vmul.f32 %v4946_v34, %v4901_v20  ;;  %v1015_v49 = vmul.f32 %v4946_v34, %v4904_v37 }
 0x2ce   : > { %v1018_v16 = vadd.f32 %v1014_v7, %v1002_v40  ;;  %v1019_v15 = vadd.f32 %v1015_v49, %v1003_v41  ;;  %v856_v49 = vmul.f32 %v3540_v12, %v848_v58  ;;  %v1034_v41 = vmul.f32 %v970_v14, %v855_v3 }
 0x2cf   : > { %v2068_v12 = vrot.slane %v4799_v21, %v4863_v60 }
 0x2d0   : > { %v4968_v6 = vpop.permute.xlu1 %967  ;;  %v1032_v23 = vadd.f32 %v4884_v25, %v1018_v16  ;;  %v1033_v2 = vadd.f32 %v4884_v25, %v1019_v15  ;;  %v1035_v39 = vmul.f32 %v971_v17, %v856_v49 }
 0x2d1   : > { %v972_v20 = vadd.f32 %v4968_v6, %v958_v8  ;;  %v973_v7 = vadd.f32 %v4968_v6, %v959_v56  ;;  %v5059_v49 = vrot.slane %v2068_v12, %v4863_v60  ;;  %v2110_v12 = vmul.f32 %v4809_v26, %v4848_v50 }
 0x2d3   : > { %v1036_v24 = vmul.f32 %v972_v20, %v857_v13  ;;  %v1037_v51 = vmul.f32 %v973_v7, %v858_v61  ;;  %v6286_v13 = vsub.s32 5, %v4795_v18 }
 0x2d4   : > { %v4976_v10 = vpop.permute.xlu1 %1022 }
 0x2d5   : > { %v1040_v11 = vadd.f32 %v1036_v24, %v1032_v23  ;;  %v1041_v8 = vadd.f32 %v1037_v51, %v1033_v2  ;;  %v1030_v40 = vadd.f32 %v4976_v10, %v1016_v19  ;;  %v1031_v38 = vadd.f32 %v4976_v10, %v1017_v1 }
 0x2d6   : > { %v2072_v7 = vrot.slane %v4799_v21, %v6286_v13  ;;  %v2046_v23 = vrot.slane %v4799_v21, %v4869_v4  ;;  %v6287_v2 = vsub.s32 4, %v4795_v18  ;;  %v2094_v51 = vrot.slane %v4799_v21, %v4802_v22 }
 0x2d7   : > { %vm1044_vm0 = vcmp.ge.f32.partialorder %v1040_v11, 0.0  ;;  %v1048_v0 = vmul.f32 0.2, %v1040_v11  ;;  %v1049_v43 = vmul.f32 0.2, %v1041_v8  ;;  %v1038_v16 = vadd.f32 %v1034_v41, %v1030_v40 }
 0x2d8   : > { %v1039_v45 = vadd.f32 %v1035_v39, %v1031_v38  ;;  %vm1045_vm1 = vcmp.ge.f32.partialorder %v1041_v8, 0.0  ;;  %v2050_v24 = vrot.slane %v4799_v21, %v6287_v2  ;;  %v5069_v38 = vrot.slane %v2046_v23, %v4869_v4 }
 0x2d9   : > { %v4980_v15 = vsel %vm1044_vm0, %v1040_v11, %v1048_v0  ;;  %vm1042_vm2 = vcmp.ge.f32.partialorder %v1038_v16, 0.0  ;;  %v1046_v61 = vmul.f32 0.2, %v1038_v16  ;;  %v4984_v52 = vsel %vm1045_vm1, %v1041_v8, %v1049_v43 }
 0x2da   : > { %vm1043_vm3 = vcmp.ge.f32.partialorder %v1039_v45, 0.0  ;;  %v1047_v20 = vmul.f32 0.2, %v1039_v45  ;;  %1056 = vrot.lane.b32.xlu1 %v4980_v15, %s4145_s1  ;;  %v5062_v11 = vrot.slane %v2072_v7, %v4863_v60  ;;  %v5072_v41 = vrot.slane %v2050_v24, %v4869_v4 }
 0x2db   : > { %v4986_v53 = vsel %vm1042_vm2, %v1038_v16, %v1046_v61  ;;  %v5075_v39 = vrot.slane %v2094_v51, %v4802_v22  ;;  %v2083_v16 = vmul.f32 %v5059_v49, %v4842_v46  ;;  %v2061_v61 = vmul.f32 %v5069_v38, %v4856_v55 }
 0x2dc   : > { %v4988_v56 = vsel %vm1043_vm3, %v1039_v45, %v1047_v20  ;;  %1054 = vrot.lane.b32.xlu0 %v4986_v53, %s4145_s1  ;;  %v1191_v58 = vpack.c.bf16 %v4980_v15, %v4986_v53  ;;  %v2084_v45 = vmul.f32 %v5062_v11, %v4842_v46  ;;  %v2062_v20 = vmul.f32 %v5072_v41, %v4856_v55 }
 0x2dd   : > { %v1192_v57 = vpack.c.bf16 %v4984_v52, %v4988_v56  ;;  %v2063_v46 = vmul.f32 %v5069_v38, %v4840_v44  ;;  %v2087_v55 = vadd.f32 %v2083_v16, %v2061_v61  ;;  %v2086_v23 = vmul.f32 %v5062_v11, %v4844_v47 }
 0x2de   : > { %1058 = vrot.lane.b32.xlu1 %v4988_v56, %s4145_s1  ;;  %v2088_v7 = vadd.f32 %v2084_v45, %v2062_v20  ;;  %v2127_v51 = vmul.f32 %v5059_v49, %v4914_v42 }
 0x2df   : > { %v2009_v63 = vpop.xlane.xlu0 %2008 }
 0x2e0   : > { %1060 = vrot.lane.b32.xlu0 %v4984_v52, %s4145_s1  ;;  %v5043_v17 = vmul.f32 0.00390625, %v2009_v63  ;;  %v2114_v24 = vadd.f32 %v2110_v12, %v2088_v7 }
 0x2e2   : > { %1089 = vrot.lane.b32.xlu1 %v4986_v53, %s4146_s26  ;;  %v2025_v21 = vmul.f32 %v5043_v17, %v5043_v17 }
 0x2e3   : > { %v2018_v5 = vpop.xlane.xlu0 %2017 }
 0x2e4   : > { %1091 = vrot.lane.b32.xlu0 %v4980_v15, %s4146_s26  ;;  %v2022_v1 = vmul.f32 0.00390625, %v2018_v5  ;;  %v2109_v5 = vmul.f32 %v5075_v39, %v4848_v50  ;;  %v2064_v50 = vmul.f32 %v5072_v41, %v4840_v44  ;;  %v2123_v44 = vmul.f32 %v5069_v38, %v4873_v9 }
 0x2e6   : > { %1093 = vrot.lane.b32.xlu1 %v4988_v56, %s4146_s26  ;;  %v2113_v2 = vadd.f32 %v2109_v5, %v2087_v55  ;;  %v2090_v45 = vadd.f32 %v2086_v23, %v2064_v50  ;;  %v2131_v20 = vadd.f32 %v2127_v51, %v2123_v44  ;;  %v2033_v23 = vsub.f32 %v4819_v29, %v5043_v17 }
 0x2e8   : > { %1095 = vrot.lane.b32.xlu0 %v4984_v52, %s4146_s26  ;;  %v2117_v61 = vadd.f32 %v2113_v2, %v4866_v62 }
 0x2ea   : > { %1123 = vrot.lane.b32.xlu1 %v4986_v53, %s4147_s5 }
 0x2ec   : > { %1125 = vrot.lane.b32.xlu0 %v4980_v15, %s4147_s5 }
 0x2ee   : > { %1127 = vrot.lane.b32.xlu1 %v4988_v56, %s4147_s5 }
 0x2f0   : > { %1129 = vrot.lane.b32.xlu0 %v4984_v52, %s4147_s5 }
 0x2f2   : > { %1157 = vrot.lane.b32.xlu1 %v4986_v53, %s4148_s7 }
 0x2f4   : > { %1159 = vrot.lane.b32.xlu0 %v4980_v15, %s4148_s7 }
 0x2f6   : > { %1161 = vrot.lane.b32.xlu1 %v4988_v56, %s4148_s7 }
 0x2f8   : > { %1163 = vrot.lane.b32.xlu0 %v4984_v52, %s4148_s7 }
 0x2fa   : > { %1195 = vrot.lane.b32.xlu1 %v4986_v53, %s4149_s0 }
 0x2fc   : > { %1197 = vrot.lane.b32.xlu0 %v4980_v15, %s4149_s0 }
 0x2fe   : > { %1199 = vrot.lane.b32.xlu1 %v4988_v56, %s4149_s0 }
 0x300   : > { %1201 = vrot.lane.b32.xlu0 %v4984_v52, %s4149_s0 }
 0x302   : > { %1229 = vrot.lane.b32.xlu1 %v4986_v53, %s4150_s19 }
 0x304   : > { %1231 = vrot.lane.b32.xlu0 %v4980_v15, %s4150_s19 }
 0x306   : > { %v2006_v14 = vpop.xlane.xlu1 %2005  ;;  %1233 = vrot.lane.b32.xlu1 %v4988_v56, %s4150_s19 }
 0x307   : > { %v5045_v19 = vmul.f32 0.00390625, %v2006_v14  ;;  %v5099_v14 = vld [vmem:[#allocation16 + $0x4] ss:$8 sps:$4 sm:$0xff]  }
 0x308   : > { %1235 = vrot.lane.b32.xlu0 %v4984_v52, %s4150_s19  ;;  %3256 = vmatprep.mubr.msk.bf16.mxu0 %vm1368_vm4, %v5099_v14 }
 0x309   : > { %v2024_v3 = vmul.f32 %v5045_v19, %v5045_v19 }
 0x30a   : > { %v2021_v8 = vpop.xlane.xlu1 %2020  ;;  %1263 = vrot.lane.b32.xlu1 %v4986_v53, %s4151_s9 }
 0x30b   : > { %v2026_v18 = vsub.f32 %v2022_v1, %v2024_v3  ;;  %v2023_v40 = vmul.f32 0.00390625, %v2021_v8  ;;  %v2085_v1 = vmul.f32 %v5059_v49, %v4844_v47  ;;  %v2128_v3 = vmul.f32 %v5062_v11, %v4914_v42 }
 0x30c   : > { %1265 = vrot.lane.b32.xlu0 %v4980_v15, %s4151_s9  ;;  %v2124_v8 = vmul.f32 %v5072_v41, %v4873_v9  ;;  %v2125_v47 = vmul.f32 %v5059_v49, %v4892_v33  ;;  %v2111_v42 = vmul.f32 %v5075_v39, %v4854_v54  ;;  %v2122_v9 = vmul.f32 %v5072_v41, %v4860_v59 }
 0x30d   : > { %v2028_v0 = vmax.f32 %v2026_v18, 0.0  ;;  %v2027_v43 = vsub.f32 %v2023_v40, %v2025_v21  ;;  %v2126_v18 = vmul.f32 %v5062_v11, %v4892_v33  ;;  %v2112_v40 = vmul.f32 %v4809_v26, %v4854_v54 }
 0x30e   : > { %1267 = vrot.lane.b32.xlu1 %v4988_v56, %s4151_s9  ;;  %v2121_v21 = vmul.f32 %v5069_v38, %v4860_v59  ;;  %v2133_v33 = vmul.f32 %v5075_v39, %v4920_v48  ;;  %v2136_v54 = vmul.f32 %v4809_v26, %v4946_v34  ;;  %v2089_v16 = vadd.f32 %v2085_v1, %v2063_v46 }
 0x30f   : > { %v2034_v22 = vadd.f32 1e-05, %v2028_v0  ;;  %v2029_v63 = vmax.f32 %v2027_v43, 0.0  ;;  %v2134_v0 = vmul.f32 %v4809_v26, %v4920_v48  ;;  %v2135_v43 = vmul.f32 %v5075_v39, %v4946_v34 }
 0x310   : > { %1269 = vrot.lane.b32.xlu0 %v4984_v52, %s4151_s9  ;;  %v2118_v59 = vadd.f32 %v2114_v24, %v4866_v62  ;;  %v2130_v5 = vadd.f32 %v2126_v18, %v2122_v9  ;;  %v2115_v48 = vadd.f32 %v2111_v42, %v2089_v16  ;;  %v2116_v12 = vadd.f32 %v2112_v40, %v2090_v45 }
 0x311   : > { %3541 = vrsqrt.f32 %v2034_v22  ;;  %v2035_v13 = vadd.f32 1e-05, %v2029_v63  ;;  %v2132_v22 = vadd.f32 %v2128_v3, %v2124_v8  ;;  %v2129_v63 = vadd.f32 %v2125_v47, %v2121_v21 }
 0x312   : > { %1297 = vrot.lane.b32.xlu1 %v4986_v53, %s4152_s27  ;;  %v2031_v34 = vsub.f32 %v4825_v31, %v5045_v19  ;;  %v2139_v55 = vadd.f32 %v2135_v43, %v2131_v20  ;;  %v2138_v62 = vadd.f32 %v2134_v0, %v2130_v5  ;;  %v2032_v1 = vsub.f32 %v4816_v28, %v5043_v17  ;;  %v1069_v5 = vld [vmem:[#allocation9] sm:$0x3] }
 0x313   : > { %3543 = vrsqrt.f32 %v2035_v13  ;;  %v2030_v13 = vsub.f32 %v4822_v30, %v5045_v19  ;;  %v2140_v7 = vadd.f32 %v2136_v54, %v2132_v22  ;;  %v2137_v50 = vadd.f32 %v2133_v33, %v2129_v63 }
 0x314   : > { %1299 = vrot.lane.b32.xlu0 %v4980_v15, %s4152_s27  ;;  %v2119_v3 = vadd.f32 %v2115_v48, %v4968_v6  ;;  %v2120_v30 = vadd.f32 %v2116_v12, %v4968_v6  ;;  %v2142_v19 = vadd.f32 %v2138_v62, %v4976_v10  ;;  %v2143_v28 = vadd.f32 %v2139_v55, %v4884_v25 }
 0x315   : > { %v2141_v31 = vadd.f32 %v2137_v50, %v4976_v10  ;;  %v2144_v42 = vadd.f32 %v2140_v7, %v4884_v25  ;;  %v6288_v20 = vlaneseq }
 0x316   : > { %1301 = vrot.lane.b32.xlu1 %v4988_v56, %s4152_s27 }
 0x317   : > { %v5210_v22 = vand.u32 127, %v6288_v20 }
 0x318   : > { %1303 = vrot.lane.b32.xlu0 %v4984_v52, %s4152_s27  ;;  %v1243_v52 = vld [vmem:[#allocation9 + $0xc] sm:$0x3] }
 0x319   : > { %vm1064_vm9 = vcmp.lt.s32.totalorder %v5210_v22, 17  ;;  %vm1097_vm10 = vcmp.lt.s32.totalorder %v5210_v22, 16  ;;  %vm1131_vm11 = vcmp.lt.s32.totalorder %v5210_v22, 15  ;;  %vm1165_vm12 = vcmp.lt.s32.totalorder %v5210_v22, 1 }
 0x31a   : > { %vm1203_vm13 = vcmp.lt.s32.totalorder %v5210_v22, 127  ;;  %vm1237_vm14 = vcmp.lt.s32.totalorder %v5210_v22, 113  ;;  %vm1271_vm15 = vcmp.lt.s32.totalorder %v5210_v22, 112  ;;  %vm1305_vm0 = vcmp.lt.s32.totalorder %v5210_v22, 111  ;;  %v3561_v22 = vld [vmem:[#allocation28] sm:$0xff]  }
 0x31b   : > { %v3542_v46 = vpop.eup %3541 }
 0x31c   : > { %v2038_v2 = vmul.f32 %v3542_v46, %v2030_v13  ;;  %v2039_v24 = vmul.f32 %v3542_v46, %v2031_v34  ;;  %v1078_v13 = vrot.slane %v1069_v5, %v4863_v60  ;;  %v1074_v34 = vrot.slane %v1069_v5, %v4869_v4 }
 0x31d   : > { %v3544_v51 = vpop.eup %3543 }
 0x31e   : > { %v2145_v44 = vmul.f32 %v2117_v61, %v2038_v2  ;;  %v2146_v8 = vmul.f32 %v2118_v59, %v2039_v24  ;;  %v2040_v47 = vmul.f32 %v3544_v51, %v2032_v1  ;;  %v2041_v18 = vmul.f32 %v3544_v51, %v2033_v23 }
 0x320   : > { %v2149_v29 = vadd.f32 %v2145_v44, %v2141_v31  ;;  %v2150_v17 = vadd.f32 %v2146_v8, %v2142_v19  ;;  %v2147_v40 = vmul.f32 %v2119_v3, %v2040_v47  ;;  %v2148_v21 = vmul.f32 %v2120_v30, %v2041_v18  ;;  %v1103_v3 = vld [vmem:[#allocation9 + $0x2] sm:$0x3] }
 0x321   : > { %v1108_v8 = vrot.slane %v1103_v3, %v4869_v4  ;;  %v1112_v47 = vrot.slane %v1103_v3, %v4863_v60 }
 0x322   : > { %v2151_v9 = vadd.f32 %v2147_v40, %v2143_v28  ;;  %v2152_v33 = vadd.f32 %v2148_v21, %v2144_v42  ;;  %vm2153_vm5 = vcmp.ge.f32.partialorder %v2149_v29, 0.0  ;;  %v2157_v6 = vmul.f32 0.2, %v2149_v29 }
 0x323   : > { %vm2154_vm6 = vcmp.ge.f32.partialorder %v2150_v17, 0.0  ;;  %v2158_v0 = vmul.f32 0.2, %v2150_v17 }
 0x324   : > { %v5159_v43 = vsel %vm2153_vm5, %v2149_v29, %v2157_v6  ;;  %vm2155_vm7 = vcmp.ge.f32.partialorder %v2151_v9, 0.0  ;;  %v2159_v10 = vmul.f32 0.2, %v2151_v9  ;;  %vm2156_vm8 = vcmp.ge.f32.partialorder %v2152_v33, 0.0 }
 0x325   : > { %2165 = vrot.lane.b32.xlu1 %v5159_v43, %s4145_s1  ;;  %v2160_v54 = vmul.f32 0.2, %v2152_v33  ;;  %v5167_v16 = vsel %vm2154_vm6, %v2150_v17, %v2158_v0  ;;  %v1137_v0 = vld [vmem:[#allocation9 + $0x4] sm:$0x3] }
 0x326   : > { %v5163_v25 = vsel %vm2155_vm7, %v2151_v9, %v2159_v10  ;;  %v1142_v5 = vrot.slane %v1137_v0, %v4869_v4 }
 0x327   : > { %2167 = vrot.lane.b32.xlu0 %v5163_v25, %s4145_s1  ;;  %v5169_v45 = vsel %vm2156_vm8, %v2152_v33, %v2160_v54  ;;  %v2293_v61 = vpack.c.bf16 %v5163_v25, %v5159_v43 }
 0x328   : > { %v2294_v59 = vpack.c.bf16 %v5169_v45, %v5167_v16 }
 0x329   : > { %2169 = vrot.lane.b32.xlu1 %v5167_v16, %s4145_s1 }
 0x32b   : > { %2171 = vrot.lane.b32.xlu0 %v5169_v45, %s4145_s1 }
 0x32d   : > { %2197 = vrot.lane.b32.xlu1 %v5159_v43, %s4146_s26 }
 0x32f   : > { %2199 = vrot.lane.b32.xlu0 %v5163_v25, %s4146_s26 }
 0x331   : > { %2201 = vrot.lane.b32.xlu1 %v5167_v16, %s4146_s26 }
 0x333   : > { %2203 = vrot.lane.b32.xlu0 %v5169_v45, %s4146_s26 }
 0x335   : > { %2229 = vrot.lane.b32.xlu1 %v5159_v43, %s4147_s5 }
 0x337   : > { %2231 = vrot.lane.b32.xlu0 %v5163_v25, %s4147_s5 }
 0x339   : > { %2233 = vrot.lane.b32.xlu1 %v5167_v16, %s4147_s5 }
 0x33b   : > { %2235 = vrot.lane.b32.xlu0 %v5169_v45, %s4147_s5 }
 0x33d   : > { %2261 = vrot.lane.b32.xlu1 %v5159_v43, %s4148_s7 }
 0x33f   : > { %2263 = vrot.lane.b32.xlu0 %v5163_v25, %s4148_s7 }
 0x341   : > { %2265 = vrot.lane.b32.xlu1 %v5167_v16, %s4148_s7 }
 0x343   : > { %2267 = vrot.lane.b32.xlu0 %v5169_v45, %s4148_s7 }
 0x345   : > { %2297 = vrot.lane.b32.xlu1 %v5159_v43, %s4149_s0 }
 0x347   : > { %2299 = vrot.lane.b32.xlu0 %v5163_v25, %s4149_s0 }
 0x349   : > { %2301 = vrot.lane.b32.xlu1 %v5167_v16, %s4149_s0 }
 0x34b   : > { %2303 = vrot.lane.b32.xlu0 %v5169_v45, %s4149_s0 }
 0x34c   : > { %v1057_v63 = vpop.permute.xlu1 %1056 }
 0x34d   : > { %2329 = vrot.lane.b32.xlu1 %v5159_v43, %s4150_s19 }
 0x34e   : > { %v1055_v48 = vpop.permute.xlu0 %1054 }
 0x34f   : > { %2331 = vrot.lane.b32.xlu0 %v5163_v25, %s4150_s19 }
 0x350   : > { %v1059_v12 = vpop.permute.xlu1 %1058 }
 0x351   : > { %2333 = vrot.lane.b32.xlu1 %v5167_v16, %s4150_s19  ;;  %v1067_v46 = vsel %vm1064_vm9, %v1059_v12, %v1055_v48  ;;  %v1065_v55 = vsel %vm1064_vm9, %v1055_v48, %v1059_v12  ;;  %v1146_v48 = vrot.slane %v1137_v0, %v4863_v60 }
 0x352   : > { %v1061_v7 = vpop.permute.xlu0 %1060  ;;  %v1082_v23 = vmul.f32 %v1078_v13, %v1065_v55  ;;  %v1081_v24 = vmul.f32 %v1074_v34, %v1067_v46 }
 0x353   : > { %2335 = vrot.lane.b32.xlu0 %v5169_v45, %s4150_s19  ;;  %v1068_v50 = vsel %vm1064_vm9, %v1061_v7, %v1057_v63  ;;  %v1066_v1 = vsel %vm1064_vm9, %v1057_v63, %v1061_v7 }
 0x354   : > { %v1090_v62 = vpop.permute.xlu1 %1089  ;;  %v1084_v2 = vmul.f32 %v1078_v13, %v1066_v1  ;;  %v1083_v51 = vmul.f32 %v1074_v34, %v1068_v50  ;;  %v807_v34 = vld [vmem:[#allocation18] sm:$0xff] }
 0x355   : > { %2361 = vrot.lane.b32.xlu1 %v5159_v43, %s4151_s9 }
 0x356   : > { %v1092_v30 = vpop.permute.xlu0 %1091  ;;  %v1086_v31 = vpack.c.bf16 %v1084_v2, %v1082_v23  ;;  %v1085_v19 = vpack.c.bf16 %v1083_v51, %v1081_v24  ;;  %v1171_v51 = vld [vmem:[#allocation9 + $0x6] sm:$0x3] }
 0x357   : > { %2363 = vrot.lane.b32.xlu0 %v5163_v25, %s4151_s9 }
 0x358   : > { %v1094_v44 = vpop.permute.xlu1 %1093  ;;  %1372 = vmatprep.subr.bf16.mxu0 %v1086_v31 }
 0x359   : > { %2365 = vrot.lane.b32.xlu1 %v5167_v16, %s4151_s9  ;;  %v1098_v18 = vsel %vm1097_vm10, %v1090_v62, %v1094_v44  ;;  %v1100_v28 = vsel %vm1097_vm10, %v1094_v44, %v1090_v62  ;;  %1373 = vmatpush1.bf16.msra.mxu0 %v1085_v19  ;;  %v798_v62 = vld [vmem:[#allocation19 + $0x8] sm:$0xff] }
 0x35a   : > { %v1096_v42 = vpop.permute.xlu0 %1095  ;;  %v1115_v21 = vmul.f32 %v1108_v8, %v1100_v28  ;;  %v1116_v9 = vmul.f32 %v1112_v47, %v1098_v18  ;;  %v5272_v44 = vld [vmem:[#allocation22 + $0x8] sm:$0xff] }
 0x35b   : > { %2367 = vrot.lane.b32.xlu0 %v5169_v45, %s4151_s9  ;;  %v1099_v29 = vsel %vm1097_vm10, %v1092_v30, %v1096_v42  ;;  %v1101_v17 = vsel %vm1097_vm10, %v1096_v42, %v1092_v30 }
 0x35c   : > { %v1124_v40 = vpop.permute.xlu1 %1123  ;;  %v1117_v33 = vmul.f32 %v1108_v8, %v1101_v17  ;;  %v1118_v6 = vmul.f32 %v1112_v47, %v1099_v29  ;;  %v1176_v8 = vrot.slane %v1171_v51, %v4869_v4  ;;  %v1180_v47 = vrot.slane %v1171_v51, %v4863_v60  ;;  %v797_v29 = vld [vmem:[#allocation19] sm:$0xff] }
 0x35d   : > { %2393 = vrot.lane.b32.xlu1 %v5159_v43, %s4152_s27 }
 0x35e   : > { %v1126_v10 = vpop.permute.xlu0 %1125  ;;  %v1120_v54 = vpack.c.bf16 %v1118_v6, %v1116_v9  ;;  %v1119_v20 = vpack.c.bf16 %v1117_v33, %v1115_v21 }
 0x35f   : > { %2395 = vrot.lane.b32.xlu0 %v5163_v25, %s4152_s27 }
 0x360   : > { %v1128_v63 = vpop.permute.xlu1 %1127  ;;  %1374 = vmatprep.subr.bf16.mxu0 %v1120_v54  ;;  %v808_v54 = vld [vmem:[#allocation18 + $0x8] sm:$0xff] }
 0x361   : > { %2397 = vrot.lane.b32.xlu1 %v5167_v16, %s4152_s27  ;;  %v1132_v12 = vsel %vm1131_vm11, %v1124_v40, %v1128_v63  ;;  %v1134_v13 = vsel %vm1131_vm11, %v1128_v63, %v1124_v40  ;;  %1375 = vmatpush1.bf16.msra.mxu0 %v1119_v20  ;;  %v1209_v20 = vld [vmem:[#allocation9 + $0xa] sm:$0x3] }
 0x362   : > { %v1130_v46 = vpop.permute.xlu0 %1129  ;;  %v1149_v1 = vmul.f32 %v1142_v5, %v1134_v13  ;;  %v1150_v23 = vmul.f32 %v1146_v48, %v1132_v12  ;;  %v6290_v12 = vmov 0  }
 0x363   : > { %2399 = vrot.lane.b32.xlu0 %v5169_v45, %s4152_s27  ;;  %v1133_v55 = vsel %vm1131_vm11, %v1126_v10, %v1130_v46  ;;  %v1135_v7 = vsel %vm1131_vm11, %v1130_v46, %v1126_v10  ;;  %v6289_v10 = vmov 1   ;;  %v1218_v46 = vrot.slane %v1209_v20, %v4863_v60 }
 0x364   : > { %v1158_v50 = vpop.permute.xlu1 %1157  ;;  %v1151_v2 = vmul.f32 %v1142_v5, %v1135_v7  ;;  %v1152_v24 = vmul.f32 %v1146_v48, %v1133_v55 }
 0x365   : > { %1351 = vperm.xlu1 %3521, %v807_v34   ;;  %v1214_v34 = vrot.slane %v1209_v20, %v4869_v4 }
 0x366   : > { %v1160_v3 = vpop.permute.xlu0 %1159  ;;  %v1154_v30 = vpack.c.bf16 %v1152_v24, %v1150_v23  ;;  %v1153_v31 = vpack.c.bf16 %v1151_v2, %v1149_v1 }
 0x367   : > { %1472 = vperm.xlu0 %3522, %v798_v62  }
 0x368   : > { %v1162_v19 = vpop.permute.xlu1 %1161  ;;  %1376 = vmatprep.subr.bf16.mxu0 %v1154_v30 }
 0x369   : > { %1460 = vperm.xlu1 %3521, %v798_v62   ;;  %v1166_v18 = vsel %vm1165_vm12, %v1158_v50, %v1162_v19  ;;  %v1168_v28 = vsel %vm1165_vm12, %v1162_v19, %v1158_v50  ;;  %1377 = vmatpush1.bf16.msra.mxu0 %v1153_v31  ;;  %v6291_v50 = vmov 2  }
 0x36a   : > { %v1164_v42 = vpop.permute.xlu0 %1163  ;;  %v1183_v9 = vmul.f32 %v1176_v8, %v1168_v28  ;;  %v1184_v33 = vmul.f32 %v1180_v47, %v1166_v18  ;;  %v1248_v18 = vrot.slane %v1243_v52, %v4869_v4  ;;  %v1252_v28 = vrot.slane %v1243_v52, %v4863_v60 }
 0x36b   : > { %1532 = vperm.xlu0 %3522, %v5272_v44   ;;  %v1167_v17 = vsel %vm1165_vm12, %v1160_v3, %v1164_v42  ;;  %v1169_v40 = vsel %vm1165_vm12, %v1164_v42, %v1160_v3  ;;  %v799_v42 = vld [vmem:[#allocation21] sm:$0xff] }
 0x36c   : > { %v1196_v21 = vpop.permute.xlu1 %1195  ;;  %v1185_v6 = vmul.f32 %v1176_v8, %v1169_v40  ;;  %v1186_v0 = vmul.f32 %v1180_v47, %v1167_v17  ;;  %v801_v8 = vld [vmem:[#allocation22] sm:$0xff] }
 0x36d   : > { %3523 = vset.pattern.permute.xlu1 %v6289_v10 }
 0x36e   : > { %1468 = vperm.xlu1 %3523, %v797_v29   ;;  %v1198_v63 = vpop.permute.xlu0 %1197  ;;  %v1188_v5 = vpack.c.bf16 %v1186_v0, %v1184_v33  ;;  %v1187_v48 = vpack.c.bf16 %v1185_v6, %v1183_v9  ;;  %v1277_v6 = vld [vmem:[#allocation9 + $0xe] sm:$0x3] }
 0x36f   : > { %3527 = vset.pattern.permute.xlu0 %v6290_v12 }
 0x370   : > { %v1200_v13 = vpop.permute.xlu1 %1199  ;;  %1356 = vperm.xlu0 %3527, %v808_v54   ;;  %1378 = vmatprep.subr.bf16.mxu0 %v1188_v5  ;;  %v1282_v5 = vrot.slane %v1277_v6, %v4869_v4 }
 0x371   : > { %v1204_v55 = vsel %vm1203_vm13, %v1196_v21, %v1200_v13  ;;  %v1206_v7 = vsel %vm1203_vm13, %v1200_v13, %v1196_v21  ;;  %1379 = vmatpush1.bf16.msra.mxu0 %v1187_v48  ;;  %v1286_v48 = vrot.slane %v1277_v6, %v4863_v60  ;;  %v3556_v6 = vld [vmem:[%s4721_s21 + $0x10] sm:$0xff] }
 0x372   : > { %3524 = vset.pattern.permute.xlu1 %v6291_v50  ;;  %1380 = vmatprep.subr.bf16.mxu0 %v1192_v57  ;;  %v1202_v1 = vpop.permute.xlu0 %1201  ;;  %v1221_v51 = vmul.f32 %v1214_v34, %v1204_v55  ;;  %v1222_v3 = vmul.f32 %v1218_v46, %v1206_v7 }
 0x373   : > { %1484 = vperm.xlu1 %3524, %v797_v29   ;;  %v1205_v23 = vsel %vm1203_vm13, %v1198_v63, %v1202_v1  ;;  %v1207_v2 = vsel %vm1203_vm13, %v1202_v1, %v1198_v63 }
 0x374   : > { %v1230_v24 = vpop.permute.xlu1 %1229  ;;  %1455 = vperm.xlu0 %3527, %v797_v29   ;;  %v1223_v30 = vmul.f32 %v1214_v34, %v1205_v23  ;;  %v1224_v31 = vmul.f32 %v1218_v46, %v1207_v2 }
 0x375   : > { %1381 = vmatpush1.bf16.msra.mxu0 %v1191_v58 }
 0x376   : > { %v1232_v56 = vpop.permute.xlu0 %1231  ;;  %v1226_v57 = vpack.c.bf16 %v1224_v31, %v1222_v3  ;;  %v1225_v19 = vpack.c.bf16 %v1223_v30, %v1221_v51  ;;  %v1311_v51 = vld [vmem:[#allocation9 + $0x10] sm:$0x3] }
 0x377   : > { %1488 = vperm.xlu1 %3524, %v798_v62  }
 0x378   : > { %v1234_v47 = vpop.permute.xlu1 %1233  ;;  %1515 = vperm.xlu0 %3527, %v801_v8   ;;  %1382 = vmatprep.subr.bf16.mxu0 %v1226_v57  ;;  %v1320_v57 = vrot.slane %v1311_v51, %v4863_v60 }
 0x379   : > { %v1238_v15 = vsel %vm1237_vm14, %v1230_v24, %v1234_v47  ;;  %v1240_v53 = vsel %vm1237_vm14, %v1234_v47, %v1230_v24  ;;  %1383 = vmatpush1.bf16.msra.mxu0 %v1225_v19 }
 0x37a   : > { %v1236_v58 = vpop.permute.xlu0 %1235  ;;  %v1255_v40 = vmul.f32 %v1248_v18, %v1238_v15  ;;  %v1256_v21 = vmul.f32 %v1252_v28, %v1240_v53 }
 0x37b   : > { %3525 = vset.pattern.permute.xlu1 %v6290_v12  ;;  %v1239_v62 = vsel %vm1237_vm14, %v1232_v56, %v1236_v58  ;;  %v1241_v29 = vsel %vm1237_vm14, %v1236_v58, %v1232_v56  ;;  %v1316_v56 = vrot.slane %v1311_v51, %v4869_v4 }
 0x37c   : > { %v1264_v17 = vpop.permute.xlu1 %1263  ;;  %1520 = vperm.xlu1 %3525, %v5272_v44   ;;  %1501 = vperm.xlu0 %3527, %v799_v42   ;;  %v1257_v9 = vmul.f32 %v1248_v18, %v1239_v62  ;;  %v1258_v33 = vmul.f32 %v1252_v28, %v1241_v29  ;;  %v800_v28 = vld [vmem:[#allocation21 + $0x8] sm:$0xff] }
 0x37e   : > { %v1266_v0 = vpop.permute.xlu0 %1265  ;;  %v1260_v54 = vpack.c.bf16 %v1258_v33, %v1256_v21  ;;  %v1259_v20 = vpack.c.bf16 %v1257_v9, %v1255_v40  ;;  %v803_v21 = vld [vmem:[#allocation24] sm:$0xff]  ;;  %v5346_v9 = vld [vmem:[#allocation16] ss:$8 sps:$4 sm:$0xff]  }
 0x37f   : > { %v3555_v33 = vld [vmem:[%s4721_s21] sm:$0xff] }
 0x380   : > { %v1268_v63 = vpop.permute.xlu1 %1267  ;;  %3526 = vset.pattern.permute.xlu1 %v6289_v10  ;;  %1384 = vmatprep.subr.bf16.mxu0 %v1260_v54 }
 0x381   : > { %1528 = vperm.xlu1 %3526, %v801_v8   ;;  %v1272_v13 = vsel %vm1271_vm15, %v1264_v17, %v1268_v63  ;;  %v1274_v34 = vsel %vm1271_vm15, %v1268_v63, %v1264_v17  ;;  %1385 = vmatpush1.bf16.msra.mxu0 %v1259_v20  ;;  %v3554_v17 = vld [vmem:[%s4721_s21 + $0x18] sm:$0xff]  ;;  %v2177_v20 = vld [vmem:[#allocation9] sm:$0x3] }
 0x382   : > { %v1270_v46 = vpop.permute.xlu0 %1269  ;;  %v1289_v1 = vmul.f32 %v1282_v5, %v1272_v13  ;;  %v1290_v23 = vmul.f32 %v1286_v48, %v1274_v34  ;;  %v2186_v13 = vrot.slane %v2177_v20, %v4863_v60 }
 0x383   : > { %v1273_v55 = vsel %vm1271_vm15, %v1266_v0, %v1270_v46  ;;  %v1275_v10 = vsel %vm1271_vm15, %v1270_v46, %v1266_v0  ;;  %v1936_v0 = vpack.c.bf16 %v3556_v6, %v3555_v33 }
 0x384   : > { %v1298_v7 = vpop.permute.xlu1 %1297  ;;  %v1291_v2 = vmul.f32 %v1282_v5, %v1273_v55  ;;  %v1292_v24 = vmul.f32 %v1286_v48, %v1275_v10  ;;  %v3533_v5 = vld [vmem:[#allocation28] sm:$0xff]   ;;  %v2182_v48 = vrot.slane %v2177_v20, %v4869_v4 }
 0x385   : > { %3528 = vset.pattern.permute.xlu1 %v6291_v50 }
 0x386   : > { %1544 = vperm.xlu1 %3528, %v801_v8   ;;  %v1300_v3 = vpop.permute.xlu0 %1299  ;;  %v1294_v30 = vpack.c.bf16 %v1292_v24, %v1290_v23  ;;  %v1293_v31 = vpack.c.bf16 %v1291_v2, %v1289_v1 }
 0x388   : > { %v1302_v52 = vpop.permute.xlu1 %1301  ;;  %1386 = vmatprep.subr.bf16.mxu0 %v1294_v30  ;;  %v2209_v30 = vld [vmem:[#allocation9 + $0x2] sm:$0x3] }
 0x389   : > { %v1306_v19 = vsel %vm1305_vm0, %v1298_v7, %v1302_v52  ;;  %v1308_v50 = vsel %vm1305_vm0, %v1302_v52, %v1298_v7  ;;  %1387 = vmatpush1.bf16.msra.mxu0 %v1293_v31 }
 0x38a   : > { %1548 = vperm.xlu1 %3528, %v5272_v44   ;;  %v1304_v8 = vpop.permute.xlu0 %1303  ;;  %v1323_v42 = vmul.f32 %v1316_v56, %v1306_v19  ;;  %v1324_v15 = vmul.f32 %v1320_v57, %v1308_v50  ;;  %v3553_v44 = vld [vmem:[%s4721_s21 + $0x8] sm:$0xff]  ;;  %v2218_v19 = vrot.slane %v2209_v30, %v4863_v60 }
 0x38b   : > { %v1307_v47 = vsel %vm1305_vm0, %v1300_v3, %v1304_v8  ;;  %v1309_v18 = vsel %vm1305_vm0, %v1304_v8, %v1300_v3  ;;  %v1937_v40 = vpack.c.bf16 %v3554_v17, %v3553_v44 }
 0x38c   : > { %v1325_v53 = vmul.f32 %v1316_v56, %v1307_v47  ;;  %v1326_v58 = vmul.f32 %v1320_v57, %v1309_v18  ;;  %v2214_v57 = vrot.slane %v2209_v30, %v4869_v4 }
 0x38e   : > { %3529 = vset.pattern.permute.xlu1 %v6290_v12  ;;  %v1328_v62 = vpack.c.bf16 %v1326_v58, %v1324_v15  ;;  %v1327_v29 = vpack.c.bf16 %v1325_v53, %v1323_v42 }
 0x38f   : > { %1506 = vperm.xlu1 %3529, %v800_v28  }
 0x390   : > { %1388 = vmatprep.subr.bf16.mxu0 %v1328_v62 }
 0x391   : > { %1389 = vmatpush1.bf16.msra.mxu0 %v1327_v29  ;;  %v2241_v29 = vld [vmem:[#allocation9 + $0x4] sm:$0x3] }
 0x392   : > { %1946 = vmatprep.subr.bf16.mxu0 %v1937_v40  ;;  %v2250_v33 = vrot.slane %v2241_v29, %v4863_v60 }
 0x393   : > { %1561 = vperm.xlu1 %3529, %v803_v21   ;;  %v2246_v21 = vrot.slane %v2241_v29, %v4869_v4 }
 0x394   : > { %1405 = vmatmul.mubr.bf16.vlgmr.msra.gmra.mrb[0].mxu0 %v5346_v9 }
 0x395   : > { %1947 = vmatpush1.bf16.msra.mxu0 %v1936_v0  ;;  %1978 = vmatprep.mubr.bf16.mxu0 %v6290_v12 }
 0x397   : > { %v2166_v54 = vpop.permute.xlu1 %2165 }
 0x399   : > { %v2168_v63 = vpop.permute.xlu0 %2167 }
 0x39b   : > { %v2170_v34 = vpop.permute.xlu1 %2169 }
 0x39c   : > { %v2173_v46 = vsel %vm1064_vm9, %v2166_v54, %v2170_v34  ;;  %v2175_v55 = vsel %vm1064_vm9, %v2170_v34, %v2166_v54  ;;  %3261 = vmatmul.mubr.msk.bf16.vlgmr.msra.gmra.mrb[4].mxu0 %vm1368_vm4, %v3533_v5 }
 0x39d   : > { %v2172_v10 = vpop.permute.xlu0 %2171  ;;  %3267 = vmatprep.mubr.msk.bf16.mxu0 %vm1368_vm4, %v5099_v14  ;;  %v2189_v23 = vmul.f32 %v2182_v48, %v2175_v55  ;;  %v2190_v2 = vmul.f32 %v2186_v13, %v2173_v46 }
 0x39e   : > { %v2174_v7 = vsel %vm1064_vm9, %v2168_v63, %v2172_v10  ;;  %v2176_v1 = vsel %vm1064_vm9, %v2172_v10, %v2168_v63  ;;  %v2273_v10 = vld [vmem:[#allocation9 + $0x6] sm:$0x3] }
 0x39f   : > { %v2191_v24 = vmul.f32 %v2182_v48, %v2176_v1  ;;  %v2192_v51 = vmul.f32 %v2186_v13, %v2174_v7  ;;  %v2198_v3 = vpop.permute.xlu1 %2197 }
 0x3a1   : > { %v2193_v31 = vpack.c.bf16 %v2191_v24, %v2189_v23  ;;  %v2200_v52 = vpop.permute.xlu0 %2199  ;;  %v2194_v56 = vpack.c.bf16 %v2192_v51, %v2190_v2  ;;  %v2278_v2 = vrot.slane %v2273_v10, %v4869_v4  ;;  %v2282_v24 = vrot.slane %v2273_v10, %v4863_v60 }
 0x3a3   : > { %v2202_v50 = vpop.permute.xlu1 %2201  ;;  %2443 = vmatprep.subr.bf16.mxu0 %v2194_v56 }
 0x3a4   : > { %v2205_v8 = vsel %vm1097_vm10, %v2198_v3, %v2202_v50  ;;  %v2207_v14 = vsel %vm1097_vm10, %v2202_v50, %v2198_v3  ;;  %2444 = vmatpush1.bf16.msra.mxu0 %v2193_v31 }
 0x3a5   : > { %v2204_v47 = vpop.permute.xlu0 %2203  ;;  %v2221_v42 = vmul.f32 %v2214_v57, %v2207_v14  ;;  %v2222_v15 = vmul.f32 %v2218_v19, %v2205_v8 }
 0x3a6   : > { %v2206_v18 = vsel %vm1097_vm10, %v2200_v52, %v2204_v47  ;;  %v2208_v28 = vsel %vm1097_vm10, %v2204_v47, %v2200_v52  ;;  %v2309_v47 = vld [vmem:[#allocation9 + $0xa] sm:$0x3] }
 0x3a7   : > { %v2223_v53 = vmul.f32 %v2214_v57, %v2208_v28  ;;  %v2224_v58 = vmul.f32 %v2218_v19, %v2206_v18  ;;  %v2230_v62 = vpop.permute.xlu1 %2229 }
 0x3a9   : > { %v2225_v44 = vpack.c.bf16 %v2223_v53, %v2221_v42  ;;  %v2232_v17 = vpop.permute.xlu0 %2231  ;;  %v2226_v40 = vpack.c.bf16 %v2224_v58, %v2222_v15  ;;  %v2314_v15 = vrot.slane %v2309_v47, %v4869_v4  ;;  %v2318_v53 = vrot.slane %v2309_v47, %v4863_v60 }
 0x3ab   : > { %v2234_v6 = vpop.permute.xlu1 %2233  ;;  %2445 = vmatprep.subr.bf16.mxu0 %v2226_v40 }
 0x3ac   : > { %v2237_v0 = vsel %vm1131_vm11, %v2230_v62, %v2234_v6  ;;  %v2239_v54 = vsel %vm1131_vm11, %v2234_v6, %v2230_v62  ;;  %2446 = vmatpush1.bf16.msra.mxu0 %v2225_v44 }
 0x3ad   : > { %v2236_v20 = vpop.permute.xlu0 %2235  ;;  %v2253_v48 = vmul.f32 %v2246_v21, %v2239_v54  ;;  %v2254_v13 = vmul.f32 %v2250_v33, %v2237_v0 }
 0x3ae   : > { %v2238_v63 = vsel %vm1131_vm11, %v2232_v17, %v2236_v20  ;;  %v2240_v5 = vsel %vm1131_vm11, %v2236_v20, %v2232_v17  ;;  %v2341_v20 = vld [vmem:[#allocation9 + $0xc] sm:$0x3] }
 0x3af   : > { %v2255_v34 = vmul.f32 %v2246_v21, %v2240_v5  ;;  %v2256_v46 = vmul.f32 %v2250_v33, %v2238_v63  ;;  %v2262_v55 = vpop.permute.xlu1 %2261  ;;  %v2350_v5 = vrot.slane %v2341_v20, %v4863_v60 }
 0x3b1   : > { %v2257_v7 = vpack.c.bf16 %v2255_v34, %v2253_v48  ;;  %v2264_v1 = vpop.permute.xlu0 %2263  ;;  %v2258_v23 = vpack.c.bf16 %v2256_v46, %v2254_v13 }
 0x3b3   : > { %v2266_v51 = vpop.permute.xlu1 %2265  ;;  %2447 = vmatprep.subr.bf16.mxu0 %v2258_v23  ;;  %v2373_v23 = vld [vmem:[#allocation9 + $0xe] sm:$0x3] }
 0x3b4   : > { %v2269_v3 = vsel %vm1165_vm12, %v2262_v55, %v2266_v51  ;;  %v2271_v30 = vsel %vm1165_vm12, %v2266_v51, %v2262_v55  ;;  %2448 = vmatpush1.bf16.msra.mxu0 %v2257_v7 }
 0x3b5   : > { %v2268_v31 = vpop.permute.xlu0 %2267  ;;  %v2285_v57 = vmul.f32 %v2278_v2, %v2271_v30  ;;  %v2286_v19 = vmul.f32 %v2282_v24, %v2269_v3  ;;  %v2378_v3 = vrot.slane %v2373_v23, %v4869_v4  ;;  %v2382_v30 = vrot.slane %v2373_v23, %v4863_v60 }
 0x3b6   : > { %v2270_v52 = vsel %vm1165_vm12, %v2264_v1, %v2268_v31  ;;  %v2272_v56 = vsel %vm1165_vm12, %v2268_v31, %v2264_v1 }
 0x3b7   : > { %v2287_v50 = vmul.f32 %v2278_v2, %v2272_v56  ;;  %v2288_v8 = vmul.f32 %v2282_v24, %v2270_v52  ;;  %v2298_v14 = vpop.permute.xlu1 %2297 }
 0x3b9   : > { %v2289_v18 = vpack.c.bf16 %v2287_v50, %v2285_v57  ;;  %v2300_v28 = vpop.permute.xlu0 %2299  ;;  %v2290_v42 = vpack.c.bf16 %v2288_v8, %v2286_v19 }
 0x3bb   : > { %v2302_v58 = vpop.permute.xlu1 %2301  ;;  %2449 = vmatprep.subr.bf16.mxu0 %v2290_v42  ;;  %v2405_v42 = vld [vmem:[#allocation9 + $0x10] sm:$0x3] }
 0x3bc   : > { %v2305_v62 = vsel %vm1203_vm13, %v2298_v14, %v2302_v58  ;;  %v2307_v29 = vsel %vm1203_vm13, %v2302_v58, %v2298_v14  ;;  %2450 = vmatpush1.bf16.msra.mxu0 %v2289_v18 }
 0x3bd   : > { %2451 = vmatprep.subr.bf16.mxu0 %v2294_v59  ;;  %v2304_v44 = vpop.permute.xlu0 %2303  ;;  %v2321_v21 = vmul.f32 %v2314_v15, %v2305_v62  ;;  %v2322_v33 = vmul.f32 %v2318_v53, %v2307_v29  ;;  %v2346_v59 = vrot.slane %v2341_v20, %v4869_v4  ;;  %v2410_v62 = vrot.slane %v2405_v42, %v4869_v4 }
 0x3be   : > { %v2306_v17 = vsel %vm1203_vm13, %v2300_v28, %v2304_v44  ;;  %v2308_v40 = vsel %vm1203_vm13, %v2304_v44, %v2300_v28  ;;  %v2414_v29 = vrot.slane %v2405_v42, %v4863_v60 }
 0x3bf   : > { %v2323_v6 = vmul.f32 %v2314_v15, %v2306_v17  ;;  %v2324_v0 = vmul.f32 %v2318_v53, %v2308_v40  ;;  %v2330_v54 = vpop.permute.xlu1 %2329 }
 0x3c0   : > { %2452 = vmatpush1.bf16.msra.mxu0 %v2293_v61 }
 0x3c1   : > { %v2325_v63 = vpack.c.bf16 %v2323_v6, %v2321_v21  ;;  %v2332_v16 = vpop.permute.xlu0 %2331  ;;  %v2326_v45 = vpack.c.bf16 %v2324_v0, %v2322_v33 }
 0x3c3   : > { %v2334_v48 = vpop.permute.xlu1 %2333  ;;  %2453 = vmatprep.subr.bf16.mxu0 %v2326_v45 }
 0x3c4   : > { %v2337_v13 = vsel %vm1237_vm14, %v2330_v54, %v2334_v48  ;;  %v2339_v34 = vsel %vm1237_vm14, %v2334_v48, %v2330_v54  ;;  %2454 = vmatpush1.bf16.msra.mxu0 %v2325_v63 }
 0x3c5   : > { %v2336_v46 = vpop.permute.xlu0 %2335  ;;  %v2353_v61 = vmul.f32 %v2346_v59, %v2337_v13  ;;  %v2354_v55 = vmul.f32 %v2350_v5, %v2339_v34 }
 0x3c6   : > { %v2338_v43 = vsel %vm1237_vm14, %v2332_v16, %v2336_v46  ;;  %v2340_v25 = vsel %vm1237_vm14, %v2336_v46, %v2332_v16 }
 0x3c7   : > { %v2355_v10 = vmul.f32 %v2346_v59, %v2338_v43  ;;  %v2356_v7 = vmul.f32 %v2350_v5, %v2340_v25  ;;  %v2362_v1 = vpop.permute.xlu1 %2361 }
 0x3c9   : > { %v2357_v2 = vpack.c.bf16 %v2355_v10, %v2353_v61  ;;  %v2364_v24 = vpop.permute.xlu0 %2363  ;;  %v2358_v51 = vpack.c.bf16 %v2356_v7, %v2354_v55 }
 0x3cb   : > { %v2366_v31 = vpop.permute.xlu1 %2365  ;;  %2455 = vmatprep.subr.bf16.mxu0 %v2358_v51 }
 0x3cc   : > { %v2369_v52 = vsel %vm1271_vm15, %v2362_v1, %v2366_v31  ;;  %v2371_v56 = vsel %vm1271_vm15, %v2366_v31, %v2362_v1  ;;  %2456 = vmatpush1.bf16.msra.mxu0 %v2357_v2 }
 0x3cd   : > { %v2368_v57 = vpop.permute.xlu0 %2367  ;;  %v2385_v8 = vmul.f32 %v2378_v3, %v2369_v52  ;;  %v2386_v14 = vmul.f32 %v2382_v30, %v2371_v56 }
 0x3ce   : > { %v2370_v19 = vsel %vm1271_vm15, %v2364_v24, %v2368_v57  ;;  %v2372_v50 = vsel %vm1271_vm15, %v2368_v57, %v2364_v24 }
 0x3cf   : > { %v2387_v47 = vmul.f32 %v2378_v3, %v2370_v19  ;;  %v2388_v18 = vmul.f32 %v2382_v30, %v2372_v50  ;;  %v2394_v28 = vpop.permute.xlu1 %2393 }
 0x3d1   : > { %v2389_v15 = vpack.c.bf16 %v2387_v47, %v2385_v8  ;;  %v2396_v53 = vpop.permute.xlu0 %2395  ;;  %v2390_v58 = vpack.c.bf16 %v2388_v18, %v2386_v14 }
 0x3d3   : > { %v2398_v44 = vpop.permute.xlu1 %2397  ;;  %2457 = vmatprep.subr.bf16.mxu0 %v2390_v58 }
 0x3d4   : > { %v2401_v17 = vsel %vm1305_vm0, %v2394_v28, %v2398_v44  ;;  %v2403_v40 = vsel %vm1305_vm0, %v2398_v44, %v2394_v28  ;;  %2458 = vmatpush1.bf16.msra.mxu0 %v2389_v15 }
 0x3d5   : > { %v2400_v21 = vpop.permute.xlu0 %2399  ;;  %v2417_v0 = vmul.f32 %v2410_v62, %v2401_v17  ;;  %v2418_v54 = vmul.f32 %v2414_v29, %v2403_v40 }
 0x3d6   : > { %v2402_v33 = vsel %vm1305_vm0, %v2396_v53, %v2400_v21  ;;  %v2404_v6 = vsel %vm1305_vm0, %v2400_v21, %v2396_v53 }
 0x3d7   : > { %v2419_v20 = vmul.f32 %v2410_v62, %v2402_v33  ;;  %v2420_v63 = vmul.f32 %v2414_v29, %v2404_v6 }
 0x3d9   : > { %v2421_v16 = vpack.c.bf16 %v2419_v20, %v2417_v0  ;;  %v2422_v45 = vpack.c.bf16 %v2420_v63, %v2418_v54 }
 0x3db   : > { %2459 = vmatprep.subr.bf16.mxu0 %v2422_v45 }
 0x3dc   : > { %2460 = vmatpush1.bf16.msra.mxu0 %v2421_v16 }
 0x3df   : > { %2476 = vmatmul.mubr.bf16.vlgmr.msra.gmra.mrb[8].mxu0 %v5346_v9 }
 0x3e4   : > { %v5442_v59 = vpop.permute.xlu1 %1351 }
 0x3e6   : > { %v5444_v5 = vpop.permute.xlu0 %1472 }
 0x3e7   : > { %v2530_v13 = vmul.f32 %v5059_v49, %v5444_v5  ;;  %v2531_v34 = vmul.f32 %v5062_v11, %v5444_v5 }
 0x3e8   : > { %v5446_v48 = vpop.permute.xlu1 %1460 }
 0x3e9   : > { %v2526_v46 = vmul.f32 %v5069_v38, %v5446_v48  ;;  %v2527_v43 = vmul.f32 %v5072_v41, %v5446_v48 }
 0x3ea   : > { %v5456_v61 = vpop.permute.xlu0 %1532 }
 0x3eb   : > { %v2534_v25 = vadd.f32 %v2530_v13, %v2526_v46  ;;  %v2535_v9 = vadd.f32 %v2531_v34, %v2527_v43  ;;  %v2554_v28 = vmul.f32 %v5059_v49, %v5456_v61  ;;  %v2555_v42 = vmul.f32 %v5062_v11, %v5456_v61 }
 0x3ed   : > { %v5458_v55 = vpop.permute.xlu1 %1468 }
 0x3ee   : > { %v2528_v7 = vmul.f32 %v5059_v49, %v5458_v55  ;;  %v2529_v1 = vmul.f32 %v5062_v11, %v5458_v55 }
 0x3ef   : > { %v5460_v10 = vpop.permute.xlu0 %1356 }
 0x3f2   : > { %v5466_v23 = vpop.permute.xlu1 %1484 }
 0x3f3   : > { %v5468_v2 = vpop.permute.xlu0 %1455  ;;  %v2536_v3 = vmul.f32 %v5075_v39, %v5466_v23  ;;  %v2537_v30 = vmul.f32 %v4809_v26, %v5466_v23 }
 0x3f4   : > { %v2524_v24 = vmul.f32 %v5069_v38, %v5468_v2  ;;  %v2525_v51 = vmul.f32 %v5072_v41, %v5468_v2 }
 0x3f6   : > { %v5478_v31 = vpop.permute.xlu1 %1488  ;;  %v2532_v52 = vadd.f32 %v2528_v7, %v2524_v24  ;;  %v2533_v56 = vadd.f32 %v2529_v1, %v2525_v51 }
 0x3f7   : > { %v2538_v57 = vmul.f32 %v5075_v39, %v5478_v31  ;;  %v2539_v19 = vmul.f32 %v4809_v26, %v5478_v31  ;;  %v5498_v29 = vpop.permute.xlu0 %1515 }
 0x3f8   : > { %v5484_v14 = vadd.f32 %v2536_v3, %v2532_v52  ;;  %v5486_v47 = vadd.f32 %v2537_v30, %v2533_v56  ;;  %v2548_v44 = vmul.f32 %v5069_v38, %v5498_v29  ;;  %v2549_v17 = vmul.f32 %v5072_v41, %v5498_v29 }
 0x3f9   : > { %v2542_v50 = vadd.f32 %v2538_v57, %v2534_v25  ;;  %v2543_v8 = vadd.f32 %v2539_v19, %v2535_v9 }
 0x3fb   : > { %v5488_v18 = vpop.permute.xlu1 %1520 }
 0x3fc   : > { %v2550_v15 = vmul.f32 %v5069_v38, %v5488_v18  ;;  %v2551_v53 = vmul.f32 %v5072_v41, %v5488_v18 }
 0x3fe   : > { %v2558_v58 = vadd.f32 %v2554_v28, %v2550_v15  ;;  %v2559_v62 = vadd.f32 %v2555_v42, %v2551_v53 }
 0x400   : > { %v5504_v40 = vpop.permute.xlu1 %1528 }
 0x401   : > { %v2552_v21 = vmul.f32 %v5059_v49, %v5504_v40  ;;  %v2553_v33 = vmul.f32 %v5062_v11, %v5504_v40 }
 0x403   : > { %v2556_v6 = vadd.f32 %v2552_v21, %v2548_v44  ;;  %v2557_v0 = vadd.f32 %v2553_v33, %v2549_v17 }
 0x405   : > { %v5510_v54 = vpop.permute.xlu1 %1544 }
 0x406   : > { %v2560_v20 = vmul.f32 %v5075_v39, %v5510_v54  ;;  %v2561_v38 = vmul.f32 %v4809_v26, %v5510_v54 }
 0x408   : > { %v5516_v63 = vadd.f32 %v2560_v20, %v2556_v6  ;;  %v5518_v41 = vadd.f32 %v2561_v38, %v2557_v0 }
 0x409   : > { %v5520_v16 = vpop.permute.xlu1 %1548 }
 0x40a   : > { %v2562_v49 = vmul.f32 %v5075_v39, %v5520_v16  ;;  %v2563_v11 = vmul.f32 %v4809_v26, %v5520_v16 }
 0x40c   : > { %v5526_v45 = vadd.f32 %v2562_v49, %v2558_v58  ;;  %v5528_v13 = vadd.f32 %v2563_v11, %v2559_v62  ;;  %v804_v58 = vld [vmem:[#allocation24 + $0x8] sm:$0xff] }
 0x40e   : > { %v5530_v34 = vpop.permute.xlu1 %1506 }
 0x40f   : > { %v5533_v46 = vadd.f32 %v2542_v50, %v5530_v34  ;;  %v5536_v43 = vadd.f32 %v2543_v8, %v5530_v34 }
 0x467   : > { %v1406_v25 = vpop.f32.mrb[0].mxu0 }
 0x468   : > { %v5539_v9 = vadd.f32 %v1406_v25, %v5442_v59  ;;  %v1408_v39 = vpop.f32.mrb[1].mxu0 }
 0x469   : > { %v5542_v7 = vadd.f32 %v1408_v39, %v5442_v59  ;;  %v1410_v26 = vpop.f32.mrb[2].mxu0 }
 0x46a   : > { %v5545_v1 = vadd.f32 %v1410_v26, %v5460_v10  ;;  %v1412_v24 = vpop.f32.mrb[3].mxu0  ;;  %v1423_v57 = vmul.f32 %v5539_v9, %v5539_v9 }
 0x46b   : > { %v5548_v51 = vadd.f32 %v1412_v24, %v5460_v10  ;;  %v1415_v3 = vadd.f32 %v5542_v7, %v5539_v9  ;;  %v1424_v19 = vmul.f32 %v5542_v7, %v5542_v7  ;;  %v5594_v24 = vpop.permute.xlu1 %1561 }
 0x46c   : > { %v1425_v30 = vmul.f32 %v5545_v1, %v5545_v1 }
 0x46d   : > { %v1426_v52 = vmul.f32 %v5548_v51, %v5548_v51  ;;  %1416 = vadd.xlane.f32.xlu1 %v1415_v3  ;;  %v1418_v56 = vadd.f32 %v5548_v51, %v5545_v1  ;;  %v1427_v42 = vadd.f32 %v1424_v19, %v1423_v57  ;;  %v5596_v3 = vpop.permute.xlu0 %1501 }
 0x46f   : > { %1419 = vadd.xlane.f32.xlu0 %v1418_v56  ;;  %v1430_v50 = vadd.f32 %v1426_v52, %v1425_v30  ;;  %v5562_v8 = vpop.f32.mrb[4].mxu0 }
 0x470   : > { %v5564_v28 = vpop.f32.mrb[5].mxu0 }
 0x471   : > { %1431 = vadd.xlane.f32.xlu1 %v1430_v50  ;;  %v5566_v15 = vpop.f32.mrb[6].mxu0 }
 0x472   : > { %6292 = vst [vmem:[#allocation48_spill] sm:$0xff] %v5566_v15  ;;  %v5568_v53 = vpop.f32.mrb[7].mxu0 }
 0x473   : > { %6293 = vst [vmem:[#allocation49_spill] sm:$0xff] %v5568_v53  ;;  %1428 = vadd.xlane.f32.xlu0 %v1427_v42 }
 0x489   : > { %1566 = vperm.xlu0 %3527, %v804_v58  }
 0x4b2   : > { %v2477_v62 = vpop.f32.mrb[8].mxu0 }
 0x4b3   : > { %v5571_v44 = vadd.f32 %v2477_v62, %v5442_v59  ;;  %v2479_v17 = vpop.f32.mrb[9].mxu0 }
 0x4b4   : > { %v5574_v21 = vadd.f32 %v2479_v17, %v5442_v59  ;;  %v2481_v33 = vpop.f32.mrb[10].mxu0 }
 0x4b5   : > { %v5577_v6 = vadd.f32 %v2481_v33, %v5460_v10  ;;  %v2483_v0 = vpop.f32.mrb[11].mxu0  ;;  %v2494_v11 = vmul.f32 %v5571_v44, %v5571_v44 }
 0x4b6   : > { %v5580_v20 = vadd.f32 %v2483_v0, %v5460_v10  ;;  %v2486_v38 = vadd.f32 %v5574_v21, %v5571_v44  ;;  %v2495_v59 = vmul.f32 %v5574_v21, %v5574_v21  ;;  %v1465_v0 = vmul.f32 %v5446_v48, %v4895_v35 }
 0x4b7   : > { %v2496_v49 = vmul.f32 %v5577_v6, %v5577_v6 }
 0x4b8   : > { %v2497_v25 = vmul.f32 %v5580_v20, %v5580_v20  ;;  %2487 = vadd.xlane.f32.xlu1 %v2486_v38  ;;  %v2489_v10 = vadd.f32 %v5580_v20, %v5577_v6  ;;  %v2498_v26 = vadd.f32 %v2495_v59, %v2494_v11  ;;  %v1477_v11 = vmul.f32 %v5444_v5, %v4887_v27 }
 0x4b9   : > { %v1466_v59 = vmul.f32 %v5446_v48, %v4898_v36 }
 0x4ba   : > { %2490 = vadd.xlane.f32.xlu0 %v2489_v10  ;;  %v2501_v39 = vadd.f32 %v2497_v25, %v2496_v49 }
 0x4bc   : > { %2502 = vadd.xlane.f32.xlu1 %v2501_v39  ;;  %v1478_v39 = vmul.f32 %v5444_v5, %v4890_v32  ;;  %v1536_v5 = vmul.f32 %v5504_v40, %v4890_v32 }
 0x4be   : > { %2499 = vadd.xlane.f32.xlu0 %v2498_v26  ;;  %v1481_v26 = vadd.f32 %v1477_v11, %v1465_v0  ;;  %v1525_v11 = vmul.f32 %v5488_v18, %v4895_v35 }
 0x4fa   : > { %v1417_v30 = vpop.xlane.xlu1 %1416 }
 0x4fb   : > { %v5598_v56 = vmul.f32 0.00390625, %v1417_v30  ;;  %v1475_v30 = vmul.f32 %v5458_v55, %v4887_v27 }
 0x4fc   : > { %v1420_v52 = vpop.xlane.xlu0 %1419 }
 0x4fd   : > { %v5600_v57 = vmul.f32 0.00390625, %v1420_v52  ;;  %v1435_v17 = vmul.f32 %v5598_v56, %v5598_v56  ;;  %v1476_v52 = vmul.f32 %v5458_v55, %v4890_v32  ;;  %v1524_v55 = vmul.f32 %v5498_v29, %v4898_v36 }
 0x4fe   : > { %v1432_v19 = vpop.xlane.xlu1 %1431 }
 0x4ff   : > { %v1434_v50 = vmul.f32 0.00390625, %v1432_v19  ;;  %v1436_v42 = vmul.f32 %v5600_v57, %v5600_v57  ;;  %v1463_v19 = vmul.f32 %v5468_v2, %v4895_v35 }
 0x500   : > { %v1429_v58 = vpop.xlane.xlu0 %1428 }
 0x501   : > { %v1438_v62 = vsub.f32 %v1434_v50, %v1436_v42  ;;  %v1433_v33 = vmul.f32 0.00390625, %v1429_v58  ;;  %v1464_v50 = vmul.f32 %v5468_v2, %v4898_v36  ;;  %v1535_v42 = vmul.f32 %v5504_v40, %v4887_v27 }
 0x502   : > { %v1523_v58 = vmul.f32 %v5498_v29, %v4895_v35 }
 0x503   : > { %v1440_v38 = vmax.f32 %v1438_v62, 0.0  ;;  %v1437_v49 = vsub.f32 %v1433_v33, %v1435_v17  ;;  %v1482_v17 = vadd.f32 %v1478_v39, %v1466_v59  ;;  %v6294_v33 = vld [vmem:[#allocation47_spill] sm:$0xff]  ;;  %v1526_v59 = vmul.f32 %v5488_v18, %v4898_v36 }
 0x504   : > { %v1491_v0 = vmul.f32 %v5466_v23, %v6294_v33  ;;  %v1493_v40 = vmul.f32 %v5478_v31, %v6294_v33  ;;  %v1539_v39 = vadd.f32 %v1535_v42, %v1523_v58  ;;  %v1553_v35 = vmul.f32 %v5520_v16, %v6294_v33 }
 0x505   : > { %v1446_v25 = vadd.f32 1e-05, %v1440_v38  ;;  %v1439_v10 = vmax.f32 %v1437_v49, 0.0  ;;  %v1492_v38 = vmul.f32 %v5466_v23, %v4904_v37  ;;  %v1494_v49 = vmul.f32 %v5478_v31, %v4904_v37 }
 0x506   : > { %v1551_v23 = vmul.f32 %v5510_v54, %v6294_v33  ;;  %v1537_v31 = vmul.f32 %v5456_v61, %v4887_v27  ;;  %v1554_v36 = vmul.f32 %v5520_v16, %v4904_v37  ;;  %v1497_v18 = vadd.f32 %v1493_v40, %v1481_v26 }
 0x507   : > { %3545 = vrsqrt.f32 %v1446_v25  ;;  %v1445_v48 = vadd.f32 1e-05, %v1439_v10  ;;  %v1480_v25 = vadd.f32 %v1476_v52, %v1464_v50  ;;  %v1552_v10 = vmul.f32 %v5510_v54, %v4904_v37 }
 0x508   : > { %v1567_v62 = vpop.permute.xlu0 %1566  ;;  %v1541_v52 = vadd.f32 %v1537_v31, %v1525_v11  ;;  %v1555_v42 = vadd.f32 %v1551_v23, %v1539_v39  ;;  %v1443_v27 = vsub.f32 %v5545_v1, %v5600_v57  ;;  %v1511_v58 = vadd.f32 %v5530_v34, %v1497_v18 }
 0x509   : > { %3547 = vrsqrt.f32 %v1445_v48  ;;  %v5633_v2 = vadd.f32 %v5526_v45, %v1567_v62  ;;  %v5642_v29 = vadd.f32 %v5528_v13, %v1567_v62  ;;  %v1479_v45 = vadd.f32 %v1475_v30, %v1463_v19 }
 0x50a   : > { %v1540_v48 = vadd.f32 %v1536_v5, %v1524_v55  ;;  %v1538_v13 = vmul.f32 %v5456_v61, %v4890_v32  ;;  %v1498_v30 = vadd.f32 %v1494_v49, %v1482_v17  ;;  %v1496_v54 = vadd.f32 %v1492_v38, %v1480_v25 }
 0x50b   : > { %v1495_v50 = vadd.f32 %v1491_v0, %v1479_v45  ;;  %v1444_v32 = vsub.f32 %v5548_v51, %v5600_v57  ;;  %v1557_v37 = vadd.f32 %v1553_v35, %v1541_v52  ;;  %v1441_v26 = vsub.f32 %v5539_v9, %v5598_v56 }
 0x50c   : > { %v1542_v19 = vadd.f32 %v1538_v13, %v1526_v59  ;;  %v1556_v5 = vadd.f32 %v1552_v10, %v1540_v48  ;;  %v1512_v55 = vadd.f32 %v5530_v34, %v1498_v30  ;;  %v1442_v17 = vsub.f32 %v5542_v7, %v5598_v56 }
 0x50d   : > { %v1509_v1 = vadd.f32 %v5596_v3, %v1495_v50  ;;  %v1510_v51 = vadd.f32 %v5596_v3, %v1496_v54  ;;  %v1571_v57 = vadd.f32 %v1567_v62, %v1557_v37  ;;  %v1569_v45 = vadd.f32 %v5594_v24, %v1555_v42 }
 0x50e   : > { %v1558_v16 = vadd.f32 %v1554_v36, %v1542_v19  ;;  %v1570_v9 = vadd.f32 %v5594_v24, %v1556_v5 }
 0x510   : > { %v1572_v40 = vadd.f32 %v1567_v62, %v1558_v16 }
 0x511   : > { %v3546_v61 = vpop.eup %3545 }
 0x512   : > { %v1451_v33 = vmul.f32 %v3546_v61, %v1443_v27  ;;  %v1452_v0 = vmul.f32 %v3546_v61, %v1444_v32 }
 0x513   : > { %v3548_v38 = vpop.eup %3547 }
 0x514   : > { %v1449_v49 = vmul.f32 %v3548_v38, %v1441_v26  ;;  %v1450_v11 = vmul.f32 %v3548_v38, %v1442_v17  ;;  %v1575_v34 = vmul.f32 %v1511_v58, %v1451_v33  ;;  %v1576_v59 = vmul.f32 %v1512_v55, %v1452_v0 }
 0x516   : > { %v1573_v25 = vmul.f32 %v1509_v1, %v1449_v49  ;;  %v1574_v23 = vmul.f32 %v1510_v51, %v1450_v11  ;;  %v1579_v7 = vadd.f32 %v1575_v34, %v1571_v57  ;;  %v1580_v56 = vadd.f32 %v1576_v59, %v1572_v40 }
 0x518   : > { %v1577_v10 = vadd.f32 %v1573_v25, %v1569_v45  ;;  %v1578_v39 = vadd.f32 %v1574_v23, %v1570_v9  ;;  %vm1583_vm1 = vcmp.ge.f32.partialorder %v1579_v7, 0.0  ;;  %vm1584_vm2 = vcmp.ge.f32.partialorder %v1580_v56, 0.0 }
 0x519   : > { %v1587_v48 = vmul.f32 0.2, %v1579_v7  ;;  %v1588_v31 = vmul.f32 0.2, %v1580_v56  ;;  %v2544_v45 = vadd.f32 %v5484_v14, %v5596_v3  ;;  %v2545_v9 = vadd.f32 %v5486_v47, %v5596_v3 }
 0x51a   : > { %v1585_v13 = vmul.f32 0.2, %v1577_v10  ;;  %v1586_v62 = vmul.f32 0.2, %v1578_v39  ;;  %vm1582_vm3 = vcmp.ge.f32.partialorder %v1578_v39, 0.0  ;;  %vm1581_vm5 = vcmp.ge.f32.partialorder %v1577_v10, 0.0 }
 0x51b   : > { %v5674_v35 = vsel %vm1583_vm1, %v1579_v7, %v1587_v48  ;;  %v5676_v36 = vsel %vm1584_vm2, %v1580_v56, %v1588_v31 }
 0x51c   : > { %v5678_v18 = vsel %vm1582_vm3, %v1578_v39, %v1586_v62  ;;  %v5680_v30 = vsel %vm1581_vm5, %v1577_v10, %v1585_v13  ;;  %v5792_v13 = vld [vmem:[#allocation25 + $0x4] ss:$8 sps:$4 sm:$0xff]  }
 0x51d   : > { %1597 = vrot.lane.b32.xlu1 %v5678_v18, %s4145_s1  ;;  %1593 = vrot.lane.b32.xlu0 %v5680_v30, %s4145_s1 }
 0x51e   : > { %3259 = vmatprep.mubr.msk.bf16.mxu1 %vm1368_vm4, %v5792_v13 }
 0x521   : > { %1625 = vrot.lane.b32.xlu1 %v5680_v30, %s4146_s26  ;;  %1599 = vrot.lane.b32.xlu0 %v5676_v36, %s4145_s1 }
 0x525   : > { %1629 = vrot.lane.b32.xlu1 %v5678_v18, %s4146_s26  ;;  %1627 = vrot.lane.b32.xlu0 %v5674_v35, %s4146_s26 }
 0x529   : > { %1657 = vrot.lane.b32.xlu1 %v5680_v30, %s4147_s5  ;;  %1631 = vrot.lane.b32.xlu0 %v5676_v36, %s4146_s26 }
 0x52d   : > { %1661 = vrot.lane.b32.xlu1 %v5678_v18, %s4147_s5  ;;  %1659 = vrot.lane.b32.xlu0 %v5674_v35, %s4147_s5 }
 0x531   : > { %1689 = vrot.lane.b32.xlu1 %v5680_v30, %s4148_s7  ;;  %1663 = vrot.lane.b32.xlu0 %v5676_v36, %s4147_s5 }
 0x535   : > { %1693 = vrot.lane.b32.xlu1 %v5678_v18, %s4148_s7  ;;  %1691 = vrot.lane.b32.xlu0 %v5674_v35, %s4148_s7 }
 0x539   : > { %1725 = vrot.lane.b32.xlu1 %v5680_v30, %s4149_s0  ;;  %1695 = vrot.lane.b32.xlu0 %v5676_v36, %s4148_s7 }
 0x53d   : > { %1729 = vrot.lane.b32.xlu1 %v5678_v18, %s4149_s0  ;;  %1727 = vrot.lane.b32.xlu0 %v5674_v35, %s4149_s0 }
 0x541   : > { %1757 = vrot.lane.b32.xlu1 %v5680_v30, %s4150_s19  ;;  %1731 = vrot.lane.b32.xlu0 %v5676_v36, %s4149_s0 }
 0x545   : > { %v2488_v50 = vpop.xlane.xlu1 %2487  ;;  %1761 = vrot.lane.b32.xlu1 %v5678_v18, %s4150_s19  ;;  %1759 = vrot.lane.b32.xlu0 %v5674_v35, %s4150_s19 }
 0x546   : > { %v2492_v42 = vmul.f32 0.00390625, %v2488_v50 }
 0x547   : > { %v2491_v54 = vpop.xlane.xlu0 %2490 }
 0x548   : > { %v2493_v5 = vmul.f32 0.00390625, %v2491_v54  ;;  %v2506_v37 = vmul.f32 %v2492_v42, %v2492_v42  ;;  %v2512_v40 = vsub.f32 %v5571_v44, %v2492_v42  ;;  %v2513_v49 = vsub.f32 %v5574_v21, %v2492_v42 }
 0x549   : > { %v2503_v27 = vpop.xlane.xlu1 %2502  ;;  %1789 = vrot.lane.b32.xlu1 %v5680_v30, %s4151_s9  ;;  %1763 = vrot.lane.b32.xlu0 %v5676_v36, %s4150_s19  ;;  %v2568_v44 = vadd.f32 %v5516_v63, %v5594_v24  ;;  %v2569_v21 = vadd.f32 %v5518_v41, %v5594_v24 }
 0x54a   : > { %v2505_v32 = vmul.f32 0.00390625, %v2503_v27  ;;  %v2507_v61 = vmul.f32 %v2493_v5, %v2493_v5  ;;  %v2514_v1 = vsub.f32 %v5577_v6, %v2493_v5  ;;  %v2515_v51 = vsub.f32 %v5580_v20, %v2493_v5 }
 0x54b   : > { %v2500_v58 = vpop.xlane.xlu0 %2499 }
 0x54c   : > { %v2509_v55 = vsub.f32 %v2505_v32, %v2507_v61  ;;  %v2504_v16 = vmul.f32 0.00390625, %v2500_v58 }
 0x54d   : > { %1793 = vrot.lane.b32.xlu1 %v5678_v18, %s4151_s9  ;;  %1791 = vrot.lane.b32.xlu0 %v5674_v35, %s4151_s9 }
 0x54e   : > { %v2511_v26 = vmax.f32 %v2509_v55, 0.0  ;;  %v2508_v17 = vsub.f32 %v2504_v16, %v2506_v37  ;;  %v812_v37 = vld [vmem:[#allocation27 + $0x8] sm:$0xff] }
 0x550   : > { %v2517_v33 = vadd.f32 1e-05, %v2511_v26  ;;  %v2510_v0 = vmax.f32 %v2508_v17, 0.0  ;;  %v811_v17 = vld [vmem:[#allocation27] sm:$0xff] }
 0x551   : > { %1821 = vrot.lane.b32.xlu1 %v5680_v30, %s4152_s27  ;;  %1795 = vrot.lane.b32.xlu0 %v5676_v36, %s4151_s9 }
 0x552   : > { %3549 = vrsqrt.f32 %v2517_v33  ;;  %v2516_v38 = vadd.f32 1e-05, %v2510_v0 }
 0x554   : > { %3551 = vrsqrt.f32 %v2516_v38 }
 0x555   : > { %1823 = vrot.lane.b32.xlu0 %v5674_v35, %s4152_s27  ;;  %1595 = vrot.lane.b32.xlu1 %v5674_v35, %s4145_s1 }
 0x559   : > { %1827 = vrot.lane.b32.xlu0 %v5676_v36, %s4152_s27  ;;  %1825 = vrot.lane.b32.xlu1 %v5678_v18, %s4152_s27 }
 0x55c   : > { %v3550_v57 = vpop.eup %3549 }
 0x55d   : > { %v2522_v11 = vmul.f32 %v3550_v57, %v2514_v1  ;;  %v2523_v34 = vmul.f32 %v3550_v57, %v2515_v51 }
 0x55e   : > { %v3552_v59 = vpop.eup %3551 }
 0x55f   : > { %v2574_v25 = vmul.f32 %v5533_v46, %v2522_v11  ;;  %v2575_v6 = vmul.f32 %v5536_v43, %v2523_v34  ;;  %v2520_v23 = vmul.f32 %v3552_v59, %v2512_v40  ;;  %v2521_v20 = vmul.f32 %v3552_v59, %v2513_v49 }
 0x561   : > { %v2578_v7 = vadd.f32 %v2574_v25, %v5633_v2  ;;  %v2579_v56 = vadd.f32 %v2575_v6, %v5642_v29  ;;  %v2572_v14 = vmul.f32 %v2544_v45, %v2520_v23  ;;  %v2573_v10 = vmul.f32 %v2545_v9, %v2521_v20  ;;  %v1605_v25 = vld [vmem:[#allocation9] sm:$0x3] }
 0x562   : > { %v1610_v23 = vrot.slane %v1605_v25, %v4869_v4 }
 0x563   : > { %v2586_v39 = vmul.f32 0.2, %v2578_v7  ;;  %v2587_v47 = vmul.f32 0.2, %v2579_v56  ;;  %v2576_v3 = vadd.f32 %v2572_v14, %v2568_v44  ;;  %v2577_v46 = vadd.f32 %v2573_v10, %v2569_v21  ;;  %v1637_v21 = vld [vmem:[#allocation9 + $0x2] sm:$0x3] }
 0x564   : > { %vm2582_vm6 = vcmp.ge.f32.partialorder %v2578_v7, 0.0  ;;  %vm2583_vm7 = vcmp.ge.f32.partialorder %v2579_v56, 0.0  ;;  %v1642_v29 = vrot.slane %v1637_v21, %v4869_v4 }
 0x565   : > { %v2584_v43 = vmul.f32 0.2, %v2576_v3  ;;  %v2585_v48 = vmul.f32 0.2, %v2577_v46  ;;  %v5766_v31 = vsel %vm2582_vm6, %v2578_v7, %v2586_v39  ;;  %vm2580_vm8 = vcmp.ge.f32.partialorder %v2576_v3, 0.0 }
 0x566   : > { %2594 = vrot.lane.b32.xlu0 %v5766_v31, %s4145_s1  ;;  %vm2581_vm1 = vcmp.ge.f32.partialorder %v2577_v46, 0.0  ;;  %v5772_v41 = vsel %vm2583_vm7, %v2579_v56, %v2587_v47  ;;  %v1614_v7 = vrot.slane %v1605_v25, %v4863_v60  ;;  %v1646_v39 = vrot.slane %v1637_v21, %v4863_v60  ;;  %v1669_v47 = vld [vmem:[#allocation9 + $0x4] sm:$0x3] }
 0x567   : > { %v5770_v63 = vsel %vm2580_vm8, %v2576_v3, %v2584_v43  ;;  %v5774_v24 = vsel %vm2581_vm1, %v2577_v46, %v2585_v48  ;;  %v1678_v2 = vrot.slane %v1669_v47, %v4863_v60 }
 0x568   : > { %2592 = vrot.lane.b32.xlu1 %v5770_v63, %s4145_s1 }
 0x56a   : > { %2598 = vrot.lane.b32.xlu0 %v5772_v41, %s4145_s1 }
 0x56c   : > { %2596 = vrot.lane.b32.xlu1 %v5774_v24, %s4145_s1  ;;  %s4018_s1 = sshll.u32 %s4153_s30, 4  ;;  %s4019_s1 = int_to_ptr.vmem [resolvable:$false] %s4018_s1 }
 0x56d   : > { %p4021_p6 = scmp.lt.s32.totalorder %s6129_s22, %s4019_s1 }
 0x56e   : > { %2626 = vrot.lane.b32.xlu0 %v5766_v31, %s4146_s26 }
 0x570   : > { %2624 = vrot.lane.b32.xlu1 %v5770_v63, %s4146_s26 }
 0x572   : > { %2630 = vrot.lane.b32.xlu0 %v5772_v41, %s4146_s26 }
 0x574   : > { %2628 = vrot.lane.b32.xlu1 %v5774_v24, %s4146_s26 }
 0x576   : > { %2658 = vrot.lane.b32.xlu0 %v5766_v31, %s4147_s5 }
 0x578   : > { %2656 = vrot.lane.b32.xlu1 %v5770_v63, %s4147_s5 }
 0x57a   : > { %2662 = vrot.lane.b32.xlu0 %v5772_v41, %s4147_s5 }
 0x57c   : > { %2660 = vrot.lane.b32.xlu1 %v5774_v24, %s4147_s5  ;;  %s4020_s5 = scalar_lea.vmem %s4019_s1, 2048 }
 0x57d   : > { %p4022_p13 = scmp.lt.s32.totalorder %s4020_s5, %s4014_s4 }
 0x57e   : > { %2690 = vrot.lane.b32.xlu0 %v5766_v31, %s4148_s7 }
 0x57f   : > { %p4023_p7 = por %p4022_p13, %p4021_p6 }
 0x580   : > { %2688 = vrot.lane.b32.xlu1 %v5770_v63, %s4148_s7 }
 0x581   : > { %p4024_p9 = pnand %p4023_p7, %p4017_p12 }
 0x582   : > { %2694 = vrot.lane.b32.xlu0 %v5772_v41, %s4148_s7 }
 0x584   : > { %2692 = vrot.lane.b32.xlu1 %v5774_v24, %s4148_s7 }
 0x586   : > { %2726 = vrot.lane.b32.xlu0 %v5766_v31, %s4149_s0 }
 0x588   : > { %2724 = vrot.lane.b32.xlu1 %v5770_v63, %s4149_s0 }
 0x58a   : > { %2730 = vrot.lane.b32.xlu0 %v5772_v41, %s4149_s0 }
 0x58c   : > { %2728 = vrot.lane.b32.xlu1 %v5774_v24, %s4149_s0 }
 0x58e   : > { %2758 = vrot.lane.b32.xlu0 %v5766_v31, %s4150_s19 }
 0x58f   : > { %v1598_v62 = vpop.permute.xlu1 %1597  ;;  %v1594_v50 = vpop.permute.xlu0 %1593 }
 0x590   : > { %2756 = vrot.lane.b32.xlu1 %v5770_v63, %s4150_s19  ;;  %v1603_v44 = vsel %vm1064_vm9, %v1598_v62, %v1594_v50  ;;  %v1601_v56 = vsel %vm1064_vm9, %v1594_v50, %v1598_v62 }
 0x591   : > { %v1617_v10 = vmul.f32 %v1610_v23, %v1603_v44  ;;  %v1618_v62 = vmul.f32 %v1614_v7, %v1601_v56 }
 0x592   : > { %2762 = vrot.lane.b32.xlu0 %v5772_v41, %s4150_s19 }
 0x593   : > { %v1626_v54 = vpop.permute.xlu1 %1625  ;;  %v1600_v42 = vpop.permute.xlu0 %1599 }
 0x594   : > { %2760 = vrot.lane.b32.xlu1 %v5774_v24, %s4150_s19 }
 0x596   : > { %2790 = vrot.lane.b32.xlu0 %v5766_v31, %s4151_s9 }
 0x597   : > { %v1630_v5 = vpop.permute.xlu1 %1629  ;;  %v1628_v27 = vpop.permute.xlu0 %1627 }
 0x598   : > { %2788 = vrot.lane.b32.xlu1 %v5770_v63, %s4151_s9  ;;  %v1633_v43 = vsel %vm1097_vm10, %v1626_v54, %v1630_v5  ;;  %v1635_v52 = vsel %vm1097_vm10, %v1630_v5, %v1626_v54  ;;  %v1674_v54 = vrot.slane %v1669_v47, %v4869_v4 }
 0x599   : > { %v1650_v53 = vmul.f32 %v1646_v39, %v1633_v43 }
 0x59a   : > { %2794 = vrot.lane.b32.xlu0 %v5772_v41, %s4151_s9 }
 0x59b   : > { %v5836_v32 = vpop.permute.xlu1 %1657  ;;  %v1632_v61 = vpop.permute.xlu0 %1631 }
 0x59c   : > { %2792 = vrot.lane.b32.xlu1 %v5774_v24, %s4151_s9  ;;  %v1634_v14 = vsel %vm1097_vm10, %v1628_v27, %v1632_v61  ;;  %v1636_v50 = vsel %vm1097_vm10, %v1632_v61, %v1628_v27  ;;  %v1701_v61 = vld [vmem:[#allocation9 + $0x6] sm:$0x3] }
 0x59d   : > { %v1651_v56 = vmul.f32 %v1642_v29, %v1636_v50  ;;  %v1706_v43 = vrot.slane %v1701_v61, %v4869_v4 }
 0x59e   : > { %2822 = vrot.lane.b32.xlu0 %v5766_v31, %s4152_s27 }
 0x59f   : > { %v5842_v58 = vpop.permute.xlu1 %1661  ;;  %v1660_v55 = vpop.permute.xlu0 %1659 }
 0x5a0   : > { %2820 = vrot.lane.b32.xlu1 %v5770_v63, %s4152_s27  ;;  %v1665_v27 = vsel %vm1131_vm11, %v5836_v32, %v5842_v58 }
 0x5a2   : > { %2826 = vrot.lane.b32.xlu0 %v5772_v41, %s4152_s27 }
 0x5a3   : > { %v5848_v16 = vpop.permute.xlu1 %1689  ;;  %v1664_v26 = vpop.permute.xlu0 %1663 }
 0x5a4   : > { %2824 = vrot.lane.b32.xlu1 %v5774_v24, %s4152_s27  ;;  %v1666_v19 = vsel %vm1131_vm11, %v1660_v55, %v1664_v26 }
 0x5a5   : > { %v1684_v21 = vmul.f32 %v1678_v2, %v1666_v19 }
 0x5a6   : > { %1878 = vperm.xlu0 %3527, %v812_v37  }
 0x5a7   : > { %v5852_v33 = vpop.permute.xlu1 %1693  ;;  %v1692_v0 = vpop.permute.xlu0 %1691 }
 0x5a8   : > { %1873 = vperm.xlu1 %3529, %v811_v17   ;;  %v1652_v17 = vmul.f32 %v1646_v39, %v1634_v14  ;;  %v1682_v39 = vmul.f32 %v1678_v2, %v1665_v27  ;;  %v1699_v2 = vsel %vm1165_vm12, %v5852_v33, %v5848_v16 }
 0x5aa   : > { %v1654_v14 = vpack.c.bf16 %v1652_v17, %v1650_v53 }
 0x5ab   : > { %v5854_v38 = vpop.permute.xlu1 %1725  ;;  %v1696_v1 = vpop.permute.xlu0 %1695 }
 0x5ac   : > { %v1698_v5 = vsel %vm1165_vm12, %v1692_v0, %v1696_v1 }
 0x5af   : > { %v5856_v51 = vpop.permute.xlu1 %1729  ;;  %v5858_v57 = vpop.permute.xlu0 %1727 }
 0x5b3   : > { %v5860_v40 = vpop.permute.xlu1 %1757  ;;  %v5862_v49 = vpop.permute.xlu0 %1731 }
 0x5b4   : > { %v1736_v17 = vsel %vm1203_vm13, %v5862_v49, %v5858_v57 }
 0x5b7   : > { %v5864_v11 = vpop.permute.xlu1 %1761  ;;  %v5866_v34 = vpop.permute.xlu0 %1759 }
 0x5bb   : > { %v5868_v59 = vpop.permute.xlu1 %1789  ;;  %v5870_v45 = vpop.permute.xlu0 %1763 }
 0x5bf   : > { %v5872_v9 = vpop.permute.xlu1 %1793  ;;  %v5874_v6 = vpop.permute.xlu0 %1791 }
 0x5c3   : > { %v5877_v20 = vpop.permute.xlu1 %1821  ;;  %v5887_v3 = vpop.permute.xlu0 %1795 }
 0x5c7   : > { %v1596_v46 = vpop.permute.xlu1 %1595 }
 0x5c8   : > { %v1602_v48 = vsel %vm1064_vm9, %v1596_v46, %v1600_v42  ;;  %v1604_v37 = vsel %vm1064_vm9, %v1600_v42, %v1596_v46  ;;  %v1649_v46 = vmul.f32 %v1642_v29, %v1635_v52  ;;  %v1700_v52 = vsel %vm1165_vm12, %v1696_v1, %v1692_v0 }
 0x5c9   : > { %v1619_v25 = vmul.f32 %v1610_v23, %v1604_v37  ;;  %v1620_v44 = vmul.f32 %v1614_v7, %v1602_v48  ;;  %v1668_v23 = vsel %vm1131_vm11, %v1664_v26, %v1660_v55  ;;  %v5909_v7 = vpop.permute.xlu0 %1823  ;;  %v1710_v55 = vrot.slane %v1701_v61, %v4863_v60  ;;  %v1737_v37 = vld [vmem:[#allocation9 + $0xa] sm:$0x3] }
 0x5ca   : > { %v1683_v19 = vmul.f32 %v1674_v54, %v1668_v23  ;;  %v1653_v53 = vpack.c.bf16 %v1651_v56, %v1649_v46  ;;  %v1686_v26 = vpack.c.bf16 %v1684_v21, %v1682_v39  ;;  %v1715_v48 = vmul.f32 %v1706_v43, %v1700_v52  ;;  %v1833_v52 = vld [vmem:[#allocation9 + $0x10] sm:$0x3] }
 0x5cb   : > { %v1622_v15 = vpack.c.bf16 %v1620_v44, %v1618_v62  ;;  %v1621_v42 = vpack.c.bf16 %v1619_v25, %v1617_v10  ;;  %v1667_v10 = vsel %vm1131_vm11, %v5842_v58, %v5836_v32  ;;  %v1716_v29 = vmul.f32 %v1710_v55, %v1698_v5  ;;  %v1826_v50 = vpop.permute.xlu1 %1825  ;;  %v1769_v44 = vld [vmem:[#allocation9 + $0xc] sm:$0x3] }
 0x5cc   : > { %v1681_v47 = vmul.f32 %v1674_v54, %v1667_v10  ;;  %v1713_v1 = vmul.f32 %v1706_v43, %v1699_v2  ;;  %v1746_v25 = vrot.slane %v1737_v37, %v4863_v60  ;;  %v1734_v56 = vsel %vm1203_vm13, %v5858_v57, %v5862_v49  ;;  %v1801_v57 = vld [vmem:[#allocation9 + $0xe] sm:$0x3] }
 0x5cd   : > { %1893 = vmatprep.subr.bf16.mxu1 %v1622_v15  ;;  %v1697_v15 = vsel %vm1165_vm12, %v5848_v16, %v5852_v33  ;;  %v5930_v58 = vpop.permute.xlu0 %1827  ;;  %v1735_v33 = vsel %vm1203_vm13, %v5856_v51, %v5854_v38  ;;  %v1742_v23 = vrot.slane %v1737_v37, %v4869_v4  ;;  %v1768_v21 = vsel %vm1237_vm14, %v5870_v45, %v5866_v34 }
 0x5ce   : > { %1894 = vmatpush1.bf16.msra.mxu1 %v1621_v42  ;;  %v1714_v32 = vmul.f32 %v1710_v55, %v1697_v15  ;;  %v1685_v62 = vpack.c.bf16 %v1683_v19, %v1681_v47  ;;  %v1717_v42 = vpack.c.bf16 %v1715_v48, %v1713_v1  ;;  %v1752_v27 = vmul.f32 %v1746_v25, %v1736_v17 }
 0x5cf   : > { %1895 = vmatprep.subr.bf16.mxu1 %v1654_v14  ;;  %v1733_v14 = vsel %vm1203_vm13, %v5854_v38, %v5856_v51  ;;  %v1750_v46 = vmul.f32 %v1746_v25, %v1735_v33  ;;  %v1778_v54 = vrot.slane %v1769_v44, %v4863_v60  ;;  %v6295_v49 = vpack.c.bf16 %v5676_v36, %v5678_v18  ;;  %v2604_v33 = vld [vmem:[#allocation9] sm:$0x3] }
 0x5d0   : > { %v1718_v0 = vpack.c.bf16 %v1716_v29, %v1714_v32  ;;  %v1751_v10 = vmul.f32 %v1742_v23, %v1734_v56  ;;  %v1767_v39 = vsel %vm1237_vm14, %v5864_v11, %v5860_v40  ;;  %v1766_v38 = vsel %vm1237_vm14, %v5866_v34, %v5870_v45 }
 0x5d1   : > { %v1784_v51 = vmul.f32 %v1778_v54, %v1768_v21  ;;  %v1800_v36 = vsel %vm1271_vm15, %v5887_v3, %v5874_v6  ;;  %v1754_v55 = vpack.c.bf16 %v1752_v27, %v1750_v46  ;;  %v1749_v19 = vmul.f32 %v1742_v23, %v1733_v14 }
 0x5d2   : > { %1896 = vmatpush1.bf16.msra.mxu1 %v1653_v53  ;;  %v1774_v15 = vrot.slane %v1769_v44, %v4869_v4  ;;  %v1810_v53 = vrot.slane %v1801_v57, %v4863_v60  ;;  %v6296_v29 = vpack.c.bf16 %v5674_v35, %v5680_v30  ;;  %v1765_v34 = vsel %vm1237_vm14, %v5860_v40, %v5864_v11 }
 0x5d3   : > { %1897 = vmatprep.subr.bf16.mxu1 %v1686_v26  ;;  %v1782_v45 = vmul.f32 %v1778_v54, %v1767_v39  ;;  %v1799_v26 = vsel %vm1271_vm15, %v5872_v9, %v5868_v59  ;;  %v1753_v32 = vpack.c.bf16 %v1751_v10, %v1749_v19  ;;  %v1806_v35 = vrot.slane %v1801_v57, %v4869_v4 }
 0x5d4   : > { %v1783_v43 = vmul.f32 %v1774_v15, %v1766_v38  ;;  %v1816_v2 = vmul.f32 %v1810_v53, %v1800_v36  ;;  %v1798_v30 = vsel %vm1271_vm15, %v5874_v6, %v5887_v3  ;;  %v1842_v40 = vrot.slane %v1833_v52, %v4863_v60 }
 0x5d5   : > { %v1786_v48 = vpack.c.bf16 %v1784_v51, %v1782_v45  ;;  %v1781_v37 = vmul.f32 %v1774_v15, %v1765_v34  ;;  %v1832_v1 = vsel %vm1305_vm0, %v5930_v58, %v5909_v7  ;;  %v1797_v6 = vsel %vm1271_vm15, %v5868_v59, %v5872_v9 }
 0x5d6   : > { %1898 = vmatpush1.bf16.msra.mxu1 %v1685_v62  ;;  %v1814_v62 = vmul.f32 %v1810_v53, %v1799_v26  ;;  %v1815_v17 = vmul.f32 %v1806_v35, %v1798_v30  ;;  %v1838_v25 = vrot.slane %v1833_v52, %v4869_v4  ;;  %v1829_v56 = vsel %vm1305_vm0, %v5877_v20, %v1826_v50  ;;  %v2668_v52 = vld [vmem:[#allocation9 + $0x4] sm:$0x3] }
 0x5d7   : > { %1899 = vmatprep.subr.bf16.mxu1 %v1718_v0  ;;  %v1831_v0 = vsel %vm1305_vm0, %v1826_v50, %v5877_v20  ;;  %v1785_v44 = vpack.c.bf16 %v1783_v43, %v1781_v37  ;;  %v1830_v23 = vsel %vm1305_vm0, %v5909_v7, %v5930_v58  ;;  %v1848_v21 = vmul.f32 %v1842_v40, %v1832_v1  ;;  %v2636_v7 = vld [vmem:[#allocation9 + $0x2] sm:$0x3] }
 0x5d8   : > { %v5937_v16 = vpop.permute.xlu0 %2594  ;;  %v1846_v27 = vmul.f32 %v1842_v40, %v1831_v0  ;;  %v1813_v9 = vmul.f32 %v1806_v35, %v1797_v6  ;;  %v2613_v46 = vrot.slane %v2604_v33, %v4863_v60  ;;  %v1845_v57 = vmul.f32 %v1838_v25, %v1829_v56  ;;  %v2700_v0 = vld [vmem:[#allocation9 + $0x6] sm:$0x3] }
 0x5d9   : > { %v1847_v20 = vmul.f32 %v1838_v25, %v1830_v23  ;;  %v2609_v51 = vrot.slane %v2604_v33, %v4869_v4  ;;  %v2645_v15 = vrot.slane %v2636_v7, %v4863_v60  ;;  %v2677_v40 = vrot.slane %v2668_v52, %v4863_v60 }
 0x5da   : > { %v5947_v61 = vpop.permute.xlu1 %2592  ;;  %1900 = vmatpush1.bf16.msra.mxu1 %v1717_v42  ;;  %v1818_v42 = vpack.c.bf16 %v1816_v2, %v1814_v62  ;;  %v1817_v58 = vpack.c.bf16 %v1815_v17, %v1813_v9  ;;  %v1850_v38 = vpack.c.bf16 %v1848_v21, %v1846_v27  ;;  %v6040_v2 = vld [vmem:[#allocation25] ss:$8 sps:$4 sm:$0xff]  }
 0x5db   : > { %1901 = vmatprep.subr.bf16.mxu1 %v6295_v49 }
 0x5dc   : > { %v5962_v5 = vpop.permute.xlu0 %2598 }
 0x5dd   : > { %v2601_v50 = vsel %vm1064_vm9, %v5937_v16, %v5962_v5 }
 0x5de   : > { %v2597_v18 = vpop.permute.xlu1 %2596  ;;  %1902 = vmatpush1.bf16.msra.mxu1 %v6296_v29  ;;  %v2619_v19 = vmul.f32 %v2613_v46, %v2601_v50  ;;  %v1849_v29 = vpack.c.bf16 %v1847_v20, %v1845_v57 }
 0x5df   : > { %1903 = vmatprep.subr.bf16.mxu1 %v1754_v55  ;;  %v2600_v14 = vsel %vm1064_vm9, %v5947_v61, %v2597_v18  ;;  %v2602_v49 = vsel %vm1064_vm9, %v2597_v18, %v5947_v61  ;;  %v2603_v55 = vsel %vm1064_vm9, %v5962_v5, %v5937_v16  ;;  %v2641_v5 = vrot.slane %v2636_v7, %v4869_v4 }
 0x5e0   : > { %v5989_v47 = vpop.permute.xlu0 %2626  ;;  %v2617_v10 = vmul.f32 %v2613_v46, %v2600_v14  ;;  %v2616_v61 = vmul.f32 %v2609_v51, %v2602_v49  ;;  %v2618_v16 = vmul.f32 %v2609_v51, %v2603_v55  ;;  %v2705_v46 = vrot.slane %v2700_v0, %v4869_v4 }
 0x5e2   : > { %v2625_v11 = vpop.permute.xlu1 %2624  ;;  %1904 = vmatpush1.bf16.msra.mxu1 %v1753_v32  ;;  %v2621_v43 = vpack.c.bf16 %v2619_v19, %v2617_v10  ;;  %v2736_v10 = vld [vmem:[#allocation9 + $0xa] sm:$0x3] }
 0x5e3   : > { %1905 = vmatprep.subr.bf16.mxu1 %v1786_v48  ;;  %v2620_v48 = vpack.c.bf16 %v2618_v16, %v2616_v61  ;;  %v2741_v61 = vrot.slane %v2736_v10, %v4869_v4 }
 0x5e4   : > { %v2631_v3 = vpop.permute.xlu0 %2630 }
 0x5e5   : > { %v2633_v18 = vsel %vm1097_vm10, %v5989_v47, %v2631_v3  ;;  %v2635_v35 = vsel %vm1097_vm10, %v2631_v3, %v5989_v47  ;;  %v2673_v3 = vrot.slane %v2668_v52, %v4869_v4 }
 0x5e6   : > { %v2629_v59 = vpop.permute.xlu1 %2628  ;;  %1906 = vmatpush1.bf16.msra.mxu1 %v1785_v44  ;;  %v2651_v30 = vmul.f32 %v2645_v15, %v2633_v18  ;;  %v2650_v47 = vmul.f32 %v2641_v5, %v2635_v35 }
 0x5e7   : > { %1907 = vmatprep.subr.bf16.mxu1 %v1818_v42  ;;  %v2632_v36 = vsel %vm1097_vm10, %v2625_v11, %v2629_v59  ;;  %v2634_v34 = vsel %vm1097_vm10, %v2629_v59, %v2625_v11  ;;  %v2709_v42 = vrot.slane %v2700_v0, %v4863_v60 }
 0x5e8   : > { %v2659_v54 = vpop.permute.xlu0 %2658  ;;  %v2649_v45 = vmul.f32 %v2645_v15, %v2632_v36  ;;  %v2648_v37 = vmul.f32 %v2641_v5, %v2634_v34  ;;  %v2745_v36 = vrot.slane %v2736_v10, %v4863_v60  ;;  %v2768_v5 = vld [vmem:[#allocation9 + $0xc] sm:$0x3] }
 0x5ea   : > { %v2657_v39 = vpop.permute.xlu1 %2656  ;;  %1908 = vmatpush1.bf16.msra.mxu1 %v1817_v58  ;;  %v2653_v25 = vpack.c.bf16 %v2651_v30, %v2649_v45  ;;  %v2652_v27 = vpack.c.bf16 %v2650_v47, %v2648_v37 }
 0x5eb   : > { %1909 = vmatprep.subr.bf16.mxu1 %v1850_v38 }
 0x5ec   : > { %v2663_v53 = vpop.permute.xlu0 %2662 }
 0x5ed   : > { %v2665_v62 = vsel %vm1131_vm11, %v2659_v54, %v2663_v53  ;;  %v2667_v33 = vsel %vm1131_vm11, %v2663_v53, %v2659_v54 }
 0x5ee   : > { %v2661_v26 = vpop.permute.xlu1 %2660  ;;  %1910 = vmatpush1.bf16.msra.mxu1 %v1849_v29  ;;  %v2683_v44 = vmul.f32 %v2677_v40, %v2665_v62  ;;  %v2682_v14 = vmul.f32 %v2673_v3, %v2667_v33 }
 0x5ef   : > { %v2664_v32 = vsel %vm1131_vm11, %v2657_v39, %v2661_v26  ;;  %2870 = vmatprep.subr.bf16.mxu1 %v2621_v43  ;;  %v2666_v1 = vsel %vm1131_vm11, %v2661_v26, %v2657_v39  ;;  %v6297_v26 = vpack.c.bf16 %v5772_v41, %v5774_v24 }
 0x5f0   : > { %v2691_v11 = vpop.permute.xlu0 %2690  ;;  %v2681_v6 = vmul.f32 %v2677_v40, %v2664_v32  ;;  %v2680_v23 = vmul.f32 %v2673_v3, %v2666_v1  ;;  %v6298_v40 = vpack.c.bf16 %v5766_v31, %v5770_v63  ;;  %v2800_v3 = vld [vmem:[#allocation9 + $0xe] sm:$0x3] }
 0x5f1   : > { %1926 = vmatmul.mubr.bf16.vlgmr.msra.gmra.mrb[0].mxu1 %v6040_v2 }
 0x5f2   : > { %v2689_v17 = vpop.permute.xlu1 %2688  ;;  %2871 = vmatpush1.bf16.msra.mxu1 %v2620_v48  ;;  %3268 = vmatprep.mubr.msk.bf16.mxu1 %vm1368_vm4, %v5792_v13  ;;  %v2685_v9 = vpack.c.bf16 %v2683_v44, %v2681_v6  ;;  %v2684_v58 = vpack.c.bf16 %v2682_v14, %v2680_v23  ;;  %v2777_v48 = vrot.slane %v2768_v5, %v4863_v60 }
 0x5f3   : > { %2872 = vmatprep.subr.bf16.mxu1 %v2653_v25 }
 0x5f4   : > { %v2695_v56 = vpop.permute.xlu0 %2694 }
 0x5f5   : > { %v2697_v21 = vsel %vm1165_vm12, %v2691_v11, %v2695_v56  ;;  %v2699_v57 = vsel %vm1165_vm12, %v2695_v56, %v2691_v11  ;;  %v2773_v11 = vrot.slane %v2768_v5, %v4869_v4  ;;  %v2805_v56 = vrot.slane %v2800_v3, %v4869_v4 }
 0x5f6   : > { %v2693_v59 = vpop.permute.xlu1 %2692  ;;  %2873 = vmatpush1.bf16.msra.mxu1 %v2652_v27  ;;  %v2715_v20 = vmul.f32 %v2709_v42, %v2697_v21  ;;  %v2714_v51 = vmul.f32 %v2705_v46, %v2699_v57  ;;  %v2809_v27 = vrot.slane %v2800_v3, %v4863_v60 }
 0x5f7   : > { %v2696_v13 = vsel %vm1165_vm12, %v2689_v17, %v2693_v59  ;;  %v2698_v54 = vsel %vm1165_vm12, %v2693_v59, %v2689_v17  ;;  %2874 = vmatprep.subr.bf16.mxu1 %v2685_v9 }
 0x5f8   : > { %v2713_v50 = vmul.f32 %v2709_v42, %v2696_v13  ;;  %v2727_v7 = vpop.permute.xlu0 %2726  ;;  %v2712_v49 = vmul.f32 %v2705_v46, %v2698_v54 }
 0x5fa   : > { %v2725_v39 = vpop.permute.xlu1 %2724  ;;  %v2717_v38 = vpack.c.bf16 %v2715_v20, %v2713_v50  ;;  %2875 = vmatpush1.bf16.msra.mxu1 %v2684_v58  ;;  %v2716_v19 = vpack.c.bf16 %v2714_v51, %v2712_v49 }
 0x5fc   : > { %2876 = vmatprep.subr.bf16.mxu1 %v2717_v38  ;;  %v2731_v55 = vpop.permute.xlu0 %2730 }
 0x5fd   : > { %v2735_v15 = vsel %vm1203_vm13, %v2731_v55, %v2727_v7  ;;  %v2733_v29 = vsel %vm1203_vm13, %v2727_v7, %v2731_v55  ;;  %v2832_v7 = vld [vmem:[#allocation9 + $0x10] sm:$0x3] }
 0x5fe   : > { %v2729_v53 = vpop.permute.xlu1 %2728  ;;  %2877 = vmatpush1.bf16.msra.mxu1 %v2716_v19  ;;  %v2751_v34 = vmul.f32 %v2745_v36, %v2735_v15  ;;  %v2750_v30 = vmul.f32 %v2741_v61, %v2733_v29  ;;  %v2841_v38 = vrot.slane %v2832_v7, %v4863_v60 }
 0x5ff   : > { %v2732_v18 = vsel %vm1203_vm13, %v2725_v39, %v2729_v53  ;;  %v2734_v52 = vsel %vm1203_vm13, %v2729_v53, %v2725_v39  ;;  %2878 = vmatprep.subr.bf16.mxu1 %v6297_v26  ;;  %v2837_v39 = vrot.slane %v2832_v7, %v4869_v4 }
 0x600   : > { %v2749_v45 = vmul.f32 %v2745_v36, %v2734_v52  ;;  %v2759_v43 = vpop.permute.xlu0 %2758  ;;  %v2748_v16 = vmul.f32 %v2741_v61, %v2732_v18 }
 0x602   : > { %v2757_v32 = vpop.permute.xlu1 %2756  ;;  %v2753_v35 = vpack.c.bf16 %v2751_v34, %v2749_v45  ;;  %2879 = vmatpush1.bf16.msra.mxu1 %v6298_v40  ;;  %v2752_v62 = vpack.c.bf16 %v2750_v30, %v2748_v16  ;;  %v3557_v34 = vld [vmem:[%s4721_s21 + $0x38] sm:$0xff]  ;;  %v3558_v45 = vld [vmem:[%s4721_s21 + $0x28] sm:$0xff]  ;;  %v3560_v16 = vld [vmem:[%s4721_s21 + $0x20] sm:$0xff] }
 0x603   : > { %v2914_v26 = vpack.c.bf16 %v3557_v34, %v3558_v45 }
 0x604   : > { %2880 = vmatprep.subr.bf16.mxu1 %v2753_v35  ;;  %v2763_v37 = vpop.permute.xlu0 %2762 }
 0x605   : > { %v2765_v41 = vsel %vm1237_vm14, %v2759_v43, %v2763_v37  ;;  %v2767_v24 = vsel %vm1237_vm14, %v2763_v37, %v2759_v43  ;;  %v3559_v43 = vld [vmem:[%s4721_s21 + $0x30] sm:$0xff] }
 0x606   : > { %v2761_v0 = vpop.permute.xlu1 %2760  ;;  %2881 = vmatpush1.bf16.msra.mxu1 %v2752_v62  ;;  %v2782_v63 = vmul.f32 %v2773_v11, %v2765_v41  ;;  %v2783_v6 = vmul.f32 %v2777_v48, %v2767_v24  ;;  %v2913_v5 = vpack.c.bf16 %v3559_v43, %v3560_v16 }
 0x607   : > { %v2764_v1 = vsel %vm1237_vm14, %v2757_v32, %v2761_v0  ;;  %v2766_v31 = vsel %vm1237_vm14, %v2761_v0, %v2757_v32 }
 0x608   : > { %v2780_v17 = vmul.f32 %v2773_v11, %v2764_v1  ;;  %v2781_v25 = vmul.f32 %v2777_v48, %v2766_v31  ;;  %v2791_v47 = vpop.permute.xlu0 %2790 }
 0x60a   : > { %v2784_v33 = vpack.c.bf16 %v2782_v63, %v2780_v17  ;;  %v2789_v44 = vpop.permute.xlu1 %2788  ;;  %v2785_v42 = vpack.c.bf16 %v2783_v6, %v2781_v25  ;;  %v6300_v6 = vld [vmem:[#allocation49_spill] sm:$0xff] }
 0x60c   : > { %2882 = vmatprep.subr.bf16.mxu1 %v2785_v42  ;;  %v2795_v23 = vpop.permute.xlu0 %2794 }
 0x60d   : > { %v2797_v21 = vsel %vm1271_vm15, %v2791_v47, %v2795_v23  ;;  %v2799_v59 = vsel %vm1271_vm15, %v2795_v23, %v2791_v47  ;;  %2883 = vmatpush1.bf16.msra.mxu1 %v2784_v33 }
 0x60e   : > { %v2793_v9 = vpop.permute.xlu1 %2792  ;;  %v2814_v13 = vmul.f32 %v2805_v56, %v2797_v21  ;;  %v2815_v54 = vmul.f32 %v2809_v27, %v2799_v59 }
 0x60f   : > { %v2796_v14 = vsel %vm1271_vm15, %v2789_v44, %v2793_v9  ;;  %v2798_v46 = vsel %vm1271_vm15, %v2793_v9, %v2789_v44 }
 0x610   : > { %v2812_v57 = vmul.f32 %v2805_v56, %v2796_v14  ;;  %v2813_v20 = vmul.f32 %v2809_v27, %v2798_v46  ;;  %v2823_v50 = vpop.permute.xlu0 %2822 }
 0x612   : > { %v2816_v58 = vpack.c.bf16 %v2814_v13, %v2812_v57  ;;  %v2821_v49 = vpop.permute.xlu1 %2820  ;;  %v2817_v10 = vpack.c.bf16 %v2815_v54, %v2813_v20 }
 0x614   : > { %2884 = vmatprep.subr.bf16.mxu1 %v2817_v10  ;;  %v2827_v51 = vpop.permute.xlu0 %2826 }
 0x615   : > { %v2829_v36 = vsel %vm1305_vm0, %v2823_v50, %v2827_v51  ;;  %v2831_v55 = vsel %vm1305_vm0, %v2827_v51, %v2823_v50  ;;  %2885 = vmatpush1.bf16.msra.mxu1 %v2816_v58 }
 0x616   : > { %v2825_v19 = vpop.permute.xlu1 %2824  ;;  %v2846_v53 = vmul.f32 %v2837_v39, %v2829_v36  ;;  %v2847_v61 = vmul.f32 %v2841_v38, %v2831_v55 }
 0x617   : > { %v2828_v15 = vsel %vm1305_vm0, %v2821_v49, %v2825_v19  ;;  %v2830_v4 = vsel %vm1305_vm0, %v2825_v19, %v2821_v49 }
 0x618   : > { %v2844_v60 = vmul.f32 %v2837_v39, %v2828_v15  ;;  %v2845_v18 = vmul.f32 %v2841_v38, %v2830_v4 }
 0x61a   : > { %v2848_v52 = vpack.c.bf16 %v2846_v53, %v2844_v60  ;;  %v2849_v29 = vpack.c.bf16 %v2847_v61, %v2845_v18 }
 0x61c   : > { %2886 = vmatprep.subr.bf16.mxu1 %v2849_v29 }
 0x61d   : > { %2887 = vmatpush1.bf16.msra.mxu1 %v2848_v52 }
 0x61e   : > { %2915 = vmatprep.subr.bf16.mxu1 %v2914_v26 }
 0x620   : > { %2903 = vmatmul.mubr.bf16.vlgmr.msra.gmra.mrb[4].mxu1 %v6040_v2 }
 0x621   : > { %2916 = vmatpush1.bf16.msra.mxu1 %v2913_v5  ;;  %2947 = vmatprep.mubr.bf16.mxu1 %v6290_v12  ;;  %v6299_v12 = vld [vmem:[#allocation48_spill] sm:$0xff] }
 0x625   : > { %v1879_v11 = vpop.permute.xlu0 %1878 }
 0x627   : > { %v1874_v32 = vpop.permute.xlu1 %1873 }
 0x62c   : > { %3269 = vmatmul.mubr.msk.bf16.vlgmr.msra.gmra.mrb[4].mxu1 %vm1368_vm4, %v3561_v22 }
 0x6c4   : > { %v1927_v35 = vpop.f32.mrb[0].mxu1 }
 0x6c5   : > { %v1928_v30 = vadd.f32 %v1927_v35, %v1874_v32  ;;  %v1929_v40 = vpop.f32.mrb[1].mxu1 }
 0x6c6   : > { %v1930_v48 = vadd.f32 %v1929_v40, %v1874_v32  ;;  %v1931_v37 = vpop.f32.mrb[2].mxu1 }
 0x6c7   : > { %v1981_v62 = vadd.f32 %v5562_v8, %v1928_v30  ;;  %v1932_v41 = vadd.f32 %v1931_v37, %v1879_v11  ;;  %v1933_v24 = vpop.f32.mrb[3].mxu1 }
 0x6c8   : > { %v1983_v2 = vadd.f32 %v5564_v28, %v1930_v48  ;;  %v1934_v0 = vadd.f32 %v1933_v24, %v1879_v11 }
 0x6c9   : > { %v1989_v1 = vmul.f32 0.70710677, %v1981_v62  ;;  %v1985_v31 = vadd.f32 %v6299_v12, %v1932_v41 }
 0x6ca   : > { %v1990_v63 = vmul.f32 0.70710677, %v1983_v2  ;;  %v1987_v17 = vadd.f32 %v6300_v6, %v1934_v0 }
 0x6cb   : > { %1993 = vst [vmem:[%s784_s16] sm:$0xff] %v1989_v1  ;;  %v1991_v25 = vmul.f32 0.70710677, %v1985_v31 }
 0x6cc   : > { %1994 = vst [vmem:[%s784_s16 + $0x8] sm:$0xff] %v1990_v63  ;;  %v1992_v47 = vmul.f32 0.70710677, %v1987_v17 }
 0x6cd   : > { %1995 = vst [vmem:[%s784_s16 + $0x10] sm:$0xff] %v1991_v25 }
 0x6ce   : > { %1996 = vst [vmem:[%s784_s16 + $0x18] sm:$0xff] %v1992_v47 }
 0x6ff   : > { %v2949_v8 = vpop.f32.mrb[4].mxu1 }
 0x700   : > { %v3294_v3 = vadd.f32 %v2949_v8, %v1874_v32  ;;  %v2951_v33 = vpop.f32.mrb[5].mxu1 }
 0x701   : > { %v3295_v28 = vadd.f32 %v2951_v33, %v1874_v32  ;;  %v2953_v44 = vpop.f32.mrb[6].mxu1 }
 0x702   : > { %v2958_v42 = vmul.f32 0.70710677, %v3294_v3  ;;  %v3296_v56 = vadd.f32 %v2953_v44, %v1879_v11  ;;  %v2955_v27 = vpop.f32.mrb[7].mxu1 }
 0x703   : > { %v2959_v23 = vmul.f32 0.70710677, %v3295_v28  ;;  %v3297_v21 = vadd.f32 %v2955_v27, %v1879_v11 }
 0x704   : > { %3270 = vst [vmem:[%s784_s16 + $0x20] sm:$0xff] %v2958_v42  ;;  %v2960_v59 = vmul.f32 0.70710677, %v3296_v56 }
 0x705   : > { %3271 = vst [vmem:[%s784_s16 + $0x28] sm:$0xff] %v2959_v23  ;;  %v2961_v9 = vmul.f32 0.70710677, %v3297_v21 }
 0x706   : > { %3272 = vst [vmem:[%s784_s16 + $0x30] sm:$0xff] %v2960_v59 }
 0x707   : > { %3273 = vst [vmem:[%s784_s16 + $0x38] sm:$0xff] %v2961_v9 }
 0x708   : > { %4027 = shalt.err (!%p4024_p9)
}
 0x709   : > { %s4028_s7 = scalar_lea.hbm %s6134_s8, 1024  ;;  %s4032_s9 = scalar_lea.hbm %s6301_s6, 2048 }
 0x70a   : > { %p4029_p0 = scmp.ne.s32.totalorder %s6134_s8, %s4028_s7  ;;  %p4033_p8 = scmp.lt.u32.totalorder %s6134_s8, %s6301_s6 }
 0x70b   : > { %p4034_p4 = scmp.lt.u32.totalorder %s4032_s9, %s4028_s7  ;;  %p4036_p10 = scmp.lt.u32.totalorder %s4028_s7, %s6134_s8 }
 0x70c   : > { %p4030_p2 = pnand %p4029_p0, %p6302_p1 }
 0x70d   : > { %p4035_p3 = por %p4034_p4, %p4033_p8 }
 0x70e   : > { %p4031_p5 = pneg %p4030_p2 }
 0x70f   : > { %p4037_p11 = por %p4036_p10, %p4035_p3 }
 0x711   : > { %p4038_p12 = pnand %p4037_p11, %p4031_p5 }
 0x713   : > { %4041 = shalt.err (!%p4038_p12)
}
 0x714   : > { %s4154_s18 = smov 256  }
 0x715   : > { %3362 = dma.vmem_to_hbm [thread:$0]  (%p6302_p1), %s6129_s22, 1024, %s6134_s8, %s2968_s29, %s4154_s18, %s4154_s18, %s4146_s26  }
 0x716 PF: > { %s6303_s3 = sld [smem:[#allocation42_spill]]  ;;  %p6304_p6 = scmp.ne.s32.totalorder %s6257_s20, 0 }
 0x717   : > { %p6305_p13 = scmp.ge.s32.totalorder %s4116_s24, 2 }
 0x719   : > { %p3415_p7 = pnand %p6305_p13, %p6304_p6 }
 0x71c   : > { %s2997_s21 = sand.u32 1, %s6303_s3  }
 0x71d   : > { %s2998_s4 = scalar_lea.sflag [#allocation6], %s2997_s21 }
 0x71e   : > { %4099 = dma.done.wait (!%p3415_p7), %s2998_s4, 1024  }
 0x71f   : > { %4101 = vsyncadd (!%p3415_p7), %s2998_s4, 4294966272  ;;  %s6306_s21 = sld [smem:[#allocation43_spill]]  ;;  %s6307_s22 = sld [smem:[#allocation44_spill]] }
 0x720   : > { %p39_p9 = scmp.ge.s32.totalorder %s4592_s28, 4   ;;  %s6308_s23 = smov %s4603_s17 }
 0x721   : > { %s6309_s24 = smov %s4592_s28 }
 0x722   :  { %41 = sbr.rel (!%p39_p9) target bundleno = 26 (0x1a), region = 208 }
 0x729   :  { %3003 = vsyncpa [#allocation5], 1 }
 0x72a   :  { %3005 = vsyncpa [#allocation5 + $0x1], 1 }
 0x72b   :  { %3006 = vsyncpa [#allocation8], 1 }
 0x72c   :  { %3008 = vsyncpa [#allocation8 + $0x1], 1 }
 0x72d   :  { %3009 = vsyncpa [#allocation11], 1 }
 0x72e   :  { %3010 = vsyncpa [#allocation14], 1 }
 0x72f   :  { %3011 = vsyncpa [#allocation17], 1 }
 0x730   :  { %3012 = vsyncpa [#allocation20], 1 }
 0x731   :  { %3013 = vsyncpa [#allocation23], 1 }
 0x732   :  { %3014 = vsyncpa [#allocation26], 1 }
 0x733   :  { %3015 = vsyncpa [#allocation29], 1 }
 0x734   :  { %3016 = vsyncpa [#allocation6], 1 }
 0x735   :  { %3018 = vsyncpa [#allocation6 + $0x1], 1 }

</bundles_post_ra>
